<compile_context>
chip_gen: v7x
topology: tpu7x:2x2x1
jax: 0.10.0
libtpu: 0.0.40
codegen_flags: <defaults>
</compile_context>

<pallas_src>
import functools

import jax
import jax.numpy as jnp
import numpy as np
from jax import lax
from jax.experimental import pallas as pl
from jax.experimental.pallas import tpu as pltpu

EPS = 1e-5
LANE = 128


def _round_up(x, m):
    return (x + m - 1) // m * m


def _nbytes(shape, dtype):
    return int(np.prod(shape)) * np.dtype(dtype).itemsize


def _compiler_params(block_bytes, scratch_bytes=0):
    # Scoped VMEM sized to the real tile footprint (x2 for BlockSpec
    # double-buffering) + headroom, kept well under v7x's 64 MiB physical.
    est = 2 * block_bytes + scratch_bytes + (8 << 20)
    est = max(est, 32 << 20)
    est = min(est, 48 << 20)
    return pltpu.CompilerParams(dimension_semantics=("parallel",),
                                vmem_limit_bytes=int(est))


def _im2col_matmul(src_ref, w_ref, patches_ref, h, w, cin):
    """3x3 / stride-1 conv of a zero-padded (1, h+2, w+2, cin) source.

    Packs the 9 shifted taps (cast to bf16) into patches_ref (h*w, 9*cin) and
    runs one MXU matmul against w_ref (9*cin, cout) with f32 accumulation.
    """
    flat = h * w
    for ky in range(3):
        for kx in range(3):
            t = ky * 3 + kx
            tap = src_ref[:, ky:ky + h, kx:kx + w, :].reshape(flat, cin)
            patches_ref[:, t * cin:(t + 1) * cin] = tap.astype(jnp.bfloat16)
    return jnp.dot(patches_ref[...], w_ref[...],
                   preferred_element_type=jnp.float32)


def _conv1_kernel(x_ref, w_ref, y_ref, s_ref, patches_ref, *, h, w, cin, cout):
    """conv1 on a pre-padded per-image block + BN1 partial statistics."""
    acc = _im2col_matmul(x_ref, w_ref, patches_ref, h, w, cin)   # (h*w, cout) f32
    y_ref[...] = acc.reshape(1, h, w, cout)
    s_ref[:, 0:1, :] = jnp.sum(acc, axis=0, keepdims=True).reshape(1, 1, cout)
    s_ref[:, 1:2, :] = jnp.sum(acc * acc, axis=0,
                               keepdims=True).reshape(1, 1, cout)


def _conv2_kernel(y1_ref, sc_ref, sh_ref, w_ref, y_ref, s_ref,
                  mid_ref, patches_ref, *, h, w, cin, cout):
    """Fused BN1 (single FMA) + ReLU + conv2 + BN2 partial statistics."""
    act = jnp.maximum(y1_ref[...] * sc_ref[...] + sh_ref[...], 0.0)
    # Only the 1-pixel halo of the padded scratch is zeroed (perimeter, not
    # the whole buffer); the interior is the post-activation tile.
    zrow = jnp.zeros((1, 1, w + 2, cin), jnp.float32)
    zcol = jnp.zeros((1, h, 1, cin), jnp.float32)
    mid_ref[:, 0:1, :, :] = zrow
    mid_ref[:, h + 1:h + 2, :, :] = zrow
    mid_ref[:, 1:h + 1, 0:1, :] = zcol
    mid_ref[:, 1:h + 1, w + 1:w + 2, :] = zcol
    mid_ref[:, 1:h + 1, 1:w + 1, :] = act

    acc = _im2col_matmul(mid_ref, w_ref, patches_ref, h, w, cin)
    y_ref[...] = acc.reshape(1, h, w, cout)
    s_ref[:, 0:1, :] = jnp.sum(acc, axis=0, keepdims=True).reshape(1, 1, cout)
    s_ref[:, 1:2, :] = jnp.sum(acc * acc, axis=0,
                               keepdims=True).reshape(1, 1, cout)


def _finalize_kernel(y2_ref, x_ref, sc_ref, sh_ref, o_ref):
    """BN2 as a single FMA + identity residual + final ReLU."""
    o_ref[...] = jnp.maximum(
        y2_ref[...] * sc_ref[...] + sh_ref[...] + x_ref[...], 0.0)


def _bn_fold(stats, gamma, beta, count):
    """Finalize two-phase BN: per-image partial sums -> per-channel FMA."""
    s = jnp.sum(stats, axis=0)                          # (2, C)
    mean = s[0] / count
    var = jnp.maximum(s[1] / count - mean * mean, 0.0)  # biased variance
    scale = gamma * lax.rsqrt(var + EPS)
    shift = beta - mean * scale
    c = scale.shape[0]
    return scale.reshape(1, 1, 1, c), shift.reshape(1, 1, 1, c)


def basic_block_forward(x_nchw, w1_hwio, g1, b1, w2_hwio, g2, b2):
    n, cin, h, w = x_nchw.shape
    cmid = w1_hwio.shape[-1]
    cout = w2_hwio.shape[-1]
    assert cin == cout, "downsample=None requires inplanes == planes"

    cp = _round_up(cin, LANE)    # lane-dense channel padding (inplanes/planes)
    cm = _round_up(cmid, LANE)   # lane-dense channel padding (midplanes)
    f32 = jnp.float32

    x_nhwc = jnp.transpose(x_nchw, (0, 2, 3, 1)).astype(f32)
    x_c = jnp.pad(x_nhwc, ((0, 0), (0, 0), (0, 0), (0, cp - cin)))
    x_pad = jnp.pad(x_c, ((0, 0), (1, 1), (1, 1), (0, 0)))

    # HWIO weights, channel-padded, flattened to (9*Cin_p, Cout_p), bf16 MXU operands.
    w1f = jnp.pad(w1_hwio, ((0, 0), (0, 0), (0, cp - cin), (0, cm - cmid))
                  ).astype(jnp.bfloat16).reshape(9 * cp, cm)
    w2f = jnp.pad(w2_hwio, ((0, 0), (0, 0), (0, cm - cmid), (0, cp - cout))
                  ).astype(jnp.bfloat16).reshape(9 * cm, cp)
    g1p = jnp.pad(g1.astype(f32), (0, cm - cmid))
    b1p = jnp.pad(b1.astype(f32), (0, cm - cmid))
    g2p = jnp.pad(g2.astype(f32), (0, cp - cout))
    b2p = jnp.pad(b2.astype(f32), (0, cp - cout))

    flat = h * w
    count = n * h * w

    # ---- pass 1: conv1 + BN1 partial stats (grid over batch) ---------------
    blk_a = (_nbytes((1, h + 2, w + 2, cp), f32)
             + _nbytes((9 * cp, cm), jnp.bfloat16)
             + _nbytes((1, h, w, cm), f32)
             + _nbytes((1, 2, cm), f32))
    scr_a = _nbytes((flat, 9 * cp), jnp.bfloat16)
    y1, s1 = pl.pallas_call(
        functools.partial(_conv1_kernel, h=h, w=w, cin=cp, cout=cm),
        out_shape=(jax.ShapeDtypeStruct((n, h, w, cm), f32),
                   jax.ShapeDtypeStruct((n, 2, cm), f32)),
        grid_spec=pltpu.PrefetchScalarGridSpec(
            num_scalar_prefetch=0,
            grid=(n,),
            in_specs=[
                pl.BlockSpec((1, h + 2, w + 2, cp), lambda i: (i, 0, 0, 0)),
                pl.BlockSpec((9 * cp, cm), lambda i: (0, 0)),
            ],
            out_specs=[
                pl.BlockSpec((1, h, w, cm), lambda i: (i, 0, 0, 0)),
                pl.BlockSpec((1, 2, cm), lambda i: (i, 0, 0)),
            ],
            scratch_shapes=[pltpu.VMEM((flat, 9 * cp), jnp.bfloat16)]),
        compiler_params=_compiler_params(blk_a, scr_a),
    )(x_pad, w1f)

    sc1, sh1 = _bn_fold(s1, g1p, b1p, count)

    # ---- pass 2: BN1-FMA + ReLU + conv2 + BN2 partial stats ----------------
    blk_b = (_nbytes((1, h, w, cm), f32) + 2 * _nbytes((1, 1, 1, cm), f32)
             + _nbytes((9 * cm, cp), jnp.bfloat16)
             + _nbytes((1, h, w, cp), f32) + _nbytes((1, 2, cp), f32))
    scr_b = (_nbytes((1, h + 2, w + 2, cm), f32)
             + _nbytes((flat, 9 * cm), jnp.bfloat16))
    y2, s2 = pl.pallas_call(
        functools.partial(_conv2_kernel, h=h, w=w, cin=cm, cout=cp),
        out_shape=(jax.ShapeDtypeStruct((n, h, w, cp), f32),
                   jax.ShapeDtypeStruct((n, 2, cp), f32)),
        grid_spec=pltpu.PrefetchScalarGridSpec(
            num_scalar_prefetch=0,
            grid=(n,),
            in_specs=[
                pl.BlockSpec((1, h, w, cm), lambda i: (i, 0, 0, 0)),
                pl.BlockSpec((1, 1, 1, cm), lambda i: (0, 0, 0, 0)),
                pl.BlockSpec((1, 1, 1, cm), lambda i: (0, 0, 0, 0)),
                pl.BlockSpec((9 * cm, cp), lambda i: (0, 0)),
            ],
            out_specs=[
                pl.BlockSpec((1, h, w, cp), lambda i: (i, 0, 0, 0)),
                pl.BlockSpec((1, 2, cp), lambda i: (i, 0, 0)),
            ],
            scratch_shapes=[
                pltpu.VMEM((1, h + 2, w + 2, cm), f32),
                pltpu.VMEM((flat, 9 * cm), jnp.bfloat16)]),
        compiler_params=_compiler_params(blk_b, scr_b),
    )(y1, sc1, sh1, w2f)

    sc2, sh2 = _bn_fold(s2, g2p, b2p, count)

    # ---- pass 3: BN2-FMA + identity residual + ReLU ------------------------
    blk_c = 3 * _nbytes((1, h, w, cp), f32) + 2 * _nbytes((1, 1, 1, cp), f32)
    out_p = pl.pallas_call(
        _finalize_kernel,
        out_shape=jax.ShapeDtypeStruct((n, h, w, cp), f32),
        grid_spec=pltpu.PrefetchScalarGridSpec(
            num_scalar_prefetch=0,
            grid=(n,),
            in_specs=[
                pl.BlockSpec((1, h, w, cp), lambda i: (i, 0, 0, 0)),
                pl.BlockSpec((1, h, w, cp), lambda i: (i, 0, 0, 0)),
                pl.BlockSpec((1, 1, 1, cp), lambda i: (0, 0, 0, 0)),
                pl.BlockSpec((1, 1, 1, cp), lambda i: (0, 0, 0, 0)),
            ],
            out_specs=pl.BlockSpec((1, h, w, cp), lambda i: (i, 0, 0, 0))),
        compiler_params=_compiler_params(blk_c),
    )(y2, x_c, sc2, sh2)

    out = out_p[:, :, :, :cout]
    return jnp.transpose(out, (0, 3, 1, 2))


def _reference_forward(x_nchw, w1_hwio, g1, b1, w2_hwio, g2, b2):
    """Plain-JAX f32 reference mirroring the PyTorch module (NCHW in/out)."""
    x = jnp.transpose(x_nchw, (0, 2, 3, 1))

    def conv(x, w):
        return lax.conv_general_dilated(
            x, w, window_strides=(1, 1), padding=((1, 1), (1, 1)),
            dimension_numbers=("NHWC", "HWIO", "NHWC"))

    def bn(y, g, b):
        m = jnp.mean(y, axis=(0, 1, 2), keepdims=True)
        v = jnp.mean((y - m) ** 2, axis=(0, 1, 2), keepdims=True)
        return ((y - m) / jnp.sqrt(v + EPS) * g.reshape(1, 1, 1, -1)
                + b.reshape(1, 1, 1, -1))

    out = jax.nn.relu(bn(conv(x, w1_hwio), g1, b1))
    out = bn(conv(out, w2_hwio), g2, b2) + x
    out = jax.nn.relu(out)
    return jnp.transpose(out, (0, 3, 1, 2))


if __name__ == "__main__":
    N, C, H, W = 2, 4, 16, 16     # inplanes = planes = 4
    CMID = 8                      # midplanes
    key = jax.random.PRNGKey(0)
    kx, k1, k2, kg1, kb1, kg2, kb2 = jax.random.split(key, 7)

    x = jax.random.normal(kx, (N, C, H, W), dtype=jnp.float32)
    w1 = 0.2 * jax.random.normal(k1, (3, 3, C, CMID), dtype=jnp.float32)   # HWIO
    w2 = 0.2 * jax.random.normal(k2, (3, 3, CMID, C), dtype=jnp.float32)   # HWIO
    gamma1 = 1.0 + 0.1 * jax.random.normal(kg1, (CMID,), dtype=jnp.float32)
    beta1 = 0.1 * jax.random.normal(kb1, (CMID,), dtype=jnp.float32)
    gamma2 = 1.0 + 0.1 * jax.random.normal(kg2, (C,), dtype=jnp.float32)
    beta2 = 0.1 * jax.random.normal(kb2, (C,), dtype=jnp.float32)

    out = jax.block_until_ready(
        jax.jit(basic_block_forward)(x, w1, gamma1, beta1, w2, gamma2, beta2))
    ref = jax.block_until_ready(
        _reference_forward(x, w1, gamma1, beta1, w2, gamma2, beta2))

    assert out.shape == (N, C, H, W)
    # Tolerance accounts for bf16 MXU operands (f32 accumulation) vs the pure
    # f32 reference; a structural bug (tap alignment, BN, residual) would be O(1).
    np.testing.assert_allclose(np.asarray(out), np.asarray(ref),
                               rtol=5e-2, atol=5e-2)
    print("KERNEL_OK")
</pallas_src>

<mosaic_0001>
module attributes {stable_mosaic.version = 11 : i64} {
  func.func @_conv1_kernel(%arg0: i32, %arg1: memref<1x18x18x128xf32, #tpu.memory_space<vmem>>, %arg2: memref<1152x128xbf16, #tpu.memory_space<vmem>>, %arg3: memref<1x16x16x128xf32, #tpu.memory_space<vmem>>, %arg4: memref<1x2x128xf32, #tpu.memory_space<vmem>>, %arg5: memref<256x1152xbf16, #tpu.memory_space<vmem>>) attributes {dimension_semantics = [#tpu.dimension_semantics<parallel>], iteration_bounds = array<i64: 2>, scalar_prefetch = 0 : i64, scratch_operands = 1 : i64, tpu.core_type = #tpu.core_type<tc>, window_params = [{transform_indices = @transform_0, window_bounds = array<i64: 1, 18, 18, 128>}, {pipeline_mode = #tpu.pipeline_mode<synchronous>, transform_indices = @transform_1, window_bounds = array<i64: 1152, 128>}, {transform_indices = @transform_2, window_bounds = array<i64: 1, 16, 16, 128>}, {transform_indices = @transform_3, window_bounds = array<i64: 1, 2, 128>}]} {
    %c0 = arith.constant 0 : index
    %c0_0 = arith.constant 0 : index
    %c0_1 = arith.constant 0 : index
    %c0_2 = arith.constant 0 : index
    %0 = vector.load %arg1[%c0, %c0_0, %c0_1, %c0_2] : memref<1x18x18x128xf32, #tpu.memory_space<vmem>>, vector<1x16x16x128xf32>
    %1 = vector.shape_cast %0 : vector<1x16x16x128xf32> to vector<256x128xf32>
    %2 = arith.truncf %1 : vector<256x128xf32> to vector<256x128xbf16>
    %c0_3 = arith.constant 0 : index
    %c0_4 = arith.constant 0 : index
    %3 = vector.load %arg5[%c0_3, %c0_4] : memref<256x1152xbf16, #tpu.memory_space<vmem>>, vector<256x128xbf16>
    tpu.vector_store %arg5[%c0_3, %c0_4], %2 {strides = array<i32>} : memref<256x1152xbf16, #tpu.memory_space<vmem>>, vector<256x128xbf16>,
    %c0_5 = arith.constant 0 : index
    %c0_6 = arith.constant 0 : index
    %c1 = arith.constant 1 : index
    %c0_7 = arith.constant 0 : index
    %4 = vector.load %arg1[%c0_5, %c0_6, %c1, %c0_7] : memref<1x18x18x128xf32, #tpu.memory_space<vmem>>, vector<1x16x16x128xf32>
    %5 = vector.shape_cast %4 : vector<1x16x16x128xf32> to vector<256x128xf32>
    %6 = arith.truncf %5 : vector<256x128xf32> to vector<256x128xbf16>
    %c0_8 = arith.constant 0 : index
    %c128 = arith.constant 128 : index
    %7 = vector.load %arg5[%c0_8, %c128] : memref<256x1152xbf16, #tpu.memory_space<vmem>>, vector<256x128xbf16>
    tpu.vector_store %arg5[%c0_8, %c128], %6 {strides = array<i32>} : memref<256x1152xbf16, #tpu.memory_space<vmem>>, vector<256x128xbf16>,
    %c0_9 = arith.constant 0 : index
    %c0_10 = arith.constant 0 : index
    %c2 = arith.constant 2 : index
    %c0_11 = arith.constant 0 : index
    %8 = vector.load %arg1[%c0_9, %c0_10, %c2, %c0_11] : memref<1x18x18x128xf32, #tpu.memory_space<vmem>>, vector<1x16x16x128xf32>
    %9 = vector.shape_cast %8 : vector<1x16x16x128xf32> to vector<256x128xf32>
    %10 = arith.truncf %9 : vector<256x128xf32> to vector<256x128xbf16>
    %c0_12 = arith.constant 0 : index
    %c256 = arith.constant 256 : index
    %11 = vector.load %arg5[%c0_12, %c256] : memref<256x1152xbf16, #tpu.memory_space<vmem>>, vector<256x128xbf16>
    tpu.vector_store %arg5[%c0_12, %c256], %10 {strides = array<i32>} : memref<256x1152xbf16, #tpu.memory_space<vmem>>, vector<256x128xbf16>,
    %c0_13 = arith.constant 0 : index
    %c1_14 = arith.constant 1 : index
    %c0_15 = arith.constant 0 : index
    %c0_16 = arith.constant 0 : index
    %12 = vector.load %arg1[%c0_13, %c1_14, %c0_15, %c0_16] : memref<1x18x18x128xf32, #tpu.memory_space<vmem>>, vector<1x16x16x128xf32>
    %13 = vector.shape_cast %12 : vector<1x16x16x128xf32> to vector<256x128xf32>
    %14 = arith.truncf %13 : vector<256x128xf32> to vector<256x128xbf16>
    %c0_17 = arith.constant 0 : index
    %c384 = arith.constant 384 : index
    %15 = vector.load %arg5[%c0_17, %c384] : memref<256x1152xbf16, #tpu.memory_space<vmem>>, vector<256x128xbf16>
    tpu.vector_store %arg5[%c0_17, %c384], %14 {strides = array<i32>} : memref<256x1152xbf16, #tpu.memory_space<vmem>>, vector<256x128xbf16>,
    %c0_18 = arith.constant 0 : index
    %c1_19 = arith.constant 1 : index
    %c1_20 = arith.constant 1 : index
    %c0_21 = arith.constant 0 : index
    %16 = vector.load %arg1[%c0_18, %c1_19, %c1_20, %c0_21] : memref<1x18x18x128xf32, #tpu.memory_space<vmem>>, vector<1x16x16x128xf32>
    %17 = vector.shape_cast %16 : vector<1x16x16x128xf32> to vector<256x128xf32>
    %18 = arith.truncf %17 : vector<256x128xf32> to vector<256x128xbf16>
    %c0_22 = arith.constant 0 : index
    %c512 = arith.constant 512 : index
    %19 = vector.load %arg5[%c0_22, %c512] : memref<256x1152xbf16, #tpu.memory_space<vmem>>, vector<256x128xbf16>
    tpu.vector_store %arg5[%c0_22, %c512], %18 {strides = array<i32>} : memref<256x1152xbf16, #tpu.memory_space<vmem>>, vector<256x128xbf16>,
    %c0_23 = arith.constant 0 : index
    %c1_24 = arith.constant 1 : index
    %c2_25 = arith.constant 2 : index
    %c0_26 = arith.constant 0 : index
    %20 = vector.load %arg1[%c0_23, %c1_24, %c2_25, %c0_26] : memref<1x18x18x128xf32, #tpu.memory_space<vmem>>, vector<1x16x16x128xf32>
    %21 = vector.shape_cast %20 : vector<1x16x16x128xf32> to vector<256x128xf32>
    %22 = arith.truncf %21 : vector<256x128xf32> to vector<256x128xbf16>
    %c0_27 = arith.constant 0 : index
    %c640 = arith.constant 640 : index
    %23 = vector.load %arg5[%c0_27, %c640] : memref<256x1152xbf16, #tpu.memory_space<vmem>>, vector<256x128xbf16>
    tpu.vector_store %arg5[%c0_27, %c640], %22 {strides = array<i32>} : memref<256x1152xbf16, #tpu.memory_space<vmem>>, vector<256x128xbf16>,
    %c0_28 = arith.constant 0 : index
    %c2_29 = arith.constant 2 : index
    %c0_30 = arith.constant 0 : index
    %c0_31 = arith.constant 0 : index
    %24 = vector.load %arg1[%c0_28, %c2_29, %c0_30, %c0_31] : memref<1x18x18x128xf32, #tpu.memory_space<vmem>>, vector<1x16x16x128xf32>
    %25 = vector.shape_cast %24 : vector<1x16x16x128xf32> to vector<256x128xf32>
    %26 = arith.truncf %25 : vector<256x128xf32> to vector<256x128xbf16>
    %c0_32 = arith.constant 0 : index
    %c768 = arith.constant 768 : index
    %27 = vector.load %arg5[%c0_32, %c768] : memref<256x1152xbf16, #tpu.memory_space<vmem>>, vector<256x128xbf16>
    tpu.vector_store %arg5[%c0_32, %c768], %26 {strides = array<i32>} : memref<256x1152xbf16, #tpu.memory_space<vmem>>, vector<256x128xbf16>,
    %c0_33 = arith.constant 0 : index
    %c2_34 = arith.constant 2 : index
    %c1_35 = arith.constant 1 : index
    %c0_36 = arith.constant 0 : index
    %28 = vector.load %arg1[%c0_33, %c2_34, %c1_35, %c0_36] : memref<1x18x18x128xf32, #tpu.memory_space<vmem>>, vector<1x16x16x128xf32>
    %29 = vector.shape_cast %28 : vector<1x16x16x128xf32> to vector<256x128xf32>
    %30 = arith.truncf %29 : vector<256x128xf32> to vector<256x128xbf16>
    %c0_37 = arith.constant 0 : index
    %c896 = arith.constant 896 : index
    %31 = vector.load %arg5[%c0_37, %c896] : memref<256x1152xbf16, #tpu.memory_space<vmem>>, vector<256x128xbf16>
    tpu.vector_store %arg5[%c0_37, %c896], %30 {strides = array<i32>} : memref<256x1152xbf16, #tpu.memory_space<vmem>>, vector<256x128xbf16>,
    %c0_38 = arith.constant 0 : index
    %c2_39 = arith.constant 2 : index
    %c2_40 = arith.constant 2 : index
    %c0_41 = arith.constant 0 : index
    %32 = vector.load %arg1[%c0_38, %c2_39, %c2_40, %c0_41] : memref<1x18x18x128xf32, #tpu.memory_space<vmem>>, vector<1x16x16x128xf32>
    %33 = vector.shape_cast %32 : vector<1x16x16x128xf32> to vector<256x128xf32>
    %34 = arith.truncf %33 : vector<256x128xf32> to vector<256x128xbf16>
    %c0_42 = arith.constant 0 : index
    %c1024 = arith.constant 1024 : index
    %35 = vector.load %arg5[%c0_42, %c1024] : memref<256x1152xbf16, #tpu.memory_space<vmem>>, vector<256x128xbf16>
    tpu.vector_store %arg5[%c0_42, %c1024], %34 {strides = array<i32>} : memref<256x1152xbf16, #tpu.memory_space<vmem>>, vector<256x128xbf16>,
    %c0_43 = arith.constant 0 : index
    %c0_44 = arith.constant 0 : index
    %36 = vector.load %arg5[%c0_43, %c0_44] : memref<256x1152xbf16, #tpu.memory_space<vmem>>, vector<256x1152xbf16>
    %c0_45 = arith.constant 0 : index
    %c0_46 = arith.constant 0 : index
    %37 = vector.load %arg2[%c0_45, %c0_46] : memref<1152x128xbf16, #tpu.memory_space<vmem>>, vector<1152x128xbf16>
    %cst = arith.constant dense<0.000000e+00> : vector<256x128xf32>
    %38 = tpu.matmul %36, %37, %cst {dimension_numbers = #tpu.dot_dimension_numbers<[1], [0], [0], [1], [0, 0, 1, 1], [], []>} : vector<256x1152xbf16>, vector<1152x128xbf16>, vector<256x128xf32> -> vector<256x128xf32>
    %39 = vector.shape_cast %38 : vector<256x128xf32> to vector<1x16x16x128xf32>
    %c0_47 = arith.constant 0 : index
    %c0_48 = arith.constant 0 : index
    %c0_49 = arith.constant 0 : index
    %c0_50 = arith.constant 0 : index
    %40 = vector.load %arg3[%c0_47, %c0_48, %c0_49, %c0_50] : memref<1x16x16x128xf32, #tpu.memory_space<vmem>>, vector<1x16x16x128xf32>
    tpu.vector_store %arg3[%c0_47, %c0_48, %c0_49, %c0_50], %39 {strides = array<i32>} : memref<1x16x16x128xf32, #tpu.memory_space<vmem>>, vector<1x16x16x128xf32>,
    %cst_51 = arith.constant dense<0.000000e+00> : vector<128xf32>
    %41 = vector.multi_reduction <add>, %38, %cst_51 [0] : vector<256x128xf32> to vector<128xf32>
    %42 = vector.shape_cast %41 : vector<128xf32> to vector<1x128xf32>
    %43 = vector.shape_cast %42 : vector<1x128xf32> to vector<1x1x128xf32>
    %c0_52 = arith.constant 0 : index
    %c0_53 = arith.constant 0 : index
    %c0_54 = arith.constant 0 : index
    %44 = vector.load %arg4[%c0_52, %c0_53, %c0_54] : memref<1x2x128xf32, #tpu.memory_space<vmem>>, vector<1x1x128xf32>
    tpu.vector_store %arg4[%c0_52, %c0_53, %c0_54], %43 {strides = array<i32>} : memref<1x2x128xf32, #tpu.memory_space<vmem>>, vector<1x1x128xf32>,
    %45 = arith.mulf %38, %38 : vector<256x128xf32>
    %cst_55 = arith.constant dense<0.000000e+00> : vector<128xf32>
    %46 = vector.multi_reduction <add>, %45, %cst_55 [0] : vector<256x128xf32> to vector<128xf32>
    %47 = vector.shape_cast %46 : vector<128xf32> to vector<1x128xf32>
    %48 = vector.shape_cast %47 : vector<1x128xf32> to vector<1x1x128xf32>
    %c0_56 = arith.constant 0 : index
    %c1_57 = arith.constant 1 : index
    %c0_58 = arith.constant 0 : index
    %49 = vector.load %arg4[%c0_56, %c1_57, %c0_58] : memref<1x2x128xf32, #tpu.memory_space<vmem>>, vector<1x1x128xf32>
    tpu.vector_store %arg4[%c0_56, %c1_57, %c0_58], %48 {strides = array<i32>} : memref<1x2x128xf32, #tpu.memory_space<vmem>>, vector<1x1x128xf32>,
    return
  }
  func.func @transform_0(%arg0: i32) -> (i32, i32, i32, i32) {
    %c0_i32 = arith.constant 0 : i32
    %c0_i32_0 = arith.constant 0 : i32
    %c0_i32_1 = arith.constant 0 : i32
    %c0_i32_2 = arith.constant 0 : i32
    return %arg0, %c0_i32, %c0_i32_0, %c0_i32_1 : i32, i32, i32, i32
  }
  func.func @transform_1(%arg0: i32) -> (i32, i32) {
    %c0_i32 = arith.constant 0 : i32
    %c0_i32_0 = arith.constant 0 : i32
    %c0_i32_1 = arith.constant 0 : i32
    return %c0_i32, %c0_i32_0 : i32, i32
  }
  func.func @transform_2(%arg0: i32) -> (i32, i32, i32, i32) {
    %c0_i32 = arith.constant 0 : i32
    %c0_i32_0 = arith.constant 0 : i32
    %c0_i32_1 = arith.constant 0 : i32
    %c0_i32_2 = arith.constant 0 : i32
    return %arg0, %c0_i32, %c0_i32_0, %c0_i32_1 : i32, i32, i32, i32
  }
  func.func @transform_3(%arg0: i32) -> (i32, i32, i32) {
    %c0_i32 = arith.constant 0 : i32
    %c0_i32_0 = arith.constant 0 : i32
    %c0_i32_1 = arith.constant 0 : i32
    return %arg0, %c0_i32, %c0_i32_0 : i32, i32, i32
  }
}

module attributes {stable_mosaic.version = 11 : i64} {
  func.func @_conv2_kernel(%arg0: i32, %arg1: memref<1x16x16x128xf32, #tpu.memory_space<vmem>>, %arg2: memref<1x1x1x128xf32, #tpu.memory_space<vmem>>, %arg3: memref<1x1x1x128xf32, #tpu.memory_space<vmem>>, %arg4: memref<1152x128xbf16, #tpu.memory_space<vmem>>, %arg5: memref<1x16x16x128xf32, #tpu.memory_space<vmem>>, %arg6: memref<1x2x128xf32, #tpu.memory_space<vmem>>, %arg7: memref<1x18x18x128xf32, #tpu.memory_space<vmem>>, %arg8: memref<256x1152xbf16, #tpu.memory_space<vmem>>) attributes {dimension_semantics = [#tpu.dimension_semantics<parallel>], iteration_bounds = array<i64: 2>, scalar_prefetch = 0 : i64, scratch_operands = 2 : i64, tpu.core_type = #tpu.core_type<tc>, window_params = [{transform_indices = @transform_0, window_bounds = array<i64: 1, 16, 16, 128>}, {pipeline_mode = #tpu.pipeline_mode<synchronous>, transform_indices = @transform_1, window_bounds = array<i64: 1, 1, 1, 128>}, {pipeline_mode = #tpu.pipeline_mode<synchronous>, transform_indices = @transform_2, window_bounds = array<i64: 1, 1, 1, 128>}, {pipeline_mode = #tpu.pipeline_mode<synchronous>, transform_indices = @transform_3, window_bounds = array<i64: 1152, 128>}, {transform_indices = @transform_4, window_bounds = array<i64: 1, 16, 16, 128>}, {transform_indices = @transform_5, window_bounds = array<i64: 1, 2, 128>}]} {
    %c0 = arith.constant 0 : index
    %c0_0 = arith.constant 0 : index
    %c0_1 = arith.constant 0 : index
    %c0_2 = arith.constant 0 : index
    %0 = vector.load %arg1[%c0, %c0_0, %c0_1, %c0_2] : memref<1x16x16x128xf32, #tpu.memory_space<vmem>>, vector<1x16x16x128xf32>
    %c0_3 = arith.constant 0 : index
    %c0_4 = arith.constant 0 : index
    %c0_5 = arith.constant 0 : index
    %c0_6 = arith.constant 0 : index
    %1 = vector.load %arg2[%c0_3, %c0_4, %c0_5, %c0_6] : memref<1x1x1x128xf32, #tpu.memory_space<vmem>>, vector<1x1x1x128xf32>
    %2 = vector.broadcast %1 : vector<1x1x1x128xf32> to vector<1x16x16x128xf32>
    %3 = arith.mulf %0, %2 : vector<1x16x16x128xf32>
    %c0_7 = arith.constant 0 : index
    %c0_8 = arith.constant 0 : index
    %c0_9 = arith.constant 0 : index
    %c0_10 = arith.constant 0 : index
    %4 = vector.load %arg3[%c0_7, %c0_8, %c0_9, %c0_10] : memref<1x1x1x128xf32, #tpu.memory_space<vmem>>, vector<1x1x1x128xf32>
    %5 = vector.broadcast %4 : vector<1x1x1x128xf32> to vector<1x16x16x128xf32>
    %6 = arith.addf %3, %5 : vector<1x16x16x128xf32>
    %cst = arith.constant 0.000000e+00 : f32
    %7 = vector.broadcast %cst : f32 to vector<1x16x16x128xf32>
    %8 = arith.maximumf %6, %7 : vector<1x16x16x128xf32>
    %cst_11 = arith.constant 0.000000e+00 : f32
    %9 = vector.broadcast %cst_11 : f32 to vector<1x1x18x128xf32>
    %cst_12 = arith.constant 0.000000e+00 : f32
    %10 = vector.broadcast %cst_12 : f32 to vector<1x16x1x128xf32>
    %c0_13 = arith.constant 0 : index
    %c0_14 = arith.constant 0 : index
    %c0_15 = arith.constant 0 : index
    %c0_16 = arith.constant 0 : index
    %11 = vector.load %arg7[%c0_13, %c0_14, %c0_15, %c0_16] : memref<1x18x18x128xf32, #tpu.memory_space<vmem>>, vector<1x1x18x128xf32>
    tpu.vector_store %arg7[%c0_13, %c0_14, %c0_15, %c0_16], %9 {strides = array<i32>} : memref<1x18x18x128xf32, #tpu.memory_space<vmem>>, vector<1x1x18x128xf32>,
    %c0_17 = arith.constant 0 : index
    %c17 = arith.constant 17 : index
    %c0_18 = arith.constant 0 : index
    %c0_19 = arith.constant 0 : index
    %12 = vector.load %arg7[%c0_17, %c17, %c0_18, %c0_19] : memref<1x18x18x128xf32, #tpu.memory_space<vmem>>, vector<1x1x18x128xf32>
    tpu.vector_store %arg7[%c0_17, %c17, %c0_18, %c0_19], %9 {strides = array<i32>} : memref<1x18x18x128xf32, #tpu.memory_space<vmem>>, vector<1x1x18x128xf32>,
    %c0_20 = arith.constant 0 : index
    %c1 = arith.constant 1 : index
    %c0_21 = arith.constant 0 : index
    %c0_22 = arith.constant 0 : index
    %13 = vector.load %arg7[%c0_20, %c1, %c0_21, %c0_22] : memref<1x18x18x128xf32, #tpu.memory_space<vmem>>, vector<1x16x1x128xf32>
    tpu.vector_store %arg7[%c0_20, %c1, %c0_21, %c0_22], %10 {strides = array<i32>} : memref<1x18x18x128xf32, #tpu.memory_space<vmem>>, vector<1x16x1x128xf32>,
    %c0_23 = arith.constant 0 : index
    %c1_24 = arith.constant 1 : index
    %c17_25 = arith.constant 17 : index
    %c0_26 = arith.constant 0 : index
    %14 = vector.load %arg7[%c0_23, %c1_24, %c17_25, %c0_26] : memref<1x18x18x128xf32, #tpu.memory_space<vmem>>, vector<1x16x1x128xf32>
    tpu.vector_store %arg7[%c0_23, %c1_24, %c17_25, %c0_26], %10 {strides = array<i32>} : memref<1x18x18x128xf32, #tpu.memory_space<vmem>>, vector<1x16x1x128xf32>,
    %c0_27 = arith.constant 0 : index
    %c1_28 = arith.constant 1 : index
    %c1_29 = arith.constant 1 : index
    %c0_30 = arith.constant 0 : index
    %15 = vector.load %arg7[%c0_27, %c1_28, %c1_29, %c0_30] : memref<1x18x18x128xf32, #tpu.memory_space<vmem>>, vector<1x16x16x128xf32>
    tpu.vector_store %arg7[%c0_27, %c1_28, %c1_29, %c0_30], %8 {strides = array<i32>} : memref<1x18x18x128xf32, #tpu.memory_space<vmem>>, vector<1x16x16x128xf32>,
    %c0_31 = arith.constant 0 : index
    %c0_32 = arith.constant 0 : index
    %c0_33 = arith.constant 0 : index
    %c0_34 = arith.constant 0 : index
    %16 = vector.load %arg7[%c0_31, %c0_32, %c0_33, %c0_34] : memref<1x18x18x128xf32, #tpu.memory_space<vmem>>, vector<1x16x16x128xf32>
    %17 = vector.shape_cast %16 : vector<1x16x16x128xf32> to vector<256x128xf32>
    %18 = arith.truncf %17 : vector<256x128xf32> to vector<256x128xbf16>
    %c0_35 = arith.constant 0 : index
    %c0_36 = arith.constant 0 : index
    %19 = vector.load %arg8[%c0_35, %c0_36] : memref<256x1152xbf16, #tpu.memory_space<vmem>>, vector<256x128xbf16>
    tpu.vector_store %arg8[%c0_35, %c0_36], %18 {strides = array<i32>} : memref<256x1152xbf16, #tpu.memory_space<vmem>>, vector<256x128xbf16>,
    %c0_37 = arith.constant 0 : index
    %c0_38 = arith.constant 0 : index
    %c1_39 = arith.constant 1 : index
    %c0_40 = arith.constant 0 : index
    %20 = vector.load %arg7[%c0_37, %c0_38, %c1_39, %c0_40] : memref<1x18x18x128xf32, #tpu.memory_space<vmem>>, vector<1x16x16x128xf32>
    %21 = vector.shape_cast %20 : vector<1x16x16x128xf32> to vector<256x128xf32>
    %22 = arith.truncf %21 : vector<256x128xf32> to vector<256x128xbf16>
    %c0_41 = arith.constant 0 : index
    %c128 = arith.constant 128 : index
    %23 = vector.load %arg8[%c0_41, %c128] : memref<256x1152xbf16, #tpu.memory_space<vmem>>, vector<256x128xbf16>
    tpu.vector_store %arg8[%c0_41, %c128], %22 {strides = array<i32>} : memref<256x1152xbf16, #tpu.memory_space<vmem>>, vector<256x128xbf16>,
    %c0_42 = arith.constant 0 : index
    %c0_43 = arith.constant 0 : index
    %c2 = arith.constant 2 : index
    %c0_44 = arith.constant 0 : index
    %24 = vector.load %arg7[%c0_42, %c0_43, %c2, %c0_44] : memref<1x18x18x128xf32, #tpu.memory_space<vmem>>, vector<1x16x16x128xf32>
    %25 = vector.shape_cast %24 : vector<1x16x16x128xf32> to vector<256x128xf32>
    %26 = arith.truncf %25 : vector<256x128xf32> to vector<256x128xbf16>
    %c0_45 = arith.constant 0 : index
    %c256 = arith.constant 256 : index
    %27 = vector.load %arg8[%c0_45, %c256] : memref<256x1152xbf16, #tpu.memory_space<vmem>>, vector<256x128xbf16>
    tpu.vector_store %arg8[%c0_45, %c256], %26 {strides = array<i32>} : memref<256x1152xbf16, #tpu.memory_space<vmem>>, vector<256x128xbf16>,
    %c0_46 = arith.constant 0 : index
    %c1_47 = arith.constant 1 : index
    %c0_48 = arith.constant 0 : index
    %c0_49 = arith.constant 0 : index
    %28 = vector.load %arg7[%c0_46, %c1_47, %c0_48, %c0_49] : memref<1x18x18x128xf32, #tpu.memory_space<vmem>>, vector<1x16x16x128xf32>
    %29 = vector.shape_cast %28 : vector<1x16x16x128xf32> to vector<256x128xf32>
    %30 = arith.truncf %29 : vector<256x128xf32> to vector<256x128xbf16>
    %c0_50 = arith.constant 0 : index
    %c384 = arith.constant 384 : index
    %31 = vector.load %arg8[%c0_50, %c384] : memref<256x1152xbf16, #tpu.memory_space<vmem>>, vector<256x128xbf16>
    tpu.vector_store %arg8[%c0_50, %c384], %30 {strides = array<i32>} : memref<256x1152xbf16, #tpu.memory_space<vmem>>, vector<256x128xbf16>,
    %c0_51 = arith.constant 0 : index
    %c1_52 = arith.constant 1 : index
    %c1_53 = arith.constant 1 : index
    %c0_54 = arith.constant 0 : index
    %32 = vector.load %arg7[%c0_51, %c1_52, %c1_53, %c0_54] : memref<1x18x18x128xf32, #tpu.memory_space<vmem>>, vector<1x16x16x128xf32>
    %33 = vector.shape_cast %32 : vector<1x16x16x128xf32> to vector<256x128xf32>
    %34 = arith.truncf %33 : vector<256x128xf32> to vector<256x128xbf16>
    %c0_55 = arith.constant 0 : index
    %c512 = arith.constant 512 : index
    %35 = vector.load %arg8[%c0_55, %c512] : memref<256x1152xbf16, #tpu.memory_space<vmem>>, vector<256x128xbf16>
    tpu.vector_store %arg8[%c0_55, %c512], %34 {strides = array<i32>} : memref<256x1152xbf16, #tpu.memory_space<vmem>>, vector<256x128xbf16>,
    %c0_56 = arith.constant 0 : index
    %c1_57 = arith.constant 1 : index
    %c2_58 = arith.constant 2 : index
    %c0_59 = arith.constant 0 : index
    %36 = vector.load %arg7[%c0_56, %c1_57, %c2_58, %c0_59] : memref<1x18x18x128xf32, #tpu.memory_space<vmem>>, vector<1x16x16x128xf32>
    %37 = vector.shape_cast %36 : vector<1x16x16x128xf32> to vector<256x128xf32>
    %38 = arith.truncf %37 : vector<256x128xf32> to vector<256x128xbf16>
    %c0_60 = arith.constant 0 : index
    %c640 = arith.constant 640 : index
    %39 = vector.load %arg8[%c0_60, %c640] : memref<256x1152xbf16, #tpu.memory_space<vmem>>, vector<256x128xbf16>
    tpu.vector_store %arg8[%c0_60, %c640], %38 {strides = array<i32>} : memref<256x1152xbf16, #tpu.memory_space<vmem>>, vector<256x128xbf16>,
    %c0_61 = arith.constant 0 : index
    %c2_62 = arith.constant 2 : index
    %c0_63 = arith.constant 0 : index
    %c0_64 = arith.constant 0 : index
    %40 = vector.load %arg7[%c0_61, %c2_62, %c0_63, %c0_64] : memref<1x18x18x128xf32, #tpu.memory_space<vmem>>, vector<1x16x16x128xf32>
    %41 = vector.shape_cast %40 : vector<1x16x16x128xf32> to vector<256x128xf32>
    %42 = arith.truncf %41 : vector<256x128xf32> to vector<256x128xbf16>
    %c0_65 = arith.constant 0 : index
    %c768 = arith.constant 768 : index
    %43 = vector.load %arg8[%c0_65, %c768] : memref<256x1152xbf16, #tpu.memory_space<vmem>>, vector<256x128xbf16>
    tpu.vector_store %arg8[%c0_65, %c768], %42 {strides = array<i32>} : memref<256x1152xbf16, #tpu.memory_space<vmem>>, vector<256x128xbf16>,
    %c0_66 = arith.constant 0 : index
    %c2_67 = arith.constant 2 : index
    %c1_68 = arith.constant 1 : index
    %c0_69 = arith.constant 0 : index
    %44 = vector.load %arg7[%c0_66, %c2_67, %c1_68, %c0_69] : memref<1x18x18x128xf32, #tpu.memory_space<vmem>>, vector<1x16x16x128xf32>
    %45 = vector.shape_cast %44 : vector<1x16x16x128xf32> to vector<256x128xf32>
    %46 = arith.truncf %45 : vector<256x128xf32> to vector<256x128xbf16>
    %c0_70 = arith.constant 0 : index
    %c896 = arith.constant 896 : index
    %47 = vector.load %arg8[%c0_70, %c896] : memref<256x1152xbf16, #tpu.memory_space<vmem>>, vector<256x128xbf16>
    tpu.vector_store %arg8[%c0_70, %c896], %46 {strides = array<i32>} : memref<256x1152xbf16, #tpu.memory_space<vmem>>, vector<256x128xbf16>,
    %c0_71 = arith.constant 0 : index
    %c2_72 = arith.constant 2 : index
    %c2_73 = arith.constant 2 : index
    %c0_74 = arith.constant 0 : index
    %48 = vector.load %arg7[%c0_71, %c2_72, %c2_73, %c0_74] : memref<1x18x18x128xf32, #tpu.memory_space<vmem>>, vector<1x16x16x128xf32>
    %49 = vector.shape_cast %48 : vector<1x16x16x128xf32> to vector<256x128xf32>
    %50 = arith.truncf %49 : vector<256x128xf32> to vector<256x128xbf16>
    %c0_75 = arith.constant 0 : index
    %c1024 = arith.constant 1024 : index
    %51 = vector.load %arg8[%c0_75, %c1024] : memref<256x1152xbf16, #tpu.memory_space<vmem>>, vector<256x128xbf16>
    tpu.vector_store %arg8[%c0_75, %c1024], %50 {strides = array<i32>} : memref<256x1152xbf16, #tpu.memory_space<vmem>>, vector<256x128xbf16>,
    %c0_76 = arith.constant 0 : index
    %c0_77 = arith.constant 0 : index
    %52 = vector.load %arg8[%c0_76, %c0_77] : memref<256x1152xbf16, #tpu.memory_space<vmem>>, vector<256x1152xbf16>
    %c0_78 = arith.constant 0 : index
    %c0_79 = arith.constant 0 : index
    %53 = vector.load %arg4[%c0_78, %c0_79] : memref<1152x128xbf16, #tpu.memory_space<vmem>>, vector<1152x128xbf16>
    %cst_80 = arith.constant dense<0.000000e+00> : vector<256x128xf32>
    %54 = tpu.matmul %52, %53, %cst_80 {dimension_numbers = #tpu.dot_dimension_numbers<[1], [0], [0], [1], [0, 0, 1, 1], [], []>} : vector<256x1152xbf16>, vector<1152x128xbf16>, vector<256x128xf32> -> vector<256x128xf32>
    %55 = vector.shape_cast %54 : vector<256x128xf32> to vector<1x16x16x128xf32>
    %c0_81 = arith.constant 0 : index
    %c0_82 = arith.constant 0 : index
    %c0_83 = arith.constant 0 : index
    %c0_84 = arith.constant 0 : index
    %56 = vector.load %arg5[%c0_81, %c0_82, %c0_83, %c0_84] : memref<1x16x16x128xf32, #tpu.memory_space<vmem>>, vector<1x16x16x128xf32>
    tpu.vector_store %arg5[%c0_81, %c0_82, %c0_83, %c0_84], %55 {strides = array<i32>} : memref<1x16x16x128xf32, #tpu.memory_space<vmem>>, vector<1x16x16x128xf32>,
    %cst_85 = arith.constant dense<0.000000e+00> : vector<128xf32>
    %57 = vector.multi_reduction <add>, %54, %cst_85 [0] : vector<256x128xf32> to vector<128xf32>
    %58 = vector.shape_cast %57 : vector<128xf32> to vector<1x128xf32>
    %59 = vector.shape_cast %58 : vector<1x128xf32> to vector<1x1x128xf32>
    %c0_86 = arith.constant 0 : index
    %c0_87 = arith.constant 0 : index
    %c0_88 = arith.constant 0 : index
    %60 = vector.load %arg6[%c0_86, %c0_87, %c0_88] : memref<1x2x128xf32, #tpu.memory_space<vmem>>, vector<1x1x128xf32>
    tpu.vector_store %arg6[%c0_86, %c0_87, %c0_88], %59 {strides = array<i32>} : memref<1x2x128xf32, #tpu.memory_space<vmem>>, vector<1x1x128xf32>,
    %61 = arith.mulf %54, %54 : vector<256x128xf32>
    %cst_89 = arith.constant dense<0.000000e+00> : vector<128xf32>
    %62 = vector.multi_reduction <add>, %61, %cst_89 [0] : vector<256x128xf32> to vector<128xf32>
    %63 = vector.shape_cast %62 : vector<128xf32> to vector<1x128xf32>
    %64 = vector.shape_cast %63 : vector<1x128xf32> to vector<1x1x128xf32>
    %c0_90 = arith.constant 0 : index
    %c1_91 = arith.constant 1 : index
    %c0_92 = arith.constant 0 : index
    %65 = vector.load %arg6[%c0_90, %c1_91, %c0_92] : memref<1x2x128xf32, #tpu.memory_space<vmem>>, vector<1x1x128xf32>
    tpu.vector_store %arg6[%c0_90, %c1_91, %c0_92], %64 {strides = array<i32>} : memref<1x2x128xf32, #tpu.memory_space<vmem>>, vector<1x1x128xf32>,
    return
  }
  func.func @transform_0(%arg0: i32) -> (i32, i32, i32, i32) {
    %c0_i32 = arith.constant 0 : i32
    %c0_i32_0 = arith.constant 0 : i32
    %c0_i32_1 = arith.constant 0 : i32
    %c0_i32_2 = arith.constant 0 : i32
    return %arg0, %c0_i32, %c0_i32_0, %c0_i32_1 : i32, i32, i32, i32
  }
  func.func @transform_1(%arg0: i32) -> (i32, i32, i32, i32) {
    %c0_i32 = arith.constant 0 : i32
    %c0_i32_0 = arith.constant 0 : i32
    %c0_i32_1 = arith.constant 0 : i32
    %c0_i32_2 = arith.constant 0 : i32
    %c0_i32_3 = arith.constant 0 : i32
    return %c0_i32, %c0_i32_0, %c0_i32_1, %c0_i32_2 : i32, i32, i32, i32
  }
  func.func @transform_2(%arg0: i32) -> (i32, i32, i32, i32) {
    %c0_i32 = arith.constant 0 : i32
    %c0_i32_0 = arith.constant 0 : i32
    %c0_i32_1 = arith.constant 0 : i32
    %c0_i32_2 = arith.constant 0 : i32
    %c0_i32_3 = arith.constant 0 : i32
    return %c0_i32, %c0_i32_0, %c0_i32_1, %c0_i32_2 : i32, i32, i32, i32
  }
  func.func @transform_3(%arg0: i32) -> (i32, i32) {
    %c0_i32 = arith.constant 0 : i32
    %c0_i32_0 = arith.constant 0 : i32
    %c0_i32_1 = arith.constant 0 : i32
    return %c0_i32, %c0_i32_0 : i32, i32
  }
  func.func @transform_4(%arg0: i32) -> (i32, i32, i32, i32) {
    %c0_i32 = arith.constant 0 : i32
    %c0_i32_0 = arith.constant 0 : i32
    %c0_i32_1 = arith.constant 0 : i32
    %c0_i32_2 = arith.constant 0 : i32
    return %arg0, %c0_i32, %c0_i32_0, %c0_i32_1 : i32, i32, i32, i32
  }
  func.func @transform_5(%arg0: i32) -> (i32, i32, i32) {
    %c0_i32 = arith.constant 0 : i32
    %c0_i32_0 = arith.constant 0 : i32
    %c0_i32_1 = arith.constant 0 : i32
    return %arg0, %c0_i32, %c0_i32_0 : i32, i32, i32
  }
}

module attributes {stable_mosaic.version = 11 : i64} {
  func.func @_finalize_kernel(%arg0: i32, %arg1: memref<1x16x16x128xf32, #tpu.memory_space<vmem>>, %arg2: memref<1x16x16x128xf32, #tpu.memory_space<vmem>>, %arg3: memref<1x1x1x128xf32, #tpu.memory_space<vmem>>, %arg4: memref<1x1x1x128xf32, #tpu.memory_space<vmem>>, %arg5: memref<1x16x16x128xf32, #tpu.memory_space<vmem>>) attributes {dimension_semantics = [#tpu.dimension_semantics<parallel>], iteration_bounds = array<i64: 2>, scalar_prefetch = 0 : i64, scratch_operands = 0 : i64, tpu.core_type = #tpu.core_type<tc>, window_params = [{transform_indices = @transform_0, window_bounds = array<i64: 1, 16, 16, 128>}, {transform_indices = @transform_1, window_bounds = array<i64: 1, 16, 16, 128>}, {pipeline_mode = #tpu.pipeline_mode<synchronous>, transform_indices = @transform_2, window_bounds = array<i64: 1, 1, 1, 128>}, {pipeline_mode = #tpu.pipeline_mode<synchronous>, transform_indices = @transform_3, window_bounds = array<i64: 1, 1, 1, 128>}, {transform_indices = @transform_4, window_bounds = array<i64: 1, 16, 16, 128>}]} {
    %c0 = arith.constant 0 : index
    %c0_0 = arith.constant 0 : index
    %c0_1 = arith.constant 0 : index
    %c0_2 = arith.constant 0 : index
    %0 = vector.load %arg1[%c0, %c0_0, %c0_1, %c0_2] : memref<1x16x16x128xf32, #tpu.memory_space<vmem>>, vector<1x16x16x128xf32>
    %c0_3 = arith.constant 0 : index
    %c0_4 = arith.constant 0 : index
    %c0_5 = arith.constant 0 : index
    %c0_6 = arith.constant 0 : index
    %1 = vector.load %arg3[%c0_3, %c0_4, %c0_5, %c0_6] : memref<1x1x1x128xf32, #tpu.memory_space<vmem>>, vector<1x1x1x128xf32>
    %2 = vector.broadcast %1 : vector<1x1x1x128xf32> to vector<1x16x16x128xf32>
    %3 = arith.mulf %0, %2 : vector<1x16x16x128xf32>
    %c0_7 = arith.constant 0 : index
    %c0_8 = arith.constant 0 : index
    %c0_9 = arith.constant 0 : index
    %c0_10 = arith.constant 0 : index
    %4 = vector.load %arg4[%c0_7, %c0_8, %c0_9, %c0_10] : memref<1x1x1x128xf32, #tpu.memory_space<vmem>>, vector<1x1x1x128xf32>
    %5 = vector.broadcast %4 : vector<1x1x1x128xf32> to vector<1x16x16x128xf32>
    %6 = arith.addf %3, %5 : vector<1x16x16x128xf32>
    %c0_11 = arith.constant 0 : index
    %c0_12 = arith.constant 0 : index
    %c0_13 = arith.constant 0 : index
    %c0_14 = arith.constant 0 : index
    %7 = vector.load %arg2[%c0_11, %c0_12, %c0_13, %c0_14] : memref<1x16x16x128xf32, #tpu.memory_space<vmem>>, vector<1x16x16x128xf32>
    %8 = arith.addf %6, %7 : vector<1x16x16x128xf32>
    %cst = arith.constant 0.000000e+00 : f32
    %9 = vector.broadcast %cst : f32 to vector<1x16x16x128xf32>
    %10 = arith.maximumf %8, %9 : vector<1x16x16x128xf32>
    %c0_15 = arith.constant 0 : index
    %c0_16 = arith.constant 0 : index
    %c0_17 = arith.constant 0 : index
    %c0_18 = arith.constant 0 : index
    %11 = vector.load %arg5[%c0_15, %c0_16, %c0_17, %c0_18] : memref<1x16x16x128xf32, #tpu.memory_space<vmem>>, vector<1x16x16x128xf32>
    tpu.vector_store %arg5[%c0_15, %c0_16, %c0_17, %c0_18], %10 {strides = array<i32>} : memref<1x16x16x128xf32, #tpu.memory_space<vmem>>, vector<1x16x16x128xf32>,
    return
  }
  func.func @transform_0(%arg0: i32) -> (i32, i32, i32, i32) {
    %c0_i32 = arith.constant 0 : i32
    %c0_i32_0 = arith.constant 0 : i32
    %c0_i32_1 = arith.constant 0 : i32
    %c0_i32_2 = arith.constant 0 : i32
    return %arg0, %c0_i32, %c0_i32_0, %c0_i32_1 : i32, i32, i32, i32
  }
  func.func @transform_1(%arg0: i32) -> (i32, i32, i32, i32) {
    %c0_i32 = arith.constant 0 : i32
    %c0_i32_0 = arith.constant 0 : i32
    %c0_i32_1 = arith.constant 0 : i32
    %c0_i32_2 = arith.constant 0 : i32
    return %arg0, %c0_i32, %c0_i32_0, %c0_i32_1 : i32, i32, i32, i32
  }
  func.func @transform_2(%arg0: i32) -> (i32, i32, i32, i32) {
    %c0_i32 = arith.constant 0 : i32
    %c0_i32_0 = arith.constant 0 : i32
    %c0_i32_1 = arith.constant 0 : i32
    %c0_i32_2 = arith.constant 0 : i32
    %c0_i32_3 = arith.constant 0 : i32
    return %c0_i32, %c0_i32_0, %c0_i32_1, %c0_i32_2 : i32, i32, i32, i32
  }
  func.func @transform_3(%arg0: i32) -> (i32, i32, i32, i32) {
    %c0_i32 = arith.constant 0 : i32
    %c0_i32_0 = arith.constant 0 : i32
    %c0_i32_1 = arith.constant 0 : i32
    %c0_i32_2 = arith.constant 0 : i32
    %c0_i32_3 = arith.constant 0 : i32
    return %c0_i32, %c0_i32_0, %c0_i32_1, %c0_i32_2 : i32, i32, i32, i32
  }
  func.func @transform_4(%arg0: i32) -> (i32, i32, i32, i32) {
    %c0_i32 = arith.constant 0 : i32
    %c0_i32_0 = arith.constant 0 : i32
    %c0_i32_1 = arith.constant 0 : i32
    %c0_i32_2 = arith.constant 0 : i32
    return %arg0, %c0_i32, %c0_i32_0, %c0_i32_1 : i32, i32, i32, i32
  }
}

</mosaic_0001>

<bundles_post_ra>
// kernel: basic_block_forward.5
= control target key start
LH: loop header
LB: loop body
LE: loop exit
PB: predicated region body
PF: predicated region fallthrough
CT: control target
= control target key end

     0   :  { %s582_s15 = smov 0   ;;  %s783_s0 = inlined_call_operand.vmem [shape: f32[2,16,16,128], index: 0, kind: input, shape index: {}]   ;;  %s784_s1 = inlined_call_operand.vmem [shape: f32[2,16,16,128], index: 1, kind: input, shape index: {}]   ;;  %s785_s2 = inlined_call_operand.vmem [shape: f32[1,1,1,128], index: 2, kind: input, shape index: {}]   ;;  %s786_s3 = inlined_call_operand.vmem [shape: f32[1,1,1,128], index: 3, kind: input, shape index: {}]   ;;  %s787_s4 = inlined_call_operand.vmem [shape: f32[2,16,16,128], index: 4, kind: output, shape index: {}]  }
   0x1 LB: > { %s523_s16 = sadd.s32 4294967295, %s555_s15   ;;  %p527_p0 = scmp.ge.s32.totalorder %s555_s15, 1  ;;  %s555_s15 = sphi %s582_s15, %s14_s15  }
   0x2   : > { %p172_p1 = scmp.lt.s32.totalorder %s555_s15, 3 }
   0x4   : > { %p173_p2 = pnand %p527_p0, %p172_p1 }
   0x5   : > { %p203_p3 = scmp.lt.s32.totalorder (!%p173_p2), %s523_s16, 1  ;;  %v595_v0 = vld [vmem:[%s785_s2] ss:$0 sm:$0xff] (!%p173_p2) }
   0x6   : > { %176 = sbr.rel (%p173_p2) target bundleno = 55 (0x37), region = 36  ;;  %v613_v2 = vld [vmem:[%s786_s3] ss:$0 sm:$0xff] (!%p173_p2) }
   0xd   : > { %s789_s16 = smov (!%p203_p3, %s523_s16), 1 }
   0xe   : > { %s590_s17 = sshll.u32 %s789_s16, 8 }
   0xf   : > { %s601_s22 = scalar_lea.vmem %s783_s0, %s590_s17  ;;  %s607_s25 = scalar_lea.vmem %s784_s1, %s590_s17 }
  0x10   : > { %v218_v1 = vld [vmem:[%s601_s22] sm:$0xff]  ;;  %v219_v3 = vld [vmem:[%s601_s22 + $0x8] sm:$0xff]  ;;  %v220_v7 = vld [vmem:[%s601_s22 + $0x10] sm:$0xff]  ;;  %s643_s30 = scalar_lea.vmem %s787_s4, %s590_s17 }
  0x11   : > { %v257_v4 = vmul.f32 %v595_v0, %v218_v1  ;;  %v328_v5 = vld [vmem:[%s607_s25] sm:$0xff]  ;;  %v258_v6 = vmul.f32 %v595_v0, %v219_v3  ;;  %v329_v8 = vld [vmem:[%s607_s25 + $0x8] sm:$0xff]  ;;  %v259_v9 = vmul.f32 %v595_v0, %v220_v7  ;;  %v221_v10 = vld [vmem:[%s601_s22 + $0x18] sm:$0xff] }
  0x12   : > { %v222_v11 = vld [vmem:[%s601_s22 + $0x20] sm:$0xff]  ;;  %v330_v14 = vld [vmem:[%s607_s25 + $0x10] sm:$0xff]  ;;  %v260_v15 = vmul.f32 %v595_v0, %v221_v10  ;;  %v331_v16 = vld [vmem:[%s607_s25 + $0x18] sm:$0xff] }
  0x13   : > { %v296_v12 = vadd.f32 %v613_v2, %v257_v4  ;;  %v297_v13 = vadd.f32 %v613_v2, %v258_v6  ;;  %v261_v17 = vmul.f32 %v595_v0, %v222_v11  ;;  %v223_v18 = vld [vmem:[%s601_s22 + $0x28] sm:$0xff]  ;;  %v298_v19 = vadd.f32 %v613_v2, %v259_v9  ;;  %v332_v20 = vld [vmem:[%s607_s25 + $0x20] sm:$0xff]  ;;  %v224_v22 = vld [vmem:[%s601_s22 + $0x30] sm:$0xff] }
  0x14   : > { %v262_v21 = vmul.f32 %v595_v0, %v223_v18  ;;  %v225_v23 = vld [vmem:[%s601_s22 + $0x38] sm:$0xff]  ;;  %v299_v26 = vadd.f32 %v613_v2, %v260_v15  ;;  %v333_v28 = vld [vmem:[%s607_s25 + $0x28] sm:$0xff]  ;;  %v263_v31 = vmul.f32 %v595_v0, %v224_v22  ;;  %v226_v33 = vld [vmem:[%s601_s22 + $0x40] sm:$0xff] }
  0x15   : > { %v360_v24 = vadd.f32 %v328_v5, %v296_v12  ;;  %v361_v25 = vadd.f32 %v329_v8, %v297_v13  ;;  %v300_v27 = vadd.f32 %v613_v2, %v261_v17  ;;  %v362_v29 = vadd.f32 %v330_v14, %v298_v19  ;;  %v227_v34 = vld [vmem:[%s601_s22 + $0x48] sm:$0xff]  ;;  %v334_v39 = vld [vmem:[%s607_s25 + $0x30] sm:$0xff]  ;;  %v335_v40 = vld [vmem:[%s607_s25 + $0x38] sm:$0xff] }
  0x16   : > { %v301_v30 = vadd.f32 %v613_v2, %v262_v21  ;;  %v264_v32 = vmul.f32 %v595_v0, %v225_v23  ;;  %v363_v37 = vadd.f32 %v331_v16, %v299_v26  ;;  %v228_v41 = vld [vmem:[%s601_s22 + $0x50] sm:$0xff]  ;;  %v302_v44 = vadd.f32 %v613_v2, %v263_v31  ;;  %v229_v46 = vld [vmem:[%s601_s22 + $0x58] sm:$0xff]  ;;  %v230_v47 = vld [vmem:[%s601_s22 + $0x60] sm:$0xff] }
  0x17   : > { %v392_v35 = vmax.f32 %v360_v24, 0.0  ;;  %v393_v36 = vmax.f32 %v361_v25, 0.0  ;;  %v364_v38 = vadd.f32 %v332_v20, %v300_v27  ;;  %v394_v42 = vmax.f32 %v362_v29, 0.0  ;;  %v231_v52 = vld [vmem:[%s601_s22 + $0x68] sm:$0xff]  ;;  %v336_v56 = vld [vmem:[%s607_s25 + $0x40] sm:$0xff]  ;;  %v338_v61 = vld [vmem:[%s607_s25 + $0x50] sm:$0xff] }
  0x18   : > { %v365_v43 = vadd.f32 %v333_v28, %v301_v30  ;;  %v303_v45 = vadd.f32 %v613_v2, %v264_v32  ;;  %v395_v48 = vmax.f32 %v363_v37, 0.0  ;;  %v265_v50 = vmul.f32 %v595_v0, %v226_v33  ;;  %v337_v57 = vld [vmem:[%s607_s25 + $0x48] sm:$0xff]  ;;  %v232_v1 = vld [vmem:[%s601_s22 + $0x70] sm:$0xff]  ;;  %v233_v3 = vld [vmem:[%s601_s22 + $0x78] sm:$0xff] }
  0x19   : > { %424 = vst [vmem:[%s643_s30] sm:$0xff] %v392_v35  ;;  %425 = vst [vmem:[%s643_s30 + $0x8] sm:$0xff] %v393_v36  ;;  %v396_v49 = vmax.f32 %v364_v38, 0.0  ;;  %v266_v51 = vmul.f32 %v595_v0, %v227_v34  ;;  %v366_v54 = vadd.f32 %v334_v39, %v302_v44  ;;  %v267_v58 = vmul.f32 %v595_v0, %v228_v41  ;;  %v339_v7 = vld [vmem:[%s607_s25 + $0x58] sm:$0xff]  ;;  %v340_v8 = vld [vmem:[%s607_s25 + $0x60] sm:$0xff] }
  0x1a   : > { %426 = vst [vmem:[%s643_s30 + $0x10] sm:$0xff] %v394_v42  ;;  %v397_v53 = vmax.f32 %v365_v43, 0.0  ;;  %v367_v55 = vadd.f32 %v335_v40, %v303_v45  ;;  %427 = vst [vmem:[%s643_s30 + $0x18] sm:$0xff] %v395_v48  ;;  %v304_v59 = vadd.f32 %v613_v2, %v265_v50  ;;  %v268_v62 = vmul.f32 %v595_v0, %v229_v46  ;;  %v341_v14 = vld [vmem:[%s607_s25 + $0x68] sm:$0xff]  ;;  %v234_v19 = vld [vmem:[%s601_s22 + $0x80] sm:$0xff] }
  0x1b   : > { %428 = vst [vmem:[%s643_s30 + $0x20] sm:$0xff] %v396_v49  ;;  %v305_v60 = vadd.f32 %v613_v2, %v266_v51  ;;  %v269_v63 = vmul.f32 %v595_v0, %v230_v47  ;;  %v398_v4 = vmax.f32 %v366_v54, 0.0  ;;  %v306_v6 = vadd.f32 %v613_v2, %v267_v58  ;;  %v235_v20 = vld [vmem:[%s601_s22 + $0x88] sm:$0xff]  ;;  %v342_v25 = vld [vmem:[%s607_s25 + $0x70] sm:$0xff]  ;;  %v343_v26 = vld [vmem:[%s607_s25 + $0x78] sm:$0xff] }
  0x1c   : > { %429 = vst [vmem:[%s643_s30 + $0x28] sm:$0xff] %v397_v53  ;;  %v399_v5 = vmax.f32 %v367_v55, 0.0  ;;  %v270_v9 = vmul.f32 %v595_v0, %v231_v52  ;;  %v368_v10 = vadd.f32 %v336_v56, %v304_v59  ;;  %v307_v12 = vadd.f32 %v613_v2, %v268_v62  ;;  %v236_v27 = vld [vmem:[%s601_s22 + $0x90] sm:$0xff]  ;;  %v237_v32 = vld [vmem:[%s601_s22 + $0x98] sm:$0xff]  ;;  %v238_v33 = vld [vmem:[%s601_s22 + $0xa0] sm:$0xff] }
  0x1d   : > { %v369_v11 = vadd.f32 %v337_v57, %v305_v60  ;;  %v308_v13 = vadd.f32 %v613_v2, %v269_v63  ;;  %430 = vst [vmem:[%s643_s30 + $0x30] sm:$0xff] %v398_v4  ;;  %v370_v15 = vadd.f32 %v338_v61, %v306_v6  ;;  %v271_v17 = vmul.f32 %v595_v0, %v232_v1  ;;  %v239_v38 = vld [vmem:[%s601_s22 + $0xa8] sm:$0xff]  ;;  %v344_v42 = vld [vmem:[%s607_s25 + $0x80] sm:$0xff]  ;;  %v346_v47 = vld [vmem:[%s607_s25 + $0x90] sm:$0xff] }
  0x1e   : > { %431 = vst [vmem:[%s643_s30 + $0x38] sm:$0xff] %v399_v5  ;;  %v309_v16 = vadd.f32 %v613_v2, %v270_v9  ;;  %v272_v18 = vmul.f32 %v595_v0, %v233_v3  ;;  %v400_v21 = vmax.f32 %v368_v10, 0.0  ;;  %v371_v23 = vadd.f32 %v339_v7, %v307_v12  ;;  %v345_v43 = vld [vmem:[%s607_s25 + $0x88] sm:$0xff]  ;;  %v240_v50 = vld [vmem:[%s601_s22 + $0xb0] sm:$0xff]  ;;  %v241_v51 = vld [vmem:[%s601_s22 + $0xb8] sm:$0xff] }
  0x1f   : > { %v401_v22 = vmax.f32 %v369_v11, 0.0  ;;  %v372_v24 = vadd.f32 %v340_v8, %v308_v13  ;;  %v402_v28 = vmax.f32 %v370_v15, 0.0  ;;  %v310_v30 = vadd.f32 %v613_v2, %v271_v17  ;;  %v347_v55 = vld [vmem:[%s607_s25 + $0x98] sm:$0xff]  ;;  %v348_v56 = vld [vmem:[%s607_s25 + $0xa0] sm:$0xff]  ;;  %v349_v62 = vld [vmem:[%s607_s25 + $0xa8] sm:$0xff] }
  0x20   : > { %v373_v29 = vadd.f32 %v341_v14, %v309_v16  ;;  %v311_v31 = vadd.f32 %v613_v2, %v272_v18  ;;  %432 = vst [vmem:[%s643_s30 + $0x40] sm:$0xff] %v400_v21  ;;  %v403_v34 = vmax.f32 %v371_v23, 0.0  ;;  %v273_v36 = vmul.f32 %v595_v0, %v234_v19  ;;  %v242_v5 = vld [vmem:[%s601_s22 + $0xc0] sm:$0xff]  ;;  %v243_v6 = vld [vmem:[%s601_s22 + $0xc8] sm:$0xff]  ;;  %v350_v11 = vld [vmem:[%s607_s25 + $0xb0] sm:$0xff] }
  0x21   : > { %433 = vst [vmem:[%s643_s30 + $0x48] sm:$0xff] %v401_v22  ;;  %v404_v35 = vmax.f32 %v372_v24, 0.0  ;;  %v274_v37 = vmul.f32 %v595_v0, %v235_v20  ;;  %434 = vst [vmem:[%s643_s30 + $0x50] sm:$0xff] %v402_v28  ;;  %v374_v40 = vadd.f32 %v342_v25, %v310_v30  ;;  %v275_v44 = vmul.f32 %v595_v0, %v236_v27  ;;  %v351_v12 = vld [vmem:[%s607_s25 + $0xb8] sm:$0xff]  ;;  %v244_v13 = vld [vmem:[%s601_s22 + $0xd0] sm:$0xff] }
  0x22   : > { %v405_v39 = vmax.f32 %v373_v29, 0.0  ;;  %v375_v41 = vadd.f32 %v343_v26, %v311_v31  ;;  %435 = vst [vmem:[%s643_s30 + $0x58] sm:$0xff] %v403_v34  ;;  %v312_v45 = vadd.f32 %v613_v2, %v273_v36  ;;  %v276_v48 = vmul.f32 %v595_v0, %v237_v32  ;;  %v245_v18 = vld [vmem:[%s601_s22 + $0xd8] sm:$0xff]  ;;  %v246_v19 = vld [vmem:[%s601_s22 + $0xe0] sm:$0xff]  ;;  %v247_v24 = vld [vmem:[%s601_s22 + $0xe8] sm:$0xff] }
  0x23   : > { %436 = vst [vmem:[%s643_s30 + $0x60] sm:$0xff] %v404_v35  ;;  %v313_v46 = vadd.f32 %v613_v2, %v274_v37  ;;  %v277_v49 = vmul.f32 %v595_v0, %v238_v33  ;;  %v406_v52 = vmax.f32 %v374_v40, 0.0  ;;  %v314_v54 = vadd.f32 %v613_v2, %v275_v44  ;;  %v352_v28 = vld [vmem:[%s607_s25 + $0xc0] sm:$0xff]  ;;  %v353_v29 = vld [vmem:[%s607_s25 + $0xc8] sm:$0xff]  ;;  %v354_v33 = vld [vmem:[%s607_s25 + $0xd0] sm:$0xff] }
  0x24   : > { %437 = vst [vmem:[%s643_s30 + $0x68] sm:$0xff] %v405_v39  ;;  %v407_v53 = vmax.f32 %v375_v41, 0.0  ;;  %v278_v57 = vmul.f32 %v595_v0, %v239_v38  ;;  %v376_v58 = vadd.f32 %v344_v42, %v312_v45  ;;  %v315_v60 = vadd.f32 %v613_v2, %v276_v48  ;;  %v248_v36 = vld [vmem:[%s601_s22 + $0xf0] sm:$0xff]  ;;  %v249_v37 = vld [vmem:[%s601_s22 + $0xf8] sm:$0xff]  ;;  %v356_v42 = vld [vmem:[%s607_s25 + $0xe0] sm:$0xff] }
  0x25   : > { %v377_v59 = vadd.f32 %v345_v43, %v313_v46  ;;  %v316_v61 = vadd.f32 %v613_v2, %v277_v49  ;;  %438 = vst [vmem:[%s643_s30 + $0x70] sm:$0xff] %v406_v52  ;;  %v378_v63 = vadd.f32 %v346_v47, %v314_v54  ;;  %v279_v3 = vmul.f32 %v595_v0, %v240_v50  ;;  %v355_v41 = vld [vmem:[%s607_s25 + $0xd8] sm:$0xff]  ;;  %v357_v48 = vld [vmem:[%s607_s25 + $0xe8] sm:$0xff] }
  0x26   : > { %439 = vst [vmem:[%s643_s30 + $0x78] sm:$0xff] %v407_v53  ;;  %v317_v1 = vadd.f32 %v613_v2, %v278_v57  ;;  %v280_v4 = vmul.f32 %v595_v0, %v241_v51  ;;  %v408_v7 = vmax.f32 %v376_v58, 0.0  ;;  %v379_v9 = vadd.f32 %v347_v55, %v315_v60  ;;  %v358_v57 = vld [vmem:[%s607_s25 + $0xf0] sm:$0xff]  ;;  %v359_v58 = vld [vmem:[%s607_s25 + $0xf8] sm:$0xff] }
  0x27   : > { %v409_v8 = vmax.f32 %v377_v59, 0.0  ;;  %v380_v10 = vadd.f32 %v348_v56, %v316_v61  ;;  %v410_v14 = vmax.f32 %v378_v63, 0.0  ;;  %v318_v16 = vadd.f32 %v613_v2, %v279_v3 }
  0x28   : > { %v381_v15 = vadd.f32 %v349_v62, %v317_v1  ;;  %v319_v17 = vadd.f32 %v613_v2, %v280_v4  ;;  %440 = vst [vmem:[%s643_s30 + $0x80] sm:$0xff] %v408_v7  ;;  %v411_v20 = vmax.f32 %v379_v9, 0.0  ;;  %v281_v22 = vmul.f32 %v595_v0, %v242_v5 }
  0x29   : > { %441 = vst [vmem:[%s643_s30 + $0x88] sm:$0xff] %v409_v8  ;;  %v412_v21 = vmax.f32 %v380_v10, 0.0  ;;  %v282_v23 = vmul.f32 %v595_v0, %v243_v6  ;;  %442 = vst [vmem:[%s643_s30 + $0x90] sm:$0xff] %v410_v14  ;;  %v382_v26 = vadd.f32 %v350_v11, %v318_v16  ;;  %v283_v30 = vmul.f32 %v595_v0, %v244_v13 }
  0x2a   : > { %v413_v25 = vmax.f32 %v381_v15, 0.0  ;;  %v383_v27 = vadd.f32 %v351_v12, %v319_v17  ;;  %443 = vst [vmem:[%s643_s30 + $0x98] sm:$0xff] %v411_v20  ;;  %v320_v31 = vadd.f32 %v613_v2, %v281_v22  ;;  %v284_v34 = vmul.f32 %v595_v0, %v245_v18 }
  0x2b   : > { %444 = vst [vmem:[%s643_s30 + $0xa0] sm:$0xff] %v412_v21  ;;  %v321_v32 = vadd.f32 %v613_v2, %v282_v23  ;;  %v285_v35 = vmul.f32 %v595_v0, %v246_v19  ;;  %v414_v38 = vmax.f32 %v382_v26, 0.0  ;;  %v322_v40 = vadd.f32 %v613_v2, %v283_v30 }
  0x2c   : > { %445 = vst [vmem:[%s643_s30 + $0xa8] sm:$0xff] %v413_v25  ;;  %v415_v39 = vmax.f32 %v383_v27, 0.0  ;;  %v286_v43 = vmul.f32 %v595_v0, %v247_v24  ;;  %v384_v44 = vadd.f32 %v352_v28, %v320_v31  ;;  %v323_v46 = vadd.f32 %v613_v2, %v284_v34 }
  0x2d   : > { %v385_v45 = vadd.f32 %v353_v29, %v321_v32  ;;  %v324_v47 = vadd.f32 %v613_v2, %v285_v35  ;;  %446 = vst [vmem:[%s643_s30 + $0xb0] sm:$0xff] %v414_v38  ;;  %v386_v49 = vadd.f32 %v354_v33, %v322_v40  ;;  %v287_v51 = vmul.f32 %v595_v0, %v248_v36 }
  0x2e   : > { %447 = vst [vmem:[%s643_s30 + $0xb8] sm:$0xff] %v415_v39  ;;  %v325_v50 = vadd.f32 %v613_v2, %v286_v43  ;;  %v288_v52 = vmul.f32 %v595_v0, %v249_v37  ;;  %v416_v53 = vmax.f32 %v384_v44, 0.0  ;;  %v387_v55 = vadd.f32 %v355_v41, %v323_v46 }
  0x2f   : > { %v417_v54 = vmax.f32 %v385_v45, 0.0  ;;  %v388_v56 = vadd.f32 %v356_v42, %v324_v47  ;;  %v418_v59 = vmax.f32 %v386_v49, 0.0  ;;  %v326_v61 = vadd.f32 %v613_v2, %v287_v51 }
  0x30   : > { %v389_v60 = vadd.f32 %v357_v48, %v325_v50  ;;  %v327_v62 = vadd.f32 %v613_v2, %v288_v52  ;;  %448 = vst [vmem:[%s643_s30 + $0xc0] sm:$0xff] %v416_v53  ;;  %v419_v0 = vmax.f32 %v387_v55, 0.0 }
  0x31   : > { %449 = vst [vmem:[%s643_s30 + $0xc8] sm:$0xff] %v417_v54  ;;  %v420_v63 = vmax.f32 %v388_v56, 0.0  ;;  %450 = vst [vmem:[%s643_s30 + $0xd0] sm:$0xff] %v418_v59  ;;  %v390_v3 = vadd.f32 %v358_v57, %v326_v61 }
  0x32   : > { %v421_v1 = vmax.f32 %v389_v60, 0.0  ;;  %v391_v4 = vadd.f32 %v359_v58, %v327_v62  ;;  %451 = vst [vmem:[%s643_s30 + $0xd8] sm:$0xff] %v419_v0 }
  0x33   : > { %452 = vst [vmem:[%s643_s30 + $0xe0] sm:$0xff] %v420_v63  ;;  %v422_v5 = vmax.f32 %v390_v3, 0.0 }
  0x34   : > { %453 = vst [vmem:[%s643_s30 + $0xe8] sm:$0xff] %v421_v1  ;;  %v423_v6 = vmax.f32 %v391_v4, 0.0 }
  0x35   : > { %454 = vst [vmem:[%s643_s30 + $0xf0] sm:$0xff] %v422_v5 }
  0x36   : > { %455 = vst [vmem:[%s643_s30 + $0xf8] sm:$0xff] %v423_v6 }
  0x37 PF: > { %s14_s15 = sadd.s32 1, %s555_s15  }
  0x38   : > { %p11_p4 = scmp.ge.s32.totalorder %s14_s15, 4  }
  0x3a   :  { %13 = sbr.rel (!%p11_p4) target bundleno = 1 (0x1), region = 69 }

// kernel: basic_block_forward.3
= control target key start
LH: loop header
LB: loop body
LE: loop exit
PB: predicated region body
PF: predicated region fallthrough
CT: control target
= control target key end

     0   :  { %s3433_s12 = smov 0   ;;  %s4412_s0 = inlined_call_operand.vmem [shape: f32[2,18,18,128], index: 0, kind: input, shape index: {}]   ;;  %s4413_s1 = inlined_call_operand.vmem [shape: bf16[1152,128], index: 1, kind: input, shape index: {}]   ;;  %s4414_s2 = inlined_call_operand.vmem [shape: f32[2,16,16,128], index: 2, kind: output, shape index: {0}]   ;;  %s4415_s3 = inlined_call_operand.vmem [shape: f32[2,2,128], index: 3, kind: output, shape index: {1}]  }
   0x1 LB: > { %s2512_s13 = sadd.s32 4294967295, %s3411_s12   ;;  %p2516_p0 = scmp.ge.s32.totalorder %s3411_s12, 1  ;;  %s3411_s12 = sphi %s3433_s12, %s14_s12  }
   0x2   : > { %p140_p1 = scmp.lt.s32.totalorder %s3411_s12, 3 }
   0x4   : > { %p141_p2 = pnand %p2516_p0, %p140_p1 }
   0x5   : > { %v3333_v0 = vld [vmem:[%s4413_s1 + $0x40] sm:$0xff] (!%p141_p2)   ;;  %p168_p3 = scmp.lt.s32.totalorder (!%p141_p2), %s2512_s13, 1  ;;  %v3335_v2 = vld [vmem:[%s4413_s1 + $0x48] sm:$0xff] (!%p141_p2)   ;;  %v3337_v4 = vld [vmem:[%s4413_s1 + $0x50] sm:$0xff] (!%p141_p2)  }
   0x6   : > { %144 = sbr.rel (%p141_p2) target bundleno = 557 (0x22d), region = 28  ;;  %v3334_v1 = vld [vmem:[%s4413_s1] sm:$0xff] (!%p141_p2)   ;;  %2788 = vmatprep.subr.bf16.mxu0 (!%p141_p2), %v3333_v0  ;;  %3308 = vmatprep.subr.bf16.mxu1 (!%p141_p2), %v3333_v0  ;;  %v3336_v3 = vld [vmem:[%s4413_s1 + $0x8] sm:$0xff] (!%p141_p2)   ;;  %v3338_v5 = vld [vmem:[%s4413_s1 + $0x10] sm:$0xff] (!%p141_p2)  }
   0x7   : > { %2789 = vmatpush3.bf16.msra.mxu0 (!%p141_p2), %v3334_v1  ;;  %3316 = vmatpush3.bf16.msra.mxu1 (!%p141_p2), %v3334_v1  ;;  %v3339_v6 = vld [vmem:[%s4413_s1 + $0x58] sm:$0xff] (!%p141_p2)   ;;  %v3341_v8 = vld [vmem:[%s4413_s1 + $0x60] sm:$0xff] (!%p141_p2)   ;;  %v3343_v10 = vld [vmem:[%s4413_s1 + $0x68] sm:$0xff] (!%p141_p2)  }
   0x8   : > { %2790 = vmatprep.subr.bf16.mxu0 (!%p141_p2), %v3335_v2  ;;  %3309 = vmatprep.subr.bf16.mxu1 (!%p141_p2), %v3335_v2  ;;  %v3340_v7 = vld [vmem:[%s4413_s1 + $0x18] sm:$0xff] (!%p141_p2)   ;;  %v3342_v9 = vld [vmem:[%s4413_s1 + $0x20] sm:$0xff] (!%p141_p2)   ;;  %v3344_v17 = vld [vmem:[%s4413_s1 + $0x28] sm:$0xff] (!%p141_p2)  }
   0x9   : > { %v3345_v18 = vld [vmem:[%s4413_s1 + $0x70] sm:$0xff] (!%p141_p2)   ;;  %v3347_v20 = vld [vmem:[%s4413_s1 + $0x78] sm:$0xff] (!%p141_p2)   ;;  %v3349_v26 = vld [vmem:[%s4413_s1 + $0xc0] sm:$0xff] (!%p141_p2)  }
   0xa   : > { %v3346_v19 = vld [vmem:[%s4413_s1 + $0x30] sm:$0xff] (!%p141_p2)   ;;  %v3348_v21 = vld [vmem:[%s4413_s1 + $0x38] sm:$0xff] (!%p141_p2)   ;;  %v3350_v27 = vld [vmem:[%s4413_s1 + $0x140] sm:$0xff] (!%p141_p2)  }
   0xb   : > { %2791 = vmatpush3.bf16.msra.mxu0 (!%p141_p2), %v3336_v3  ;;  %3317 = vmatpush3.bf16.msra.mxu1 (!%p141_p2), %v3336_v3  ;;  %v3351_v30 = vld [vmem:[%s4413_s1 + $0x80] sm:$0xff] (!%p141_p2)   ;;  %v3353_v36 = vld [vmem:[%s4413_s1 + $0xc8] sm:$0xff] (!%p141_p2)   ;;  %v3355_v45 = vld [vmem:[%s4413_s1 + $0xd0] sm:$0xff] (!%p141_p2)  }
   0xc   : > { %2792 = vmatprep.subr.bf16.mxu0 (!%p141_p2), %v3337_v4  ;;  %3310 = vmatprep.subr.bf16.mxu1 (!%p141_p2), %v3337_v4  ;;  %v3352_v35 = vld [vmem:[%s4413_s1 + $0x100] sm:$0xff] (!%p141_p2)   ;;  %v3354_v38 = vld [vmem:[%s4413_s1 + $0x88] sm:$0xff] (!%p141_p2)   ;;  %v3356_v53 = vld [vmem:[%s4413_s1 + $0x90] sm:$0xff] (!%p141_p2)  }
   0xd   : > { %s4417_s13 = smov (!%p168_p3, %s2512_s13), 1  ;;  %v3358_v42 = vld [vmem:[%s4413_s1 + $0x148] sm:$0xff]   ;;  %v3357_v55 = vld [vmem:[%s4413_s1 + $0xd8] sm:$0xff]   ;;  %v3361_v62 = vld [vmem:[%s4413_s1 + $0xe0] sm:$0xff]  }
   0xe   : > { %s3324_s28 = smul.u32 432, %s4417_s13  ;;  %v3360_v46 = vld [vmem:[%s4413_s1 + $0x108] sm:$0xff]   ;;  %v3359_v57 = vld [vmem:[%s4413_s1 + $0x98] sm:$0xff]   ;;  %v3366_v2 = vld [vmem:[%s4413_s1 + $0x150] sm:$0xff]   ;;  %s2520_s20 = sshll.u32 %s4417_s13, 1 }
   0xf   : > { %2793 = vmatpush3.bf16.msra.mxu0 %v3338_v5  ;;  %3318 = vmatpush3.bf16.msra.mxu1 %v3338_v5  ;;  %s181_s23 = scalar_lea.vmem %s4415_s3, %s2520_s20 }
  0x10   : > { %2794 = vmatprep.subr.bf16.mxu0 %v3339_v6  ;;  %3311 = vmatprep.subr.bf16.mxu1 %v3339_v6  ;;  %s3474_s8 = scalar_lea.vmem %s4412_s0, %s3324_s28  ;;  %v3368_v6 = vld [vmem:[%s4413_s1 + $0x110] sm:$0xff]  }
  0x11   : > { %v247_v11 = vld [vmem:[%s3474_s8 + $0x1] sm:$0xff]  ;;  %v248_v12 = vld [vmem:[%s3474_s8 + $0x9] sm:$0xff]  ;;  %v249_v28 = vld [vmem:[%s3474_s8 + $0x19] sm:$0xff] }
  0x12   : > { %v271_v13 = vld [vmem:[%s3474_s8 + $0x121] sm:$0xff]  ;;  %v279_v14 = vpack.c.bf16 %v248_v12, %v247_v11  ;;  %v272_v15 = vld [vmem:[%s3474_s8 + $0x129] sm:$0xff]  ;;  %v273_v31 = vld [vmem:[%s3474_s8 + $0x139] sm:$0xff] }
  0x13   : > { %2795 = vmatpush3.bf16.msra.mxu0 %v3340_v7  ;;  %3319 = vmatpush3.bf16.msra.mxu1 %v3340_v7  ;;  %v291_v16 = vpack.c.bf16 %v272_v15, %v271_v13  ;;  %v183_v22 = vld [vmem:[%s3474_s8] sm:$0xff]  ;;  %v184_v23 = vld [vmem:[%s3474_s8 + $0x8] sm:$0xff]  ;;  %v185_v40 = vld [vmem:[%s3474_s8 + $0x18] sm:$0xff] }
  0x14   : > { %2796 = vmatprep.subr.bf16.mxu0 %v3341_v8  ;;  %3312 = vmatprep.subr.bf16.mxu1 %v3341_v8  ;;  %v207_v24 = vld [vmem:[%s3474_s8 + $0x120] sm:$0xff]  ;;  %v208_v25 = vld [vmem:[%s3474_s8 + $0x128] sm:$0xff]  ;;  %v215_v32 = vpack.c.bf16 %v184_v23, %v183_v22  ;;  %v209_v43 = vld [vmem:[%s3474_s8 + $0x138] sm:$0xff] }
  0x15   : > { %1513 = vmatprep.mubr.bf16.mxu0 %v279_v14  ;;  %1609 = vmatprep.mubr.bf16.mxu1 %v291_v16  ;;  %v250_v29 = vld [vmem:[%s3474_s8 + $0x21] sm:$0xff]  ;;  %v3517_v33 = vpack.c.bf16 %v208_v25, %v207_v24  ;;  %v251_v47 = vld [vmem:[%s3474_s8 + $0x31] sm:$0xff]  ;;  %v252_v48 = vld [vmem:[%s3474_s8 + $0x39] sm:$0xff] }
  0x16   : > { %v274_v34 = vld [vmem:[%s3474_s8 + $0x141] sm:$0xff]  ;;  %v3526_v37 = vpack.c.bf16 %v250_v29, %v249_v28  ;;  %v275_v49 = vld [vmem:[%s3474_s8 + $0x151] sm:$0xff]  ;;  %v276_v50 = vld [vmem:[%s3474_s8 + $0x159] sm:$0xff]  ;;  %v3557_v54 = vpack.c.bf16 %v252_v48, %v251_v47 }
  0x17   : > { %2797 = vmatpush3.bf16.msra.mxu0 %v3342_v9  ;;  %3320 = vmatpush3.bf16.msra.mxu1 %v3342_v9  ;;  %v292_v39 = vpack.c.bf16 %v274_v34, %v273_v31  ;;  %v186_v41 = vld [vmem:[%s3474_s8 + $0x20] sm:$0xff]  ;;  %v293_v56 = vpack.c.bf16 %v276_v50, %v275_v49  ;;  %v187_v58 = vld [vmem:[%s3474_s8 + $0x30] sm:$0xff]  ;;  %v188_v59 = vld [vmem:[%s3474_s8 + $0x38] sm:$0xff] }
  0x18   : > { %2798 = vmatprep.subr.bf16.mxu0 %v3343_v10  ;;  %3313 = vmatprep.subr.bf16.mxu1 %v3343_v10  ;;  %v210_v44 = vld [vmem:[%s3474_s8 + $0x140] sm:$0xff]  ;;  %v3550_v51 = vpack.c.bf16 %v186_v41, %v185_v40  ;;  %v211_v60 = vld [vmem:[%s3474_s8 + $0x150] sm:$0xff]  ;;  %v212_v61 = vld [vmem:[%s3474_s8 + $0x158] sm:$0xff]  ;;  %v3582_v4 = vpack.c.bf16 %v188_v59, %v187_v58 }
  0x19   : > { %v3552_v52 = vpack.c.bf16 %v210_v44, %v209_v43  ;;  %v253_v63 = vld [vmem:[%s3474_s8 + $0x49] sm:$0xff]  ;;  %v254_v0 = vld [vmem:[%s3474_s8 + $0x51] sm:$0xff]  ;;  %v3584_v5 = vpack.c.bf16 %v212_v61, %v211_v60  ;;  %v3362_v7 = vld [vmem:[%s4413_s1 + $0xa0] sm:$0xff]  }
  0x1a   : > { %v277_v1 = vld [vmem:[%s3474_s8 + $0x169] sm:$0xff]  ;;  %v278_v3 = vld [vmem:[%s3474_s8 + $0x171] sm:$0xff]  ;;  %v3592_v8 = vpack.c.bf16 %v254_v0, %v253_v63  ;;  %v3371_v31 = vld [vmem:[%s4413_s1 + $0x1c0] sm:$0xff]  }
  0x1b   : > { %2799 = vmatpush3.bf16.msra.mxu0 %v3344_v17  ;;  %3321 = vmatpush3.bf16.msra.mxu1 %v3344_v17  ;;  %v3363_v9 = vld [vmem:[%s4413_s1 + $0xe8] sm:$0xff]   ;;  %v294_v10 = vpack.c.bf16 %v278_v3, %v277_v1  ;;  %v190_v13 = vld [vmem:[%s3474_s8 + $0x50] sm:$0xff]  ;;  %v3374_v22 = vld [vmem:[%s4413_s1 + $0x118] sm:$0xff]  }
  0x1c   : > { %2800 = vmatprep.subr.bf16.mxu0 %v3345_v18  ;;  %3314 = vmatprep.subr.bf16.mxu1 %v3345_v18  ;;  %v3364_v11 = vld [vmem:[%s4413_s1 + $0xa8] sm:$0xff]   ;;  %v214_v15 = vld [vmem:[%s3474_s8 + $0x170] sm:$0xff]  ;;  %v3369_v25 = vld [vmem:[%s4413_s1 + $0xf8] sm:$0xff]  }
  0x1d   : > { %v189_v12 = vld [vmem:[%s3474_s8 + $0x48] sm:$0xff]  ;;  %v3365_v16 = vld [vmem:[%s4413_s1 + $0xf0] sm:$0xff]   ;;  %v3375_v34 = vld [vmem:[%s4413_s1 + $0x160] sm:$0xff]  }
  0x1e   : > { %v213_v14 = vld [vmem:[%s3474_s8 + $0x168] sm:$0xff]  ;;  %v3367_v23 = vld [vmem:[%s4413_s1 + $0xb0] sm:$0xff]   ;;  %v3372_v40 = vld [vmem:[%s4413_s1 + $0x180] sm:$0xff]  }
  0x1f   : > { %2801 = vmatpush3.bf16.msra.mxu0 %v3346_v19  ;;  %3322 = vmatpush3.bf16.msra.mxu1 %v3346_v19  ;;  %v255_v17 = vld [vmem:[%s3474_s8 + $0x61] sm:$0xff]  ;;  %v256_v18 = vld [vmem:[%s3474_s8 + $0x69] sm:$0xff]  ;;  %v3373_v19 = vld [vmem:[%s4413_s1 + $0x158] sm:$0xff]  }
  0x20   : > { %2802 = vmatprep.subr.bf16.mxu0 %v3347_v20  ;;  %3315 = vmatprep.subr.bf16.mxu1 %v3347_v20  ;;  %v3615_v20 = vpack.c.bf16 %v190_v13, %v189_v12  ;;  %v3625_v24 = vpack.c.bf16 %v256_v18, %v255_v17  ;;  %v192_v28 = vld [vmem:[%s3474_s8 + $0x68] sm:$0xff]  ;;  %v193_v43 = vld [vmem:[%s3474_s8 + $0x78] sm:$0xff]  ;;  %v3382_v58 = vld [vmem:[%s4413_s1 + $0x190] sm:$0xff]  }
  0x21   : > { %v311_v29 = vld [vmem:[%s3474_s8 + $0x2] sm:$0xff]  ;;  %v313_v47 = vld [vmem:[%s3474_s8 + $0x1a] sm:$0xff]  ;;  %v259_v50 = vld [vmem:[%s3474_s8 + $0x91] sm:$0xff] }
  0x22   : > { %v3379_v44 = vld [vmem:[%s4413_s1 + $0x168] sm:$0xff]   ;;  %v3383_v59 = vld [vmem:[%s4413_s1 + $0x170] sm:$0xff]   ;;  %v316_v0 = vld [vmem:[%s3474_s8 + $0x3a] sm:$0xff] }
  0x23   : > { %2803 = vmatpush3.bf16.msra.mxu0 %v3348_v21  ;;  %3323 = vmatpush3.bf16.msra.mxu1 %v3348_v21  ;;  %v3617_v21 = vpack.c.bf16 %v214_v15, %v213_v14  ;;  %v314_v48 = vld [vmem:[%s3474_s8 + $0x22] sm:$0xff]  ;;  %v195_v60 = vld [vmem:[%s3474_s8 + $0x90] sm:$0xff]  ;;  %v3385_v3 = vld [vmem:[%s4413_s1 + $0x1d8] sm:$0xff]  }
  0x24   : > { %2900 = vmatprep.subr.bf16.mxu1 %v3349_v26  ;;  %3012 = vmatprep.subr.bf16.mxu0 %v3350_v27  ;;  %v3370_v26 = vld [vmem:[%s4413_s1 + $0xb8] sm:$0xff]   ;;  %v191_v27 = vld [vmem:[%s3474_s8 + $0x60] sm:$0xff]  ;;  %v3378_v49 = vld [vmem:[%s4413_s1 + $0x188] sm:$0xff]  }
  0x25   : > { %v3384_v61 = vld [vmem:[%s4413_s1 + $0x130] sm:$0xff]   ;;  %v3388_v12 = vld [vmem:[%s4413_s1 + $0x138] sm:$0xff]   ;;  %v197_v13 = vld [vmem:[%s3474_s8 + $0xa8] sm:$0xff] }
  0x26   : > { %1514 = vmatmul.mubr.bf16.vlgmr.msra.gmra.mrb[0].mxu0 %v215_v32  ;;  %1610 = vmatmul.mubr.bf16.vlgmr.msra.gmra.mrb[0].mxu1 %v3517_v33  ;;  %v257_v32 = vld [vmem:[%s3474_s8 + $0x79] sm:$0xff]  ;;  %v261_v1 = vld [vmem:[%s3474_s8 + $0xa9] sm:$0xff]  ;;  %v263_v17 = vld [vmem:[%s3474_s8 + $0xc1] sm:$0xff] }
  0x27   : > { %2901 = vmatpush3.bf16.msra.mxu1 %v3351_v30  ;;  %3013 = vmatpush3.bf16.msra.mxu0 %v3352_v35  ;;  %v312_v30 = vld [vmem:[%s3474_s8 + $0xa] sm:$0xff]  ;;  %v258_v35 = vld [vmem:[%s3474_s8 + $0x81] sm:$0xff]  ;;  %v315_v63 = vld [vmem:[%s3474_s8 + $0x32] sm:$0xff] }
  0x28   : > { %2902 = vmatprep.subr.bf16.mxu1 %v3353_v36  ;;  %1521 = vmatprep.mubr.bf16.mxu0 %v3526_v37  ;;  %v3377_v36 = vld [vmem:[%s4413_s1 + $0x120] sm:$0xff]   ;;  %v3657_v41 = vpack.c.bf16 %v258_v35, %v257_v32  ;;  %v198_v14 = vld [vmem:[%s3474_s8 + $0xb0] sm:$0xff]  ;;  %v3394_v32 = vld [vmem:[%s4413_s1 + $0x1a8] sm:$0xff]  }
  0x29   : > { %1617 = vmatprep.mubr.bf16.mxu1 %v292_v39  ;;  %3014 = vmatprep.subr.bf16.mxu0 %v3358_v42  ;;  %v343_v39 = vpack.c.bf16 %v312_v30, %v311_v29  ;;  %v3376_v42 = vld [vmem:[%s4413_s1 + $0x1c8] sm:$0xff]   ;;  %v199_v29 = vld [vmem:[%s3474_s8 + $0xc0] sm:$0xff] }
  0x2a   : > { %v317_v15 = vld [vmem:[%s3474_s8 + $0x4a] sm:$0xff]  ;;  %v265_v35 = vld [vmem:[%s3474_s8 + $0xd9] sm:$0xff] }
  0x2b   : > { %2903 = vmatpush3.bf16.msra.mxu1 %v3354_v38  ;;  %3015 = vmatpush3.bf16.msra.mxu0 %v3360_v46  ;;  %v3652_v38 = vpack.c.bf16 %v192_v28, %v191_v27  ;;  %v3380_v46 = vld [vmem:[%s4413_s1 + $0x128] sm:$0xff]  }
  0x2c   : > { %2904 = vmatprep.subr.bf16.mxu1 %v3355_v45  ;;  %3016 = vmatprep.subr.bf16.mxu0 %v3366_v2  ;;  %v194_v45 = vld [vmem:[%s3474_s8 + $0x80] sm:$0xff]  ;;  %v262_v2 = vld [vmem:[%s3474_s8 + $0xb1] sm:$0xff]  ;;  %v264_v18 = vld [vmem:[%s3474_s8 + $0xc9] sm:$0xff] }
  0x2d   : > { %v3751_v27 = vpack.c.bf16 %v264_v18, %v263_v17  ;;  %v3392_v28 = vld [vmem:[%s4413_s1 + $0x1e8] sm:$0xff]  }
  0x2e   : > { %1522 = vmatmul.mubr.bf16.gmra.mrb[4].mxu0 %v3550_v51  ;;  %1618 = vmatmul.mubr.bf16.gmra.mrb[4].mxu1 %v3552_v52  ;;  %v200_v30 = vld [vmem:[%s3474_s8 + $0xc8] sm:$0xff] }
  0x2f   : > { %2905 = vmatpush3.bf16.msra.mxu1 %v3356_v53  ;;  %1529 = vmatprep.mubr.bf16.mxu0 %v3557_v54  ;;  %v3381_v53 = vld [vmem:[%s4413_s1 + $0x1d0] sm:$0xff]   ;;  %v327_v18 = vld [vmem:[%s3474_s8 + $0xc2] sm:$0xff] }
  0x30   : > { %2906 = vmatprep.subr.bf16.mxu1 %v3357_v55  ;;  %1625 = vmatprep.mubr.bf16.mxu1 %v293_v56  ;;  %v3683_v55 = vpack.c.bf16 %v194_v45, %v193_v43  ;;  %v3685_v56 = vpack.c.bf16 %v314_v48, %v313_v47  ;;  %v3397_v43 = vld [vmem:[%s4413_s1 + $0x1b0] sm:$0xff]   ;;  %v201_v45 = vld [vmem:[%s3474_s8 + $0xd8] sm:$0xff]  ;;  %v202_v47 = vld [vmem:[%s3474_s8 + $0xe0] sm:$0xff] }
  0x31   : > { %3017 = vmatpush3.bf16.msra.mxu0 %v3368_v6  ;;  %v321_v48 = vld [vmem:[%s3474_s8 + $0x7a] sm:$0xff] }
  0x32   : > { %3018 = vmatprep.subr.bf16.mxu0 %v3373_v19  ;;  %v3389_v19 = vld [vmem:[%s4413_s1 + $0x1e0] sm:$0xff]  }
  0x33   : > { %2907 = vmatpush3.bf16.msra.mxu1 %v3359_v57 }
  0x34   : > { %2908 = vmatprep.subr.bf16.mxu1 %v3361_v62  ;;  %v196_v62 = vld [vmem:[%s3474_s8 + $0x98] sm:$0xff] }
  0x35   : > { %3019 = vmatpush3.bf16.msra.mxu0 %v3374_v22  ;;  %v3711_v6 = vpack.c.bf16 %v196_v62, %v195_v60  ;;  %v3742_v22 = vld [vmem:[%s4413_s1 + $0x200] sm:$0xff]   ;;  %v204_v62 = vld [vmem:[%s3474_s8 + $0xf8] sm:$0xff] }
  0x36   : > { %1530 = vmatmul.mubr.bf16.gmra.mrb[8].mxu0 %v3582_v4  ;;  %1626 = vmatmul.mubr.bf16.gmra.mrb[8].mxu1 %v3584_v5 }
  0x37   : > { %2909 = vmatpush3.bf16.msra.mxu1 %v3362_v7  ;;  %1537 = vmatprep.mubr.bf16.mxu0 %v3592_v8  ;;  %v3713_v7 = vpack.c.bf16 %v316_v0, %v315_v63  ;;  %v323_v63 = vld [vmem:[%s3474_s8 + $0x92] sm:$0xff]  ;;  %v324_v0 = vld [vmem:[%s3474_s8 + $0x9a] sm:$0xff] }
  0x38   : > { %2910 = vmatprep.subr.bf16.mxu1 %v3363_v9  ;;  %1633 = vmatprep.mubr.bf16.mxu1 %v294_v10  ;;  %v3386_v9 = vld [vmem:[%s4413_s1 + $0x198] sm:$0xff]   ;;  %v3718_v10 = vpack.c.bf16 %v262_v2, %v261_v1  ;;  %v269_v1 = vld [vmem:[%s3474_s8 + $0x109] sm:$0xff] }
  0x39   : > { %3020 = vmatprep.subr.bf16.mxu0 %v3375_v34  ;;  %v320_v34 = vld [vmem:[%s3474_s8 + $0x6a] sm:$0xff] }
  0x3a   : > { %3021 = vmatpush3.bf16.msra.mxu0 %v3377_v36  ;;  %v266_v36 = vld [vmem:[%s3474_s8 + $0xe1] sm:$0xff]  ;;  %v270_v2 = vld [vmem:[%s3474_s8 + $0x111] sm:$0xff] }
  0x3b   : > { %2911 = vmatpush3.bf16.msra.mxu1 %v3364_v11  ;;  %3022 = vmatprep.subr.bf16.mxu0 %v3379_v44  ;;  %v3387_v11 = vld [vmem:[%s4413_s1 + $0x178] sm:$0xff]   ;;  %v3780_v44 = vpack.c.bf16 %v266_v36, %v265_v35  ;;  %v3402_v36 = vld [vmem:[%s4413_s1 + $0x228] sm:$0xff]  }
  0x3c   : > { %2912 = vmatprep.subr.bf16.mxu1 %v3365_v16  ;;  %v318_v16 = vld [vmem:[%s3474_s8 + $0x52] sm:$0xff] }
  0x3e   : > { %1538 = vmatmul.mubr.bf16.gmra.mrb[12].mxu0 %v3615_v20  ;;  %1634 = vmatmul.mubr.bf16.gmra.mrb[12].mxu1 %v3617_v21 }
  0x3f   : > { %2913 = vmatpush3.bf16.msra.mxu1 %v3367_v23  ;;  %1545 = vmatprep.mubr.bf16.mxu0 %v3625_v24  ;;  %v3744_v23 = vpack.c.bf16 %v198_v14, %v197_v13  ;;  %v206_v13 = vld [vmem:[%s3474_s8 + $0x110] sm:$0xff] }
  0x40   : > { %2914 = vmatprep.subr.bf16.mxu1 %v3369_v25  ;;  %1674 = vmatprep.mubr.bf16.mxu1 %v3550_v51  ;;  %v260_v51 = vld [vmem:[%s3474_s8 + $0x99] sm:$0xff]  ;;  %v3746_v25 = vpack.c.bf16 %v318_v16, %v317_v15  ;;  %v325_v14 = vld [vmem:[%s3474_s8 + $0xaa] sm:$0xff] }
  0x41   : > { %3023 = vmatpush3.bf16.msra.mxu0 %v3380_v46  ;;  %v3687_v57 = vpack.c.bf16 %v260_v51, %v259_v50  ;;  %v3398_v46 = vld [vmem:[%s4413_s1 + $0x1f8] sm:$0xff]  }
  0x42   : > { %3024 = vmatprep.subr.bf16.mxu0 %v3383_v59  ;;  %v3400_v50 = vld [vmem:[%s4413_s1 + $0x1b8] sm:$0xff]  }
  0x43   : > { %2915 = vmatpush3.bf16.msra.mxu1 %v3370_v26  ;;  %v3391_v26 = vld [vmem:[%s4413_s1 + $0x1a0] sm:$0xff]   ;;  %v267_v51 = vld [vmem:[%s3474_s8 + $0xf1] sm:$0xff] }
  0x44   : > { %3124 = vmatprep.subr.bf16.mxu1 %v3371_v31  ;;  %v319_v31 = vld [vmem:[%s3474_s8 + $0x62] sm:$0xff]  ;;  %v326_v15 = vld [vmem:[%s3474_s8 + $0xb2] sm:$0xff] }
  0x45   : > { %3025 = vmatpush3.bf16.msra.mxu0 %v3384_v61  ;;  %v203_v61 = vld [vmem:[%s3474_s8 + $0xf0] sm:$0xff]  ;;  %v3830_v17 = vpack.c.bf16 %v326_v15, %v325_v14 }
  0x46   : > { %1546 = vmatmul.mubr.bf16.gmra.mrb[16].mxu0 %v3652_v38  ;;  %1675 = vmatmul.mubr.bf16.vlgmr.msra.gmra.mrb[16].mxu1 %v343_v39  ;;  %v3395_v39 = vld [vmem:[%s4413_s1 + $0x1f0] sm:$0xff]  }
  0x47   : > { %3125 = vmatpush3.bf16.msra.mxu1 %v3372_v40  ;;  %1553 = vmatprep.mubr.bf16.mxu0 %v3657_v41  ;;  %v3773_v40 = vpack.c.bf16 %v200_v30, %v199_v29  ;;  %v329_v29 = vld [vmem:[%s3474_s8 + $0xda] sm:$0xff]  ;;  %v3396_v30 = vld [vmem:[%s4413_s1 + $0x210] sm:$0xff]  }
  0x48   : > { %1682 = vmatprep.mubr.bf16.mxu1 %v3582_v4  ;;  %3126 = vmatprep.subr.bf16.mxu1 %v3376_v42  ;;  %v3775_v42 = vpack.c.bf16 %v320_v34, %v319_v31  ;;  %v3401_v34 = vld [vmem:[%s4413_s1 + $0x220] sm:$0xff]   ;;  %v2616_v14 = vld [vmem:[%s3474_s8 + $0x18a] sm:$0xff] }
  0x49   : > { %3026 = vmatprep.subr.bf16.mxu0 %v3387_v11  ;;  %v3818_v11 = vpack.c.bf16 %v270_v2, %v269_v1  ;;  %v341_v1 = vld [vmem:[%s3474_s8 + $0x16a] sm:$0xff] }
  0x4a   : > { %3027 = vmatpush3.bf16.msra.mxu0 %v3388_v12  ;;  %v205_v12 = vld [vmem:[%s3474_s8 + $0x108] sm:$0xff] }
  0x4b   : > { %3127 = vmatpush3.bf16.msra.mxu1 %v3378_v49  ;;  %3260 = vmatprep.subr.bf16.mxu0 %v3742_v22  ;;  %v322_v49 = vld [vmem:[%s3474_s8 + $0x82] sm:$0xff]  ;;  %v3828_v16 = vpack.c.bf16 %v206_v13, %v205_v12 }
  0x4c   : > { %3128 = vmatprep.subr.bf16.mxu1 %v3381_v53  ;;  %v268_v53 = vld [vmem:[%s3474_s8 + $0xf9] sm:$0xff]  ;;  %v3800_v59 = vpack.c.bf16 %v322_v49, %v321_v48  ;;  %v336_v48 = vld [vmem:[%s3474_s8 + $0x12a] sm:$0xff]  ;;  %v2615_v13 = vld [vmem:[%s3474_s8 + $0x182] sm:$0xff] }
  0x4d   : > { %v3802_v60 = vpack.c.bf16 %v268_v53, %v267_v51  ;;  %v339_v53 = vld [vmem:[%s3474_s8 + $0x152] sm:$0xff] }
  0x4e   : > { %1554 = vmatmul.mubr.bf16.gmra.mrb[20].mxu0 %v3683_v55  ;;  %1683 = vmatmul.mubr.bf16.gmra.mrb[20].mxu1 %v3685_v56 }
  0x4f   : > { %1561 = vmatprep.mubr.bf16.mxu0 %v3687_v57  ;;  %1690 = vmatprep.mubr.bf16.mxu1 %v3615_v20 }
  0x50   : > { %3129 = vmatpush3.bf16.msra.mxu1 %v3382_v58  ;;  %v3798_v58 = vpack.c.bf16 %v202_v47, %v201_v45  ;;  %v3403_v45 = vld [vmem:[%s4413_s1 + $0x230] sm:$0xff]   ;;  %v335_v47 = vld [vmem:[%s3474_s8 + $0x122] sm:$0xff] }
  0x51   : > { %3130 = vmatprep.subr.bf16.mxu1 %v3385_v3  ;;  %v3814_v3 = vpack.c.bf16 %v204_v62, %v203_v61  ;;  %v3892_v49 = vpack.c.bf16 %v336_v48, %v335_v47  ;;  %v340_v61 = vld [vmem:[%s3474_s8 + $0x15a] sm:$0xff] }
  0x52   : > { %v2551_v62 = vld [vmem:[%s3474_s8 + $0x180] sm:$0xff] }
  0x54   : > { %3131 = vmatpush3.bf16.msra.mxu1 %v3386_v9  ;;  %v3816_v9 = vpack.c.bf16 %v324_v0, %v323_v63  ;;  %v3910_v63 = vpack.c.bf16 %v340_v61, %v339_v53 }
  0x55   : > { %3132 = vmatprep.subr.bf16.mxu1 %v3389_v19  ;;  %v328_v19 = vld [vmem:[%s3474_s8 + $0xca] sm:$0xff] }
  0x56   : > { %1562 = vmatmul.mubr.bf16.gmra.mrb[24].mxu0 %v3711_v6  ;;  %1691 = vmatmul.mubr.bf16.gmra.mrb[24].mxu1 %v3713_v7 }
  0x57   : > { %1569 = vmatprep.mubr.bf16.mxu0 %v3718_v10  ;;  %1698 = vmatprep.mubr.bf16.mxu1 %v3652_v38 }
  0x58   : > { %3133 = vmatpush3.bf16.msra.mxu1 %v3391_v26  ;;  %v3838_v26 = vpack.c.bf16 %v328_v19, %v327_v18  ;;  %v2584_v18 = vld [vmem:[%s3474_s8 + $0x189] sm:$0xff] }
  0x59   : > { %3134 = vmatprep.subr.bf16.mxu1 %v3392_v28  ;;  %v3393_v28 = vld [vmem:[%s4413_s1 + $0x208] sm:$0xff]  }
  0x5c   : > { %3135 = vmatpush3.bf16.msra.mxu1 %v3394_v32  ;;  %v332_v32 = vld [vmem:[%s3474_s8 + $0xfa] sm:$0xff] }
  0x5d   : > { %3136 = vmatprep.subr.bf16.mxu1 %v3395_v39  ;;  %v333_v39 = vld [vmem:[%s3474_s8 + $0x10a] sm:$0xff] }
  0x5e   : > { %1570 = vmatmul.mubr.bf16.gmra.mrb[28].mxu0 %v3744_v23  ;;  %1699 = vmatmul.mubr.bf16.gmra.mrb[28].mxu1 %v3746_v25 }
  0x5f   : > { %1577 = vmatprep.mubr.bf16.mxu0 %v3751_v27  ;;  %1706 = vmatprep.mubr.bf16.mxu1 %v3683_v55 }
  0x60   : > { %3137 = vmatpush3.bf16.msra.mxu1 %v3397_v43  ;;  %v334_v43 = vld [vmem:[%s3474_s8 + $0x112] sm:$0xff] }
  0x61   : > { %3138 = vmatprep.subr.bf16.mxu1 %v3398_v46  ;;  %v3881_v46 = vpack.c.bf16 %v334_v43, %v333_v39 }
  0x64   : > { %3139 = vmatpush3.bf16.msra.mxu1 %v3400_v50  ;;  %v338_v50 = vld [vmem:[%s3474_s8 + $0x142] sm:$0xff] }
  0x66   : > { %1578 = vmatmul.mubr.bf16.gmra.mrb[32].mxu0 %v3773_v40  ;;  %1707 = vmatmul.mubr.bf16.gmra.mrb[32].mxu1 %v3775_v42 }
  0x67   : > { %1585 = vmatprep.mubr.bf16.mxu0 %v3780_v44  ;;  %1714 = vmatprep.mubr.bf16.mxu1 %v3711_v6 }
  0x6e   : > { %1586 = vmatmul.mubr.bf16.gmra.mrb[36].mxu0 %v3798_v58  ;;  %1715 = vmatmul.mubr.bf16.gmra.mrb[36].mxu1 %v3800_v59 }
  0x6f   : > { %1593 = vmatprep.mubr.bf16.mxu0 %v3802_v60  ;;  %1722 = vmatprep.mubr.bf16.mxu1 %v3744_v23 }
  0x76   : > { %1594 = vmatmul.mubr.bf16.gmra.mrb[40].mxu0 %v3814_v3  ;;  %1723 = vmatmul.mubr.bf16.gmra.mrb[40].mxu1 %v3816_v9 }
  0x77   : > { %1601 = vmatprep.mubr.bf16.mxu0 %v3818_v11  ;;  %1730 = vmatprep.mubr.bf16.mxu1 %v3773_v40 }
  0x7e   : > { %1602 = vmatmul.mubr.bf16.gmra.mrb[44].mxu0 %v3828_v16  ;;  %1731 = vmatmul.mubr.bf16.gmra.mrb[44].mxu1 %v3830_v17 }
  0x7f   : > { %1738 = vmatprep.mubr.bf16.mxu1 %v3798_v58  ;;  %1835 = vmatprep.mubr.bf16.mxu0 %v3685_v56  ;;  %v330_v56 = vld [vmem:[%s3474_s8 + $0xe2] sm:$0xff] }
  0x80   : > { %v3853_v31 = vpack.c.bf16 %v330_v56, %v329_v29 }
  0x86   : > { %1739 = vmatmul.mubr.bf16.gmra.mrb[48].mxu1 %v3838_v26  ;;  %1836 = vmatmul.mubr.bf16.vlgmr.msra.gmra.mrb[48].mxu0 %v3526_v37  ;;  %v3399_v37 = vld [vmem:[%s4413_s1 + $0x218] sm:$0xff]  }
  0x87   : > { %3261 = vmatpush3.bf16.msra.mxu0 %v3742_v22  ;;  %1746 = vmatprep.mubr.bf16.mxu1 %v3814_v3  ;;  %v331_v22 = vld [vmem:[%s3474_s8 + $0xf2] sm:$0xff] }
  0x88   : > { %1843 = vmatprep.mubr.bf16.mxu0 %v3713_v7  ;;  %3262 = vmatprep.subr.bf16.mxu0 %v3393_v28  ;;  %v3867_v35 = vpack.c.bf16 %v332_v32, %v331_v22 }
  0x8b   : > { %3263 = vmatpush3.bf16.msra.mxu0 %v3393_v28 }
  0x8c   : > { %3264 = vmatprep.subr.bf16.mxu0 %v3396_v30 }
  0x8e   : > { %1747 = vmatmul.mubr.bf16.gmra.mrb[52].mxu1 %v3853_v31  ;;  %1844 = vmatmul.mubr.bf16.gmra.mrb[52].mxu0 %v3557_v54 }
  0x8f   : > { %1754 = vmatprep.mubr.bf16.mxu1 %v3828_v16  ;;  %1851 = vmatprep.mubr.bf16.mxu0 %v3746_v25 }
  0x90   : > { %3265 = vmatpush3.bf16.msra.mxu0 %v3396_v30 }
  0x91   : > { %3266 = vmatprep.subr.bf16.mxu0 %v3399_v37 }
  0x94   : > { %3267 = vmatpush3.bf16.msra.mxu0 %v3399_v37 }
  0x95   : > { %3268 = vmatprep.subr.bf16.mxu0 %v3401_v34 }
  0x96   : > { %1755 = vmatmul.mubr.bf16.gmra.mrb[56].mxu1 %v3867_v35  ;;  %1852 = vmatmul.mubr.bf16.gmra.mrb[56].mxu0 %v3592_v8 }
  0x97   : > { %1762 = vmatprep.mubr.bf16.mxu1 %v3517_v33  ;;  %1859 = vmatprep.mubr.bf16.mxu0 %v3775_v42  ;;  %v3404_v33 = vld [vmem:[%s4413_s1 + $0x238] sm:$0xff]  }
  0x98   : > { %3269 = vmatpush3.bf16.msra.mxu0 %v3401_v34 }
  0x99   : > { %3270 = vmatprep.subr.bf16.mxu0 %v3402_v36 }
  0x9c   : > { %3271 = vmatpush3.bf16.msra.mxu0 %v3402_v36 }
  0x9d   : > { %3272 = vmatprep.subr.bf16.mxu0 %v3403_v45 }
  0x9e   : > { %1763 = vmatmul.mubr.bf16.gmra.mrb[60].mxu1 %v3881_v46  ;;  %1860 = vmatmul.mubr.bf16.gmra.mrb[60].mxu0 %v3625_v24 }
  0x9f   : > { %1770 = vmatprep.mubr.bf16.mxu1 %v3552_v52  ;;  %1867 = vmatprep.mubr.bf16.mxu0 %v3800_v59  ;;  %v337_v52 = vld [vmem:[%s3474_s8 + $0x13a] sm:$0xff] }
  0xa0   : > { %3273 = vmatpush3.bf16.msra.mxu0 %v3403_v45  ;;  %v3900_v51 = vpack.c.bf16 %v338_v50, %v337_v52 }
  0xa1   : > { %3274 = vmatprep.subr.bf16.mxu0 %v3404_v33 }
  0xa4   : > { %3275 = vmatpush3.bf16.msra.mxu0 %v3404_v33 }
  0xa6   : > { %1771 = vmatmul.mubr.bf16.gmra.mrb[64].mxu1 %v3892_v49  ;;  %1868 = vmatmul.mubr.bf16.gmra.mrb[64].mxu0 %v3657_v41 }
  0xa7   : > { %1778 = vmatprep.mubr.bf16.mxu1 %v3584_v5  ;;  %1875 = vmatprep.mubr.bf16.mxu0 %v3816_v9  ;;  %v2552_v5 = vld [vmem:[%s3474_s8 + $0x188] sm:$0xff] }
  0xa8   : > { %v3912_v0 = vpack.c.bf16 %v2552_v5, %v2551_v62 }
  0xae   : > { %1779 = vmatmul.mubr.bf16.gmra.mrb[68].mxu1 %v3900_v51  ;;  %1876 = vmatmul.mubr.bf16.gmra.mrb[68].mxu0 %v3687_v57 }
  0xaf   : > { %1786 = vmatprep.mubr.bf16.mxu1 %v3617_v21  ;;  %1883 = vmatprep.mubr.bf16.mxu0 %v3830_v17  ;;  %v342_v21 = vld [vmem:[%s3474_s8 + $0x172] sm:$0xff] }
  0xb0   : > { %v3920_v2 = vpack.c.bf16 %v342_v21, %v341_v1 }
  0xb6   : > { %1787 = vmatmul.mubr.bf16.gmra.mrb[72].mxu1 %v3910_v63  ;;  %1884 = vmatmul.mubr.bf16.gmra.mrb[72].mxu0 %v3718_v10 }
  0xb7   : > { %1794 = vmatprep.mubr.bf16.mxu1 %v3912_v0  ;;  %1891 = vmatprep.mubr.bf16.mxu0 %v3838_v26 }
  0xbe   : > { %1795 = vmatmul.mubr.bf16.gmra.mrb[76].mxu1 %v3920_v2  ;;  %1892 = vmatmul.mubr.bf16.gmra.mrb[76].mxu0 %v3751_v27 }
  0xbf   : > { %1899 = vmatprep.mubr.bf16.mxu0 %v3853_v31  ;;  %1996 = vmatprep.mubr.bf16.mxu1 %v3557_v54  ;;  %v2575_v54 = vld [vmem:[%s3474_s8 + $0x121] sm:$0xff] }
  0xc6   : > { %1900 = vmatmul.mubr.bf16.gmra.mrb[80].mxu0 %v3780_v44  ;;  %1997 = vmatmul.mubr.bf16.vlgmr.msra.gmra.mrb[80].mxu1 %v3582_v4  ;;  %v2576_v4 = vld [vmem:[%s3474_s8 + $0x129] sm:$0xff] }
  0xc7   : > { %1907 = vmatprep.mubr.bf16.mxu0 %v3867_v35  ;;  %2004 = vmatprep.mubr.bf16.mxu1 %v3592_v8  ;;  %v3940_v8 = vpack.c.bf16 %v2576_v4, %v2575_v54 }
  0xce   : > { %1908 = vmatmul.mubr.bf16.gmra.mrb[84].mxu0 %v3802_v60  ;;  %2005 = vmatmul.mubr.bf16.gmra.mrb[84].mxu1 %v3615_v20  ;;  %v2577_v20 = vld [vmem:[%s3474_s8 + $0x139] sm:$0xff] }
  0xcf   : > { %1915 = vmatprep.mubr.bf16.mxu0 %v3881_v46  ;;  %2012 = vmatprep.mubr.bf16.mxu1 %v3625_v24  ;;  %v2578_v24 = vld [vmem:[%s3474_s8 + $0x141] sm:$0xff] }
  0xd6   : > { %1916 = vmatmul.mubr.bf16.gmra.mrb[88].mxu0 %v3818_v11  ;;  %2013 = vmatmul.mubr.bf16.gmra.mrb[88].mxu1 %v3652_v38  ;;  %v3948_v38 = vpack.c.bf16 %v2578_v24, %v2577_v20 }
  0xd7   : > { %1923 = vmatprep.mubr.bf16.mxu0 %v3892_v49  ;;  %2020 = vmatprep.mubr.bf16.mxu1 %v3657_v41  ;;  %v2579_v41 = vld [vmem:[%s3474_s8 + $0x151] sm:$0xff] }
  0xde   : > { %1924 = vmatmul.mubr.bf16.gmra.mrb[92].mxu0 %v3940_v8  ;;  %2021 = vmatmul.mubr.bf16.gmra.mrb[92].mxu1 %v3683_v55  ;;  %v2580_v55 = vld [vmem:[%s3474_s8 + $0x159] sm:$0xff] }
  0xdf   : > { %1931 = vmatprep.mubr.bf16.mxu0 %v3900_v51  ;;  %2028 = vmatprep.mubr.bf16.mxu1 %v3687_v57  ;;  %v3956_v12 = vpack.c.bf16 %v2580_v55, %v2579_v41  ;;  %v2581_v57 = vld [vmem:[%s3474_s8 + $0x169] sm:$0xff] }
  0xe6   : > { %1932 = vmatmul.mubr.bf16.gmra.mrb[96].mxu0 %v3948_v38  ;;  %2029 = vmatmul.mubr.bf16.gmra.mrb[96].mxu1 %v3711_v6  ;;  %v2582_v6 = vld [vmem:[%s3474_s8 + $0x171] sm:$0xff] }
  0xe7   : > { %1939 = vmatprep.mubr.bf16.mxu0 %v3910_v63  ;;  %2036 = vmatprep.mubr.bf16.mxu1 %v3718_v10  ;;  %v3966_v15 = vpack.c.bf16 %v2582_v6, %v2581_v57  ;;  %v3968_v10 = vpack.c.bf16 %v2616_v14, %v2615_v13 }
  0xee   : > { %1940 = vmatmul.mubr.bf16.gmra.mrb[100].mxu0 %v3956_v12  ;;  %2037 = vmatmul.mubr.bf16.gmra.mrb[100].mxu1 %v3744_v23  ;;  %v2583_v23 = vld [vmem:[%s3474_s8 + $0x181] sm:$0xff] }
  0xef   : > { %1947 = vmatprep.mubr.bf16.mxu0 %v3920_v2  ;;  %2044 = vmatprep.mubr.bf16.mxu1 %v3751_v27  ;;  %v3976_v56 = vpack.c.bf16 %v2584_v18, %v2583_v23 }
  0xf6   : > { %1948 = vmatmul.mubr.bf16.gmra.mrb[104].mxu0 %v3966_v15  ;;  %2045 = vmatmul.mubr.bf16.gmra.mrb[104].mxu1 %v3773_v40 }
  0xf7   : > { %1955 = vmatprep.mubr.bf16.mxu0 %v3968_v10  ;;  %2052 = vmatprep.mubr.bf16.mxu1 %v3780_v44 }
  0xf9   : > { %v2804_v19 = vpop.f32.mrb[0].mxu0  ;;  %v2876_v27 = vpop.f32.mrb[0].mxu1 }
  0xfa   : > { %v2805_v28 = vpop.f32.mrb[1].mxu0  ;;  %v2877_v29 = vpop.f32.mrb[1].mxu1 }
  0xfb   : > { %v3978_v30 = vadd.f32 %v2805_v28, %v2804_v19  ;;  %v3980_v37 = vadd.f32 %v2877_v29, %v2876_v27  ;;  %v2807_v22 = vpop.f32.mrb[2].mxu0  ;;  %v2879_v32 = vpop.f32.mrb[2].mxu1  ;;  %v2639_v28 = vld [vmem:[%s3474_s8 + $0x138] sm:$0xff]  ;;  %v2640_v29 = vld [vmem:[%s3474_s8 + $0x140] sm:$0xff] }
  0xfc   : > { %v2808_v34 = vpop.f32.mrb[3].mxu0  ;;  %v2880_v40 = vpop.f32.mrb[3].mxu1 }
  0xfd   : > { %v3982_v36 = vadd.f32 %v2808_v34, %v2807_v22  ;;  %v3984_v39 = vadd.f32 %v2880_v40, %v2879_v32 }
  0xfe   : > { %1956 = vmatmul.mubr.bf16.gmra.mrb[108].mxu0 %v3976_v56  ;;  %2053 = vmatmul.mubr.bf16.gmra.mrb[108].mxu1 %v3798_v58 }
  0xff   : > { %2060 = vmatprep.mubr.bf16.mxu1 %v3802_v60  ;;  %3276 = vmatprep.mubr.bf16.mxu0 %v3713_v7 }
 0x101   : > { %v2810_v44 = vpop.f32.mrb[4].mxu0  ;;  %v2882_v43 = vpop.f32.mrb[4].mxu1 }
 0x102   : > { %v2811_v45 = vpop.f32.mrb[5].mxu0  ;;  %v2883_v33 = vpop.f32.mrb[5].mxu1 }
 0x103   : > { %v3990_v47 = vadd.f32 %v2811_v45, %v2810_v44  ;;  %v3992_v48 = vadd.f32 %v2883_v33, %v2882_v43  ;;  %v2813_v52 = vpop.f32.mrb[6].mxu0  ;;  %v2885_v50 = vpop.f32.mrb[6].mxu1  ;;  %v612_v44 = vpack.c.bf16 %v2640_v29, %v2639_v28 }
 0x104   : > { %v2814_v53 = vpop.f32.mrb[7].mxu0  ;;  %v2886_v61 = vpop.f32.mrb[7].mxu1 }
 0x105   : > { %v3994_v62 = vadd.f32 %v2814_v53, %v2813_v52  ;;  %v3996_v5 = vadd.f32 %v2886_v61, %v2885_v50 }
 0x106   : > { %2061 = vmatmul.mubr.bf16.gmra.mrb[112].mxu1 %v3814_v3  ;;  %3277 = vmatmul.mubr.bf16.vlgmr.msra.gmra.mrb[112].mxu0 %v3746_v25 }
 0x107   : > { %2068 = vmatprep.mubr.bf16.mxu1 %v3818_v11  ;;  %3280 = vmatprep.mubr.bf16.mxu0 %v3775_v42  ;;  %v2637_v42 = vld [vmem:[%s3474_s8 + $0x120] sm:$0xff]  ;;  %v2638_v11 = vld [vmem:[%s3474_s8 + $0x128] sm:$0xff] }
 0x108   : > { %v611_v14 = vpack.c.bf16 %v2638_v11, %v2637_v42 }
 0x109   : > { %v2816_v7 = vpop.f32.mrb[8].mxu0  ;;  %v2888_v58 = vpop.f32.mrb[8].mxu1 }
 0x10a   : > { %v2817_v60 = vpop.f32.mrb[9].mxu0  ;;  %v2889_v1 = vpop.f32.mrb[9].mxu1 }
 0x10b   : > { %v4002_v21 = vadd.f32 %v2817_v60, %v2816_v7  ;;  %v4004_v54 = vadd.f32 %v2889_v1, %v2888_v58  ;;  %v2819_v4 = vpop.f32.mrb[10].mxu0  ;;  %v2891_v20 = vpop.f32.mrb[10].mxu1  ;;  %v2641_v7 = vld [vmem:[%s3474_s8 + $0x150] sm:$0xff]  ;;  %v2642_v58 = vld [vmem:[%s3474_s8 + $0x158] sm:$0xff] }
 0x10c   : > { %v2820_v24 = vpop.f32.mrb[11].mxu0  ;;  %v2892_v3 = vpop.f32.mrb[11].mxu1 }
 0x10d   : > { %v4006_v41 = vadd.f32 %v2820_v24, %v2819_v4  ;;  %v4008_v25 = vadd.f32 %v2892_v3, %v2891_v20  ;;  %v613_v20 = vpack.c.bf16 %v2642_v58, %v2641_v7 }
 0x10e   : > { %2069 = vmatmul.mubr.bf16.gmra.mrb[116].mxu1 %v3828_v16  ;;  %3281 = vmatmul.mubr.bf16.gmra.mrb[116].mxu0 %v3800_v59 }
 0x10f   : > { %2076 = vmatprep.mubr.bf16.mxu1 %v3940_v8  ;;  %3284 = vmatprep.mubr.bf16.mxu0 %v3816_v9 }
 0x111   : > { %v2822_v55 = vpop.f32.mrb[12].mxu0  ;;  %v2894_v57 = vpop.f32.mrb[12].mxu1 }
 0x112   : > { %v2823_v6 = vpop.f32.mrb[13].mxu0  ;;  %v2895_v13 = vpop.f32.mrb[13].mxu1 }
 0x113   : > { %v4016_v23 = vadd.f32 %v2823_v6, %v2822_v55  ;;  %v4018_v18 = vadd.f32 %v2895_v13, %v2894_v57  ;;  %v2825_v16 = vpop.f32.mrb[14].mxu0  ;;  %v2897_v19 = vpop.f32.mrb[14].mxu1  ;;  %v2643_v6 = vld [vmem:[%s3474_s8 + $0x168] sm:$0xff]  ;;  %v2644_v13 = vld [vmem:[%s3474_s8 + $0x170] sm:$0xff] }
 0x114   : > { %v2826_v59 = vpop.f32.mrb[15].mxu0  ;;  %v2898_v27 = vpop.f32.mrb[15].mxu1 }
 0x115   : > { %v4020_v8 = vadd.f32 %v2826_v59, %v2825_v16  ;;  %v4022_v9 = vadd.f32 %v2898_v27, %v2897_v19  ;;  %v614_v59 = vpack.c.bf16 %v2644_v13, %v2643_v6 }
 0x116   : > { %2077 = vmatmul.mubr.bf16.gmra.mrb[120].mxu1 %v611_v14  ;;  %3285 = vmatmul.mubr.bf16.gmra.mrb[120].mxu0 %v3830_v17 }
 0x117   : > { %2084 = vmatprep.mubr.bf16.mxu1 %v3948_v38  ;;  %3288 = vmatprep.mubr.bf16.mxu0 %v3838_v26 }
 0x119   : > { %v2828_v22 = vpop.f32.mrb[16].mxu0  ;;  %v2916_v32 = vpop.f32.mrb[16].mxu1 }
 0x11a   : > { %v2829_v34 = vpop.f32.mrb[17].mxu0  ;;  %v2917_v40 = vpop.f32.mrb[17].mxu1 }
 0x11b   : > { %v4029_v43 = vadd.f32 %v2829_v34, %v2828_v22  ;;  %v2918_v45 = vadd.f32 %v2917_v40, %v2916_v32  ;;  %v2831_v33 = vpop.f32.mrb[18].mxu0  ;;  %v2919_v52 = vpop.f32.mrb[18].mxu1  ;;  %v2679_v40 = vld [vmem:[%s3474_s8 + $0x199] sm:$0xff] }
 0x11c   : > { %v2832_v50 = vpop.f32.mrb[19].mxu0  ;;  %v2920_v17 = vpop.f32.mrb[19].mxu1 }
 0x11d   : > { %v4032_v38 = vadd.f32 %v2918_v45, %v3978_v30  ;;  %v4034_v26 = vadd.f32 %v2832_v50, %v2831_v33  ;;  %v2921_v53 = vadd.f32 %v2920_v17, %v2919_v52 }
 0x11e   : > { %2085 = vmatmul.mubr.bf16.gmra.mrb[124].mxu1 %v612_v44  ;;  %3289 = vmatmul.mubr.bf16.gmra.mrb[124].mxu0 %v3853_v31  ;;  %v2680_v44 = vld [vmem:[%s3474_s8 + $0x1a1] sm:$0xff] }
 0x11f   : > { %v4038_v61 = vadd.f32 %v2921_v53, %v3982_v36  ;;  %2092 = vmatprep.mubr.bf16.mxu1 %v3956_v12  ;;  %3292 = vmatprep.mubr.bf16.mxu0 %v3867_v35  ;;  %v680_v53 = vpack.c.bf16 %v2680_v44, %v2679_v40 }
 0x121   : > { %v2834_v60 = vpop.f32.mrb[20].mxu0  ;;  %v2922_v1 = vpop.f32.mrb[20].mxu1 }
 0x122   : > { %v2835_v4 = vpop.f32.mrb[21].mxu0  ;;  %v2923_v30 = vpop.f32.mrb[21].mxu1 }
 0x123   : > { %v4044_v24 = vadd.f32 %v2835_v4, %v2834_v60  ;;  %v2924_v3 = vadd.f32 %v2923_v30, %v2922_v1  ;;  %v2837_v31 = vpop.f32.mrb[22].mxu0  ;;  %v2925_v42 = vpop.f32.mrb[22].mxu1  ;;  %v2647_v1 = vld [vmem:[%s3474_s8 + $0x198] sm:$0xff]  ;;  %v2648_v30 = vld [vmem:[%s3474_s8 + $0x1a0] sm:$0xff] }
 0x124   : > { %v2838_v36 = vpop.f32.mrb[23].mxu0  ;;  %v2926_v11 = vpop.f32.mrb[23].mxu1 }
 0x125   : > { %v4047_v12 = vadd.f32 %v2924_v3, %v3990_v47  ;;  %v4049_v35 = vadd.f32 %v2838_v36, %v2837_v31  ;;  %v2927_v55 = vadd.f32 %v2926_v11, %v2925_v42  ;;  %v2712_v3 = vld [vmem:[%s3474_s8 + $0x1a2] sm:$0xff]  ;;  %v616_v11 = vpack.c.bf16 %v2648_v30, %v2647_v1 }
 0x126   : > { %2093 = vmatmul.mubr.bf16.gmra.mrb[128].mxu1 %v613_v20  ;;  %3293 = vmatmul.mubr.bf16.gmra.mrb[128].mxu0 %v3881_v46  ;;  %v2711_v20 = vld [vmem:[%s3474_s8 + $0x19a] sm:$0xff]  ;;  %s2787_s8 = sshll.u32 %s4417_s13, 8 }
 0x127   : > { %v4053_v57 = vadd.f32 %v2927_v55, %v3994_v62  ;;  %2100 = vmatprep.mubr.bf16.mxu1 %v3966_v15  ;;  %3296 = vmatprep.mubr.bf16.mxu0 %v3892_v49  ;;  %v744_v55 = vpack.c.bf16 %v2712_v3, %v2711_v20  ;;  %s4321_s19 = scalar_lea.vmem %s4414_s2, %s2787_s8 }
 0x129   : > { %v2840_v14 = vpop.f32.mrb[24].mxu0  ;;  %v2928_v16 = vpop.f32.mrb[24].mxu1 }
 0x12a   : > { %v2841_v19 = vpop.f32.mrb[25].mxu0  ;;  %v2929_v47 = vpop.f32.mrb[25].mxu1 }
 0x12b   : > { %v4059_v27 = vadd.f32 %v2841_v19, %v2840_v14  ;;  %v2930_v28 = vadd.f32 %v2929_v47, %v2928_v16  ;;  %v2843_v46 = vpop.f32.mrb[26].mxu0  ;;  %v2931_v29 = vpop.f32.mrb[26].mxu1 }
 0x12c   : > { %v2844_v62 = vpop.f32.mrb[27].mxu0  ;;  %v2932_v22 = vpop.f32.mrb[27].mxu1 }
 0x12d   : > { %v4062_v15 = vadd.f32 %v2930_v28, %v4002_v21  ;;  %v4064_v49 = vadd.f32 %v2844_v62, %v2843_v46  ;;  %v2933_v32 = vadd.f32 %v2932_v22, %v2931_v29 }
 0x12e   : > { %2101 = vmatmul.mubr.bf16.gmra.mrb[132].mxu1 %v614_v59  ;;  %3297 = vmatmul.mubr.bf16.gmra.mrb[132].mxu0 %v3900_v51 }
 0x12f   : > { %v4068_v34 = vadd.f32 %v2933_v32, %v4006_v41  ;;  %2108 = vmatprep.mubr.bf16.mxu1 %v3976_v56  ;;  %3300 = vmatprep.mubr.bf16.mxu0 %v3910_v63 }
 0x131   : > { %v2846_v45 = vpop.f32.mrb[28].mxu0  ;;  %v2934_v33 = vpop.f32.mrb[28].mxu1 }
 0x132   : > { %v2847_v21 = vpop.f32.mrb[29].mxu0  ;;  %v2935_v52 = vpop.f32.mrb[29].mxu1 }
 0x133   : > { %v4074_v50 = vadd.f32 %v2847_v21, %v2846_v45  ;;  %v2936_v17 = vadd.f32 %v2935_v52, %v2934_v33  ;;  %v2849_v51 = vpop.f32.mrb[30].mxu0  ;;  %v2937_v41 = vpop.f32.mrb[30].mxu1 }
 0x134   : > { %v2850_v7 = vpop.f32.mrb[31].mxu0  ;;  %v2938_v56 = vpop.f32.mrb[31].mxu1 }
 0x135   : > { %v4077_v63 = vadd.f32 %v2936_v17, %v4016_v23  ;;  %v4079_v58 = vadd.f32 %v2850_v7, %v2849_v51  ;;  %v2939_v60 = vadd.f32 %v2938_v56, %v2937_v41 }
 0x136   : > { %2109 = vmatmul.mubr.bf16.gmra.mrb[136].mxu1 %v3912_v0  ;;  %3301 = vmatmul.mubr.bf16.gmra.mrb[136].mxu0 %v3920_v2 }
 0x137   : > { %v4085_v4 = vadd.f32 %v2939_v60, %v4020_v8  ;;  %2116 = vmatprep.mubr.bf16.mxu1 %v680_v53  ;;  %3304 = vmatprep.mubr.bf16.mxu0 %v3968_v10 }
 0x139   : > { %v2852_v31 = vpop.f32.mrb[32].mxu0  ;;  %v2940_v23 = vpop.f32.mrb[32].mxu1 }
 0x13a   : > { %v2853_v42 = vpop.f32.mrb[33].mxu0  ;;  %v2941_v36 = vpop.f32.mrb[33].mxu1 }
 0x13b   : > { %v4091_v6 = vadd.f32 %v2853_v42, %v2852_v31  ;;  %v2942_v0 = vadd.f32 %v2941_v36, %v2940_v23  ;;  %v2855_v2 = vpop.f32.mrb[34].mxu0  ;;  %v2943_v13 = vpop.f32.mrb[34].mxu1 }
 0x13c   : > { %v2856_v14 = vpop.f32.mrb[35].mxu0  ;;  %v2944_v8 = vpop.f32.mrb[35].mxu1 }
 0x13d   : > { %v4094_v16 = vadd.f32 %v2942_v0, %v4029_v43  ;;  %v2857_v10 = vadd.f32 %v2856_v14, %v2855_v2  ;;  %v2945_v19 = vadd.f32 %v2944_v8, %v2943_v13 }
 0x13e   : > { %2117 = vmatmul.mubr.bf16.gmra.mrb[140].mxu1 %v616_v11  ;;  %3305 = vmatmul.mubr.bf16.gmra.mrb[140].mxu0 %v744_v55 }
 0x13f   : > { %v4097_v47 = vadd.f32 %v2945_v19, %v4034_v26 }
 0x141   : > { %v2858_v59 = vpop.f32.mrb[36].mxu0  ;;  %v2946_v28 = vpop.f32.mrb[36].mxu1 }
 0x142   : > { %v2859_v46 = vpop.f32.mrb[37].mxu0  ;;  %v2947_v29 = vpop.f32.mrb[37].mxu1 }
 0x143   : > { %v4099_v62 = vadd.f32 %v2859_v46, %v2858_v59  ;;  %v2948_v22 = vadd.f32 %v2947_v29, %v2946_v28  ;;  %v2861_v32 = vpop.f32.mrb[38].mxu0  ;;  %v2949_v40 = vpop.f32.mrb[38].mxu1 }
 0x144   : > { %v2862_v44 = vpop.f32.mrb[39].mxu0  ;;  %v2950_v45 = vpop.f32.mrb[39].mxu1 }
 0x145   : > { %v4102_v43 = vadd.f32 %v2948_v22, %v4044_v24  ;;  %v2863_v33 = vadd.f32 %v2862_v44, %v2861_v32  ;;  %v2951_v21 = vadd.f32 %v2950_v45, %v2949_v40 }
 0x147   : > { %v4105_v52 = vadd.f32 %v2951_v21, %v4049_v35 }
 0x149   : > { %v2864_v26 = vpop.f32.mrb[40].mxu0  ;;  %v2952_v17 = vpop.f32.mrb[40].mxu1 }
 0x14a   : > { %v2865_v51 = vpop.f32.mrb[41].mxu0  ;;  %v2953_v41 = vpop.f32.mrb[41].mxu1 }
 0x14b   : > { %v4107_v53 = vadd.f32 %v2865_v51, %v2864_v26  ;;  %v2954_v7 = vadd.f32 %v2953_v41, %v2952_v17  ;;  %v2867_v56 = vpop.f32.mrb[42].mxu0  ;;  %v2955_v60 = vpop.f32.mrb[42].mxu1 }
 0x14c   : > { %v2868_v1 = vpop.f32.mrb[43].mxu0  ;;  %v2956_v30 = vpop.f32.mrb[43].mxu1 }
 0x14d   : > { %v4110_v20 = vadd.f32 %v2954_v7, %v4059_v27  ;;  %v4112_v24 = vadd.f32 %v2868_v1, %v2867_v56  ;;  %v2957_v3 = vadd.f32 %v2956_v30, %v2955_v60 }
 0x14f   : > { %v4115_v35 = vadd.f32 %v2957_v3, %v4064_v49 }
 0x151   : > { %v2870_v31 = vpop.f32.mrb[44].mxu0  ;;  %v2958_v23 = vpop.f32.mrb[44].mxu1 }
 0x152   : > { %v2871_v42 = vpop.f32.mrb[45].mxu0  ;;  %v2959_v36 = vpop.f32.mrb[45].mxu1 }
 0x153   : > { %v4117_v11 = vadd.f32 %v2871_v42, %v2870_v31  ;;  %v2960_v55 = vadd.f32 %v2959_v36, %v2958_v23  ;;  %v2873_v0 = vpop.f32.mrb[46].mxu0  ;;  %v2961_v2 = vpop.f32.mrb[46].mxu1 }
 0x154   : > { %v2874_v13 = vpop.f32.mrb[47].mxu0  ;;  %v2962_v14 = vpop.f32.mrb[47].mxu1 }
 0x155   : > { %v4120_v27 = vadd.f32 %v2960_v55, %v4074_v50  ;;  %v4122_v8 = vadd.f32 %v2874_v13, %v2873_v0  ;;  %v2963_v19 = vadd.f32 %v2962_v14, %v2961_v2 }
 0x157   : > { %v4125_v49 = vadd.f32 %v2963_v19, %v4079_v58 }
 0x159   : > { %v2964_v59 = vpop.f32.mrb[48].mxu1  ;;  %v3028_v28 = vpop.f32.mrb[48].mxu0 }
 0x15a   : > { %v2965_v46 = vpop.f32.mrb[49].mxu1  ;;  %v3029_v29 = vpop.f32.mrb[49].mxu0 }
 0x15b   : > { %v2966_v22 = vadd.f32 %v2965_v46, %v2964_v59  ;;  %v3030_v32 = vadd.f32 %v3029_v29, %v3028_v28  ;;  %v2967_v40 = vpop.f32.mrb[50].mxu1  ;;  %v3031_v44 = vpop.f32.mrb[50].mxu0 }
 0x15c   : > { %v2968_v45 = vpop.f32.mrb[51].mxu1  ;;  %v3032_v21 = vpop.f32.mrb[51].mxu0 }
 0x15d   : > { %v4128_v26 = vadd.f32 %v2966_v22, %v4091_v6  ;;  %v4131_v50 = vadd.f32 %v3030_v32, %v4032_v38  ;;  %v2969_v17 = vadd.f32 %v2968_v45, %v2967_v40  ;;  %v3033_v51 = vadd.f32 %v3032_v21, %v3031_v44 }
 0x15f   : > { %v4133_v58 = vadd.f32 %v2969_v17, %v2857_v10  ;;  %v4136_v41 = vadd.f32 %v3033_v51, %v4038_v61 }
 0x161   : > { %v2970_v7 = vpop.f32.mrb[52].mxu1  ;;  %v3034_v56 = vpop.f32.mrb[52].mxu0 }
 0x162   : > { %v2971_v60 = vpop.f32.mrb[53].mxu1  ;;  %v3035_v1 = vpop.f32.mrb[53].mxu0 }
 0x163   : > { %v2972_v30 = vadd.f32 %v2971_v60, %v2970_v7  ;;  %v3036_v3 = vadd.f32 %v3035_v1, %v3034_v56  ;;  %v2973_v31 = vpop.f32.mrb[54].mxu1  ;;  %v3037_v23 = vpop.f32.mrb[54].mxu0 }
 0x164   : > { %v2974_v6 = vpop.f32.mrb[55].mxu1  ;;  %v3038_v42 = vpop.f32.mrb[55].mxu0 }
 0x165   : > { %v4139_v38 = vadd.f32 %v2972_v30, %v4099_v62  ;;  %v4142_v36 = vadd.f32 %v3036_v3, %v4047_v12  ;;  %v2975_v10 = vadd.f32 %v2974_v6, %v2973_v31  ;;  %v3039_v55 = vadd.f32 %v3038_v42, %v3037_v23 }
 0x167   : > { %v4144_v61 = vadd.f32 %v2975_v10, %v2863_v33  ;;  %v4147_v0 = vadd.f32 %v3039_v55, %v4053_v57 }
 0x169   : > { %v2976_v2 = vpop.f32.mrb[56].mxu1  ;;  %v3040_v13 = vpop.f32.mrb[56].mxu0 }
 0x16a   : > { %v2977_v14 = vpop.f32.mrb[57].mxu1  ;;  %v3041_v19 = vpop.f32.mrb[57].mxu0 }
 0x16b   : > { %v2978_v59 = vadd.f32 %v2977_v14, %v2976_v2  ;;  %v3042_v28 = vadd.f32 %v3041_v19, %v3040_v13  ;;  %v2979_v46 = vpop.f32.mrb[58].mxu1  ;;  %v3043_v29 = vpop.f32.mrb[58].mxu0 }
 0x16c   : > { %v2980_v62 = vpop.f32.mrb[59].mxu1  ;;  %v3044_v22 = vpop.f32.mrb[59].mxu0 }
 0x16d   : > { %v4150_v12 = vadd.f32 %v2978_v59, %v4107_v53  ;;  %v4153_v32 = vadd.f32 %v3042_v28, %v4062_v15  ;;  %v2981_v33 = vadd.f32 %v2980_v62, %v2979_v46  ;;  %v3045_v40 = vadd.f32 %v3044_v22, %v3043_v29 }
 0x16f   : > { %v4156_v57 = vadd.f32 %v2981_v33, %v4112_v24  ;;  %v4159_v44 = vadd.f32 %v3045_v40, %v4068_v34 }
 0x171   : > { %v2982_v45 = vpop.f32.mrb[60].mxu1  ;;  %v3046_v21 = vpop.f32.mrb[60].mxu0 }
 0x172   : > { %v2983_v17 = vpop.f32.mrb[61].mxu1  ;;  %v3047_v51 = vpop.f32.mrb[61].mxu0 }
 0x173   : > { %v2984_v7 = vadd.f32 %v2983_v17, %v2982_v45  ;;  %v3048_v56 = vadd.f32 %v3047_v51, %v3046_v21  ;;  %v2985_v60 = vpop.f32.mrb[62].mxu1  ;;  %v3049_v53 = vpop.f32.mrb[62].mxu0 }
 0x174   : > { %v2986_v1 = vpop.f32.mrb[63].mxu1  ;;  %v3050_v30 = vpop.f32.mrb[63].mxu0 }
 0x175   : > { %v4162_v15 = vadd.f32 %v2984_v7, %v4117_v11  ;;  %v4165_v3 = vadd.f32 %v3048_v56, %v4077_v63  ;;  %v2987_v24 = vadd.f32 %v2986_v1, %v2985_v60  ;;  %v3051_v31 = vadd.f32 %v3050_v30, %v3049_v53 }
 0x177   : > { %v4168_v34 = vadd.f32 %v2987_v24, %v4122_v8  ;;  %v4171_v23 = vadd.f32 %v3051_v31, %v4085_v4 }
 0x179   : > { %v2988_v6 = vpop.f32.mrb[64].mxu1  ;;  %v3052_v42 = vpop.f32.mrb[64].mxu0 }
 0x17a   : > { %v2989_v10 = vpop.f32.mrb[65].mxu1  ;;  %v3053_v55 = vpop.f32.mrb[65].mxu0 }
 0x17b   : > { %v2990_v2 = vadd.f32 %v2989_v10, %v2988_v6  ;;  %v3054_v13 = vadd.f32 %v3053_v55, %v3052_v42  ;;  %v2991_v14 = vpop.f32.mrb[66].mxu1  ;;  %v3055_v11 = vpop.f32.mrb[66].mxu0 }
 0x17c   : > { %v2992_v19 = vpop.f32.mrb[67].mxu1  ;;  %v3056_v59 = vpop.f32.mrb[67].mxu0 }
 0x17d   : > { %v4174_v63 = vadd.f32 %v2990_v2, %v3980_v37  ;;  %v4177_v28 = vadd.f32 %v3054_v13, %v4094_v16  ;;  %v2993_v8 = vadd.f32 %v2992_v19, %v2991_v14  ;;  %v3057_v46 = vadd.f32 %v3056_v59, %v3055_v11 }
 0x17f   : > { %v4180_v4 = vadd.f32 %v2993_v8, %v3984_v39  ;;  %v4183_v29 = vadd.f32 %v3057_v46, %v4097_v47 }
 0x181   : > { %v2994_v62 = vpop.f32.mrb[68].mxu1  ;;  %v3058_v22 = vpop.f32.mrb[68].mxu0 }
 0x182   : > { %v2995_v33 = vpop.f32.mrb[69].mxu1  ;;  %v3059_v40 = vpop.f32.mrb[69].mxu0 }
 0x183   : > { %v2996_v45 = vadd.f32 %v2995_v33, %v2994_v62  ;;  %v3060_v21 = vadd.f32 %v3059_v40, %v3058_v22  ;;  %v2997_v17 = vpop.f32.mrb[70].mxu1  ;;  %v3061_v37 = vpop.f32.mrb[70].mxu0 }
 0x184   : > { %v2998_v51 = vpop.f32.mrb[71].mxu1  ;;  %v3062_v7 = vpop.f32.mrb[71].mxu0 }
 0x185   : > { %v4186_v16 = vadd.f32 %v2996_v45, %v3992_v48  ;;  %v4189_v56 = vadd.f32 %v3060_v21, %v4102_v43  ;;  %v2999_v39 = vadd.f32 %v2998_v51, %v2997_v17  ;;  %v3063_v60 = vadd.f32 %v3062_v7, %v3061_v37 }
 0x187   : > { %v4192_v47 = vadd.f32 %v2999_v39, %v3996_v5  ;;  %v4195_v53 = vadd.f32 %v3063_v60, %v4105_v52 }
 0x189   : > { %v3000_v1 = vpop.f32.mrb[72].mxu1  ;;  %v3064_v30 = vpop.f32.mrb[72].mxu0 }
 0x18a   : > { %v3001_v24 = vpop.f32.mrb[73].mxu1  ;;  %v3065_v31 = vpop.f32.mrb[73].mxu0 }
 0x18b   : > { %v3002_v6 = vadd.f32 %v3001_v24, %v3000_v1  ;;  %v3066_v42 = vadd.f32 %v3065_v31, %v3064_v30  ;;  %v3003_v10 = vpop.f32.mrb[74].mxu1  ;;  %v3067_v48 = vpop.f32.mrb[74].mxu0 }
 0x18c   : > { %v3004_v55 = vpop.f32.mrb[75].mxu1  ;;  %v3068_v2 = vpop.f32.mrb[75].mxu0 }
 0x18d   : > { %v4198_v43 = vadd.f32 %v3002_v6, %v4004_v54  ;;  %v4201_v13 = vadd.f32 %v3066_v42, %v4110_v20  ;;  %v3005_v5 = vadd.f32 %v3004_v55, %v3003_v10  ;;  %v3069_v14 = vadd.f32 %v3068_v2, %v3067_v48 }
 0x18f   : > { %v4204_v52 = vadd.f32 %v3005_v5, %v4008_v25  ;;  %v4207_v11 = vadd.f32 %v3069_v14, %v4115_v35 }
 0x191   : > { %v3006_v19 = vpop.f32.mrb[76].mxu1  ;;  %v3070_v59 = vpop.f32.mrb[76].mxu0 }
 0x192   : > { %v3007_v8 = vpop.f32.mrb[77].mxu1  ;;  %v3071_v46 = vpop.f32.mrb[77].mxu0 }
 0x193   : > { %v3008_v62 = vadd.f32 %v3007_v8, %v3006_v19  ;;  %v3072_v22 = vadd.f32 %v3071_v46, %v3070_v59  ;;  %v3009_v33 = vpop.f32.mrb[78].mxu1  ;;  %v3073_v54 = vpop.f32.mrb[78].mxu0 }
 0x194   : > { %v3010_v40 = vpop.f32.mrb[79].mxu1  ;;  %v3074_v45 = vpop.f32.mrb[79].mxu0 }
 0x195   : > { %v4210_v20 = vadd.f32 %v3008_v62, %v4018_v18  ;;  %v4213_v21 = vadd.f32 %v3072_v22, %v4120_v27  ;;  %v3011_v25 = vadd.f32 %v3010_v40, %v3009_v33  ;;  %v3075_v17 = vadd.f32 %v3074_v45, %v3073_v54 }
 0x197   : > { %v4216_v35 = vadd.f32 %v3011_v25, %v4022_v9  ;;  %v4219_v37 = vadd.f32 %v3075_v17, %v4125_v49 }
 0x199   : > { %v3076_v51 = vpop.f32.mrb[80].mxu0  ;;  %v3140_v7 = vpop.f32.mrb[80].mxu1 }
 0x19a   : > { %v3077_v39 = vpop.f32.mrb[81].mxu0  ;;  %v3141_v60 = vpop.f32.mrb[81].mxu1 }
 0x19b   : > { %v3078_v1 = vadd.f32 %v3077_v39, %v3076_v51  ;;  %v3142_v30 = vadd.f32 %v3141_v60, %v3140_v7  ;;  %v3079_v24 = vpop.f32.mrb[82].mxu0  ;;  %v3143_v18 = vpop.f32.mrb[82].mxu1 }
 0x19c   : > { %v3080_v31 = vpop.f32.mrb[83].mxu0  ;;  %v3144_v6 = vpop.f32.mrb[83].mxu1 }
 0x19d   : > { %v4222_v27 = vadd.f32 %v3078_v1, %v4128_v26  ;;  %v3081_v42 = vadd.f32 %v3080_v31, %v3079_v24  ;;  %v3145_v10 = vadd.f32 %v3144_v6, %v3143_v18  ;;  %v4225_v9 = vadd.f32 %v3142_v30, %v4131_v50 }
 0x19f   : > { %v4228_v49 = vadd.f32 %v3081_v42, %v4133_v58  ;;  %v4231_v48 = vadd.f32 %v3145_v10, %v4136_v41 }
 0x1a1   : > { %v3082_v55 = vpop.f32.mrb[84].mxu0  ;;  %v3146_v2 = vpop.f32.mrb[84].mxu1 }
 0x1a2   : > { %v3083_v5 = vpop.f32.mrb[85].mxu0  ;;  %v3147_v14 = vpop.f32.mrb[85].mxu1 }
 0x1a3   : > { %v3084_v19 = vadd.f32 %v3083_v5, %v3082_v55  ;;  %v3148_v59 = vadd.f32 %v3147_v14, %v3146_v2  ;;  %v3085_v8 = vpop.f32.mrb[86].mxu0  ;;  %v3149_v26 = vpop.f32.mrb[86].mxu1 }
 0x1a4   : > { %v3086_v46 = vpop.f32.mrb[87].mxu0  ;;  %v3150_v62 = vpop.f32.mrb[87].mxu1 }
 0x1a5   : > { %v4234_v22 = vadd.f32 %v3084_v19, %v4139_v38  ;;  %v3087_v50 = vadd.f32 %v3086_v46, %v3085_v8  ;;  %v3151_v33 = vadd.f32 %v3150_v62, %v3149_v26  ;;  %v4237_v58 = vadd.f32 %v3148_v59, %v4142_v36 }
 0x1a7   : > { %v4240_v41 = vadd.f32 %v3087_v50, %v4144_v61  ;;  %v4243_v54 = vadd.f32 %v3151_v33, %v4147_v0 }
 0x1a9   : > { %v3088_v40 = vpop.f32.mrb[88].mxu0  ;;  %v3152_v45 = vpop.f32.mrb[88].mxu1 }
 0x1aa   : > { %v3089_v25 = vpop.f32.mrb[89].mxu0  ;;  %v3153_v17 = vpop.f32.mrb[89].mxu1 }
 0x1ab   : > { %v3090_v51 = vadd.f32 %v3089_v25, %v3088_v40  ;;  %v3154_v7 = vadd.f32 %v3153_v17, %v3152_v45  ;;  %v3091_v39 = vpop.f32.mrb[90].mxu0  ;;  %v3155_v38 = vpop.f32.mrb[90].mxu1 }
 0x1ac   : > { %v3092_v60 = vpop.f32.mrb[91].mxu0  ;;  %v3156_v1 = vpop.f32.mrb[91].mxu1 }
 0x1ad   : > { %v4246_v30 = vadd.f32 %v3090_v51, %v4150_v12  ;;  %v3093_v36 = vadd.f32 %v3092_v60, %v3091_v39  ;;  %v3157_v24 = vadd.f32 %v3156_v1, %v3155_v38  ;;  %v4249_v61 = vadd.f32 %v3154_v7, %v4153_v32 }
 0x1af   : > { %v4252_v0 = vadd.f32 %v3093_v36, %v4156_v57  ;;  %v4255_v18 = vadd.f32 %v3157_v24, %v4159_v44 }
 0x1b1   : > { %v3094_v31 = vpop.f32.mrb[92].mxu0  ;;  %v3158_v6 = vpop.f32.mrb[92].mxu1 }
 0x1b2   : > { %v3095_v42 = vpop.f32.mrb[93].mxu0  ;;  %v3159_v10 = vpop.f32.mrb[93].mxu1 }
 0x1b3   : > { %v3096_v55 = vadd.f32 %v3095_v42, %v3094_v31  ;;  %v3160_v2 = vadd.f32 %v3159_v10, %v3158_v6  ;;  %v3097_v5 = vpop.f32.mrb[94].mxu0  ;;  %v3161_v12 = vpop.f32.mrb[94].mxu1 }
 0x1b4   : > { %v3098_v14 = vpop.f32.mrb[95].mxu0  ;;  %v3162_v19 = vpop.f32.mrb[95].mxu1 }
 0x1b5   : > { %v4258_v59 = vadd.f32 %v3096_v55, %v4162_v15  ;;  %v3099_v32 = vadd.f32 %v3098_v14, %v3097_v5  ;;  %v3163_v8 = vadd.f32 %v3162_v19, %v3161_v12  ;;  %v4261_v57 = vadd.f32 %v3160_v2, %v4165_v3 }
 0x1b7   : > { %v4264_v44 = vadd.f32 %v3099_v32, %v4168_v34  ;;  %v4267_v26 = vadd.f32 %v3163_v8, %v4171_v23 }
 0x1b9   : > { %v3100_v46 = vpop.f32.mrb[96].mxu0  ;;  %v3164_v62 = vpop.f32.mrb[96].mxu1 }
 0x1ba   : > { %v3101_v50 = vpop.f32.mrb[97].mxu0  ;;  %v3165_v33 = vpop.f32.mrb[97].mxu1 }
 0x1bb   : > { %v3102_v40 = vadd.f32 %v3101_v50, %v3100_v46  ;;  %v3166_v45 = vadd.f32 %v3165_v33, %v3164_v62  ;;  %v3103_v25 = vpop.f32.mrb[98].mxu0  ;;  %v3167_v15 = vpop.f32.mrb[98].mxu1 }
 0x1bc   : > { %v3104_v17 = vpop.f32.mrb[99].mxu0  ;;  %v3168_v51 = vpop.f32.mrb[99].mxu1 }
 0x1bd   : > { %v4270_v7 = vadd.f32 %v3102_v40, %v4174_v63  ;;  %v3105_v3 = vadd.f32 %v3104_v17, %v3103_v25  ;;  %v3169_v39 = vadd.f32 %v3168_v51, %v3167_v15  ;;  %v4273_v34 = vadd.f32 %v3166_v45, %v4177_v28 }
 0x1bf   : > { %v4276_v23 = vadd.f32 %v3105_v3, %v4180_v4  ;;  %v4279_v38 = vadd.f32 %v3169_v39, %v4183_v29 }
 0x1c1   : > { %v3106_v60 = vpop.f32.mrb[100].mxu0  ;;  %v3170_v1 = vpop.f32.mrb[100].mxu1 }
 0x1c2   : > { %v3107_v36 = vpop.f32.mrb[101].mxu0  ;;  %v3171_v24 = vpop.f32.mrb[101].mxu1 }
 0x1c3   : > { %v3108_v31 = vadd.f32 %v3107_v36, %v3106_v60  ;;  %v3172_v6 = vadd.f32 %v3171_v24, %v3170_v1  ;;  %v3109_v42 = vpop.f32.mrb[102].mxu0  ;;  %v3173_v63 = vpop.f32.mrb[102].mxu1 }
 0x1c4   : > { %v3110_v10 = vpop.f32.mrb[103].mxu0  ;;  %v3174_v55 = vpop.f32.mrb[103].mxu1 }
 0x1c5   : > { %v4282_v2 = vadd.f32 %v3108_v31, %v4186_v16  ;;  %v3111_v28 = vadd.f32 %v3110_v10, %v3109_v42  ;;  %v3175_v5 = vadd.f32 %v3174_v55, %v3173_v63  ;;  %v4285_v4 = vadd.f32 %v3172_v6, %v4189_v56 }
 0x1c7   : > { %v4288_v29 = vadd.f32 %v3111_v28, %v4192_v47  ;;  %v4291_v12 = vadd.f32 %v3175_v5, %v4195_v53 }
 0x1c9   : > { %v3112_v14 = vpop.f32.mrb[104].mxu0  ;;  %v3176_v19 = vpop.f32.mrb[104].mxu1 }
 0x1ca   : > { %v3113_v32 = vpop.f32.mrb[105].mxu0  ;;  %v3177_v8 = vpop.f32.mrb[105].mxu1 }
 0x1cb   : > { %v3114_v46 = vadd.f32 %v3113_v32, %v3112_v14  ;;  %v3178_v62 = vadd.f32 %v3177_v8, %v3176_v19  ;;  %v3115_v50 = vpop.f32.mrb[106].mxu0  ;;  %v3179_v16 = vpop.f32.mrb[106].mxu1 }
 0x1cc   : > { %v3116_v33 = vpop.f32.mrb[107].mxu0  ;;  %v3180_v40 = vpop.f32.mrb[107].mxu1 }
 0x1cd   : > { %v4294_v45 = vadd.f32 %v3114_v46, %v4198_v43  ;;  %v3117_v56 = vadd.f32 %v3116_v33, %v3115_v50  ;;  %v3181_v25 = vadd.f32 %v3180_v40, %v3179_v16  ;;  %v4297_v47 = vadd.f32 %v3178_v62, %v4201_v13 }
 0x1cf   : > { %v4300_v53 = vadd.f32 %v3117_v56, %v4204_v52  ;;  %v4303_v15 = vadd.f32 %v3181_v25, %v4207_v11 }
 0x1d1   : > { %v3118_v17 = vpop.f32.mrb[108].mxu0  ;;  %v3182_v51 = vpop.f32.mrb[108].mxu1 }
 0x1d2   : > { %v3119_v3 = vpop.f32.mrb[109].mxu0  ;;  %v3183_v39 = vpop.f32.mrb[109].mxu1 }
 0x1d3   : > { %v3120_v60 = vadd.f32 %v3119_v3, %v3118_v17  ;;  %v3184_v1 = vadd.f32 %v3183_v39, %v3182_v51  ;;  %v3121_v43 = vpop.f32.mrb[110].mxu0  ;;  %v3185_v36 = vpop.f32.mrb[110].mxu1 }
 0x1d4   : > { %v3122_v24 = vpop.f32.mrb[111].mxu0  ;;  %v3186_v31 = vpop.f32.mrb[111].mxu1 }
 0x1d5   : > { %v4306_v13 = vadd.f32 %v3120_v60, %v4210_v20  ;;  %v3123_v6 = vadd.f32 %v3122_v24, %v3121_v43  ;;  %v3187_v52 = vadd.f32 %v3186_v31, %v3185_v36  ;;  %v4309_v42 = vadd.f32 %v3184_v1, %v4213_v21 }
 0x1d7   : > { %v4313_v11 = vadd.f32 %v3123_v6, %v4216_v35  ;;  %v4316_v63 = vadd.f32 %v3187_v52, %v4219_v37 }
 0x1d9   : > { %v3188_v10 = vpop.f32.mrb[112].mxu1  ;;  %v3278_v20 = vpop.f32.mrb[112].mxu0 }
 0x1da   : > { %v2168_v21 = vadd.f32 %v3278_v20, %v4237_v58  ;;  %v3189_v55 = vpop.f32.mrb[113].mxu1  ;;  %v2159_v28 = vpop.f32.mrb[113].mxu0 }
 0x1db   : > { %v3190_v35 = vadd.f32 %v3189_v55, %v3188_v10  ;;  %v2160_v5 = vadd.f32 %v2159_v28, %v4225_v9  ;;  %v3191_v37 = vpop.f32.mrb[114].mxu1  ;;  %v3279_v14 = vpop.f32.mrb[114].mxu0 }
 0x1dc   : > { %2288 = vst [vmem:[%s4321_s19 + $0x10] sm:$0xff] %v2168_v21  ;;  %v2171_v19 = vadd.f32 %v3279_v14, %v4243_v54  ;;  %v3192_v32 = vpop.f32.mrb[115].mxu1  ;;  %v2162_v8 = vpop.f32.mrb[115].mxu0  ;;  %v2358_v40 = vmul.f32 %v2168_v21, %v2168_v21 }
 0x1dd   : > { %2286 = vst [vmem:[%s4321_s19] sm:$0xff] %v2160_v5  ;;  %v3193_v46 = vadd.f32 %v3192_v32, %v3191_v37  ;;  %v2163_v62 = vadd.f32 %v2162_v8, %v4231_v48  ;;  %v4330_v50 = vadd.f32 %v3190_v35, %v4222_v27  ;;  %v2356_v58 = vmul.f32 %v2160_v5, %v2160_v5 }
 0x1de   : > { %2289 = vst [vmem:[%s4321_s19 + $0x18] sm:$0xff] %v2171_v19  ;;  %v2359_v51 = vmul.f32 %v2171_v19, %v2171_v19 }
 0x1df   : > { %2287 = vst [vmem:[%s4321_s19 + $0x8] sm:$0xff] %v2163_v62  ;;  %v2318_v16 = vadd.f32 %v2163_v62, %v2160_v5  ;;  %v2357_v33 = vmul.f32 %v2163_v62, %v2163_v62  ;;  %v4335_v9 = vadd.f32 %v3193_v46, %v4228_v49 }
 0x1e1   : > { %v2319_v54 = vadd.f32 %v2318_v16, %v2168_v21  ;;  %v2388_v56 = vadd.f32 %v2357_v33, %v2356_v58  ;;  %v3194_v25 = vpop.f32.mrb[116].mxu1  ;;  %v3282_v17 = vpop.f32.mrb[116].mxu0 }
 0x1e2   : > { %v2184_v48 = vadd.f32 %v3282_v17, %v4261_v57  ;;  %v3195_v27 = vpop.f32.mrb[117].mxu1  ;;  %v2175_v3 = vpop.f32.mrb[117].mxu0 }
 0x1e3   : > { %v2389_v39 = vadd.f32 %v2388_v56, %v2358_v40  ;;  %v3196_v60 = vadd.f32 %v3195_v27, %v3194_v25  ;;  %v2176_v1 = vadd.f32 %v2175_v3, %v4249_v61  ;;  %v2320_v43 = vadd.f32 %v2319_v54, %v2171_v19  ;;  %v3197_v49 = vpop.f32.mrb[118].mxu1  ;;  %v3283_v36 = vpop.f32.mrb[118].mxu0 }
 0x1e4   : > { %2292 = vst [vmem:[%s4321_s19 + $0x30] sm:$0xff] %v2184_v48  ;;  %v2187_v24 = vadd.f32 %v3283_v36, %v4267_v26  ;;  %v3198_v31 = vpop.f32.mrb[119].mxu1  ;;  %v2178_v6 = vpop.f32.mrb[119].mxu0  ;;  %v2362_v14 = vmul.f32 %v2184_v48, %v2184_v48 }
 0x1e5   : > { %2290 = vst [vmem:[%s4321_s19 + $0x20] sm:$0xff] %v2176_v1  ;;  %v2321_v52 = vadd.f32 %v2320_v43, %v2176_v1  ;;  %v2360_v10 = vmul.f32 %v2176_v1, %v2176_v1  ;;  %v2390_v57 = vadd.f32 %v2389_v39, %v2359_v51  ;;  %v3199_v20 = vadd.f32 %v3198_v31, %v3197_v49 }
 0x1e6   : > { %2293 = vst [vmem:[%s4321_s19 + $0x38] sm:$0xff] %v2187_v24  ;;  %v2179_v21 = vadd.f32 %v2178_v6, %v4255_v18  ;;  %v4345_v55 = vadd.f32 %v3196_v60, %v4234_v22  ;;  %v2363_v16 = vmul.f32 %v2187_v24, %v2187_v24 }
 0x1e7   : > { %v2391_v61 = vadd.f32 %v2390_v57, %v2360_v10  ;;  %v4348_v28 = vadd.f32 %v3199_v20, %v4240_v41 }
 0x1e8   : > { %2291 = vst [vmem:[%s4321_s19 + $0x28] sm:$0xff] %v2179_v21  ;;  %v2322_v35 = vadd.f32 %v2321_v52, %v2179_v21  ;;  %v2361_v26 = vmul.f32 %v2179_v21, %v2179_v21 }
 0x1e9   : > { %v3200_v5 = vpop.f32.mrb[120].mxu1  ;;  %v3286_v37 = vpop.f32.mrb[120].mxu0 }
 0x1ea   : > { %v2323_v19 = vadd.f32 %v2322_v35, %v2184_v48  ;;  %v2392_v32 = vadd.f32 %v2391_v61, %v2361_v26  ;;  %v2200_v8 = vadd.f32 %v3286_v37, %v4285_v4  ;;  %v3201_v18 = vpop.f32.mrb[121].mxu1  ;;  %v2191_v46 = vpop.f32.mrb[121].mxu0 }
 0x1eb   : > { %v3202_v22 = vadd.f32 %v3201_v18, %v3200_v5  ;;  %v2192_v62 = vadd.f32 %v2191_v46, %v4273_v34  ;;  %v3203_v58 = vpop.f32.mrb[122].mxu1  ;;  %v3287_v41 = vpop.f32.mrb[122].mxu0 }
 0x1ec   : > { %v2393_v33 = vadd.f32 %v2392_v32, %v2362_v14  ;;  %2296 = vst [vmem:[%s4321_s19 + $0x50] sm:$0xff] %v2200_v8  ;;  %v2324_v40 = vadd.f32 %v2323_v19, %v2187_v24  ;;  %v2203_v54 = vadd.f32 %v3287_v41, %v4291_v12  ;;  %v3204_v56 = vpop.f32.mrb[123].mxu1  ;;  %v2194_v25 = vpop.f32.mrb[123].mxu0  ;;  %v2366_v49 = vmul.f32 %v2200_v8, %v2200_v8 }
 0x1ed   : > { %2294 = vst [vmem:[%s4321_s19 + $0x40] sm:$0xff] %v2192_v62  ;;  %v2364_v17 = vmul.f32 %v2192_v62, %v2192_v62  ;;  %v3205_v4 = vadd.f32 %v3204_v56, %v3203_v58  ;;  %v2195_v51 = vadd.f32 %v2194_v25, %v4279_v38  ;;  %v4358_v48 = vadd.f32 %v3202_v22, %v4246_v30 }
 0x1ee   : > { %v2325_v34 = vadd.f32 %v2324_v40, %v2192_v62  ;;  %v2394_v27 = vadd.f32 %v2393_v33, %v2363_v16  ;;  %2297 = vst [vmem:[%s4321_s19 + $0x58] sm:$0xff] %v2203_v54  ;;  %v2367_v57 = vmul.f32 %v2203_v54, %v2203_v54 }
 0x1ef   : > { %2295 = vst [vmem:[%s4321_s19 + $0x48] sm:$0xff] %v2195_v51  ;;  %v2365_v3 = vmul.f32 %v2195_v51, %v2195_v51  ;;  %v4363_v39 = vadd.f32 %v3205_v4, %v4252_v0 }
 0x1f0   : > { %v2395_v60 = vadd.f32 %v2394_v27, %v2364_v17  ;;  %v2326_v12 = vadd.f32 %v2325_v34, %v2195_v51 }
 0x1f1   : > { %v3206_v1 = vpop.f32.mrb[124].mxu1  ;;  %v3290_v43 = vpop.f32.mrb[124].mxu0 }
 0x1f2   : > { %v2327_v36 = vadd.f32 %v2326_v12, %v2200_v8  ;;  %v2396_v38 = vadd.f32 %v2395_v60, %v2365_v3  ;;  %v2216_v30 = vadd.f32 %v3290_v43, %v4309_v42  ;;  %v3207_v24 = vpop.f32.mrb[125].mxu1  ;;  %v2207_v31 = vpop.f32.mrb[125].mxu0 }
 0x1f3   : > { %v3208_v6 = vadd.f32 %v3207_v24, %v3206_v1  ;;  %v2208_v52 = vadd.f32 %v2207_v31, %v4297_v47  ;;  %v3209_v10 = vpop.f32.mrb[126].mxu1  ;;  %v3291_v0 = vpop.f32.mrb[126].mxu0 }
 0x1f4   : > { %v2397_v20 = vadd.f32 %v2396_v38, %v2366_v49  ;;  %2300 = vst [vmem:[%s4321_s19 + $0x70] sm:$0xff] %v2216_v30  ;;  %v2328_v21 = vadd.f32 %v2327_v36, %v2203_v54  ;;  %v2219_v61 = vadd.f32 %v3291_v0, %v4316_v63  ;;  %v3210_v35 = vpop.f32.mrb[127].mxu1  ;;  %v2210_v26 = vpop.f32.mrb[127].mxu0  ;;  %v2370_v62 = vmul.f32 %v2216_v30, %v2216_v30 }
 0x1f5   : > { %2298 = vst [vmem:[%s4321_s19 + $0x60] sm:$0xff] %v2208_v52  ;;  %v2368_v5 = vmul.f32 %v2208_v52, %v2208_v52  ;;  %v3211_v42 = vadd.f32 %v3210_v35, %v3209_v10  ;;  %v2211_v37 = vadd.f32 %v2210_v26, %v4303_v15  ;;  %v2087_v14 = vadd.f32 %v3208_v6, %v4258_v59 }
 0x1f6   : > { %v2329_v47 = vadd.f32 %v2328_v21, %v2208_v52  ;;  %v2398_v19 = vadd.f32 %v2397_v20, %v2367_v57  ;;  %2301 = vst [vmem:[%s4321_s19 + $0x78] sm:$0xff] %v2219_v61 }
 0x1f7   : > { %2299 = vst [vmem:[%s4321_s19 + $0x68] sm:$0xff] %v2211_v37  ;;  %v2369_v32 = vmul.f32 %v2211_v37, %v2211_v37  ;;  %v2090_v8 = vadd.f32 %v3211_v42, %v4264_v44  ;;  %v2371_v44 = vmul.f32 %v2219_v61, %v2219_v61 }
 0x1f8   : > { %v2399_v18 = vadd.f32 %v2398_v19, %v2368_v5  ;;  %v2330_v46 = vadd.f32 %v2329_v47, %v2211_v37 }
 0x1f9   : > { %v3212_v63 = vpop.f32.mrb[128].mxu1  ;;  %v3294_v22 = vpop.f32.mrb[128].mxu0 }
 0x1fa   : > { %v2331_v58 = vadd.f32 %v2330_v46, %v2216_v30  ;;  %v2400_v41 = vadd.f32 %v2399_v18, %v2369_v32  ;;  %v2232_v15 = vadd.f32 %v3294_v22, %v4345_v55  ;;  %v3213_v16 = vpop.f32.mrb[129].mxu1  ;;  %v2223_v59 = vpop.f32.mrb[129].mxu0 }
 0x1fb   : > { %v3214_v33 = vadd.f32 %v3213_v16, %v3212_v63  ;;  %v2224_v40 = vadd.f32 %v2223_v59, %v4330_v50  ;;  %v3215_v54 = vpop.f32.mrb[130].mxu1  ;;  %v3295_v56 = vpop.f32.mrb[130].mxu0 }
 0x1fc   : > { %v2401_v25 = vadd.f32 %v2400_v41, %v2370_v62  ;;  %2304 = vst [vmem:[%s4321_s19 + $0x90] sm:$0xff] %v2232_v15  ;;  %v2332_v17 = vadd.f32 %v2331_v58, %v2219_v61  ;;  %v2235_v4 = vadd.f32 %v3295_v56, %v4348_v28  ;;  %v3216_v51 = vpop.f32.mrb[131].mxu1  ;;  %v2226_v34 = vpop.f32.mrb[131].mxu0  ;;  %v2374_v30 = vmul.f32 %v2232_v15, %v2232_v15 }
 0x1fd   : > { %2302 = vst [vmem:[%s4321_s19 + $0x80] sm:$0xff] %v2224_v40  ;;  %v2372_v27 = vmul.f32 %v2224_v40, %v2224_v40  ;;  %v3217_v55 = vadd.f32 %v3216_v51, %v3215_v54  ;;  %v2227_v3 = vadd.f32 %v2226_v34, %v4335_v9  ;;  %v2095_v60 = vadd.f32 %v3214_v33, %v4270_v7 }
 0x1fe   : > { %v2333_v50 = vadd.f32 %v2332_v17, %v2224_v40  ;;  %v2402_v12 = vadd.f32 %v2401_v25, %v2371_v44  ;;  %2305 = vst [vmem:[%s4321_s19 + $0x98] sm:$0xff] %v2235_v4 }
 0x1ff   : > { %2303 = vst [vmem:[%s4321_s19 + $0x88] sm:$0xff] %v2227_v3  ;;  %v2373_v1 = vmul.f32 %v2227_v3, %v2227_v3  ;;  %v2098_v43 = vadd.f32 %v3217_v55, %v4276_v23  ;;  %v2375_v23 = vmul.f32 %v2235_v4, %v2235_v4 }
 0x200   : > { %v2403_v49 = vadd.f32 %v2402_v12, %v2372_v27  ;;  %v2334_v36 = vadd.f32 %v2333_v50, %v2227_v3 }
 0x201   : > { %v3218_v28 = vpop.f32.mrb[132].mxu1  ;;  %v3298_v38 = vpop.f32.mrb[132].mxu0 }
 0x202   : > { %v2335_v24 = vadd.f32 %v2334_v36, %v2232_v15  ;;  %v2404_v31 = vadd.f32 %v2403_v49, %v2373_v1  ;;  %v2248_v6 = vadd.f32 %v3298_v38, %v2087_v14  ;;  %v3219_v9 = vpop.f32.mrb[133].mxu1  ;;  %v2239_v52 = vpop.f32.mrb[133].mxu0 }
 0x203   : > { %v3220_v7 = vadd.f32 %v3219_v9, %v3218_v28  ;;  %v2240_v10 = vadd.f32 %v2239_v52, %v4358_v48  ;;  %v3221_v0 = vpop.f32.mrb[134].mxu1  ;;  %v3299_v57 = vpop.f32.mrb[134].mxu0 }
 0x204   : > { %v2405_v20 = vadd.f32 %v2404_v31, %v2374_v30  ;;  %2308 = vst [vmem:[%s4321_s19 + $0xb0] sm:$0xff] %v2248_v6  ;;  %v2336_v21 = vadd.f32 %v2335_v24, %v2235_v4  ;;  %v2251_v61 = vadd.f32 %v3299_v57, %v2090_v8  ;;  %v3222_v35 = vpop.f32.mrb[135].mxu1  ;;  %v2242_v26 = vpop.f32.mrb[135].mxu0  ;;  %v2378_v22 = vmul.f32 %v2248_v6, %v2248_v6 }
 0x205   : > { %2306 = vst [vmem:[%s4321_s19 + $0xa0] sm:$0xff] %v2240_v10  ;;  %v2376_v5 = vmul.f32 %v2240_v10, %v2240_v10  ;;  %v3223_v42 = vadd.f32 %v3222_v35, %v3221_v0  ;;  %v2243_v37 = vadd.f32 %v2242_v26, %v4363_v39  ;;  %v2103_v14 = vadd.f32 %v3220_v7, %v4282_v2 }
 0x206   : > { %v2337_v47 = vadd.f32 %v2336_v21, %v2240_v10  ;;  %v2406_v48 = vadd.f32 %v2405_v20, %v2375_v23  ;;  %2309 = vst [vmem:[%s4321_s19 + $0xb8] sm:$0xff] %v2251_v61  ;;  %v2379_v40 = vmul.f32 %v2251_v61, %v2251_v61 }
 0x207   : > { %2307 = vst [vmem:[%s4321_s19 + $0xa8] sm:$0xff] %v2243_v37  ;;  %v2377_v19 = vmul.f32 %v2243_v37, %v2243_v37  ;;  %v2106_v32 = vadd.f32 %v3223_v42, %v4288_v29 }
 0x208   : > { %v2407_v18 = vadd.f32 %v2406_v48, %v2376_v5  ;;  %v2338_v46 = vadd.f32 %v2337_v47, %v2243_v37 }
 0x209   : > { %v3224_v8 = vpop.f32.mrb[136].mxu1  ;;  %v3302_v63 = vpop.f32.mrb[136].mxu0 }
 0x20a   : > { %v2339_v62 = vadd.f32 %v2338_v46, %v2248_v6  ;;  %v2408_v58 = vadd.f32 %v2407_v18, %v2377_v19  ;;  %v2264_v41 = vadd.f32 %v3302_v63, %v2103_v14  ;;  %v3225_v39 = vpop.f32.mrb[137].mxu1  ;;  %v2255_v15 = vpop.f32.mrb[137].mxu0 }
 0x20b   : > { %v3226_v2 = vadd.f32 %v3225_v39, %v3224_v8  ;;  %v2256_v16 = vadd.f32 %v2255_v15, %v2095_v60  ;;  %v3227_v59 = vpop.f32.mrb[138].mxu1  ;;  %v3303_v33 = vpop.f32.mrb[138].mxu0 }
 0x20c   : > { %v2409_v29 = vadd.f32 %v2408_v58, %v2378_v22  ;;  %2312 = vst [vmem:[%s4321_s19 + $0xd0] sm:$0xff] %v2264_v41  ;;  %v2340_v54 = vadd.f32 %v2339_v62, %v2251_v61  ;;  %v2267_v56 = vadd.f32 %v3303_v33, %v2106_v32  ;;  %v3228_v44 = vpop.f32.mrb[139].mxu1  ;;  %v2258_v25 = vpop.f32.mrb[139].mxu0  ;;  %v2382_v36 = vmul.f32 %v2264_v41, %v2264_v41 }
 0x20d   : > { %2310 = vst [vmem:[%s4321_s19 + $0xc0] sm:$0xff] %v2256_v16  ;;  %v2380_v17 = vmul.f32 %v2256_v16, %v2256_v16  ;;  %v3229_v4 = vadd.f32 %v3228_v44, %v3227_v59  ;;  %v2259_v51 = vadd.f32 %v2258_v25, %v2098_v43  ;;  %v2111_v34 = vadd.f32 %v3226_v2, %v4294_v45 }
 0x20e   : > { %v2341_v27 = vadd.f32 %v2340_v54, %v2256_v16  ;;  %v2410_v55 = vadd.f32 %v2409_v29, %v2379_v40  ;;  %2313 = vst [vmem:[%s4321_s19 + $0xd8] sm:$0xff] %v2267_v56  ;;  %v2383_v9 = vmul.f32 %v2267_v56, %v2267_v56 }
 0x20f   : > { %2311 = vst [vmem:[%s4321_s19 + $0xc8] sm:$0xff] %v2259_v51  ;;  %v2381_v3 = vmul.f32 %v2259_v51, %v2259_v51  ;;  %v2114_v60 = vadd.f32 %v3229_v4, %v4300_v53 }
 0x210   : > { %v2411_v50 = vadd.f32 %v2410_v55, %v2380_v17  ;;  %v2342_v12 = vadd.f32 %v2341_v27, %v2259_v51 }
 0x211   : > { %v3230_v1 = vpop.f32.mrb[140].mxu1  ;;  %v3306_v49 = vpop.f32.mrb[140].mxu0 }
 0x212   : > { %v2343_v28 = vadd.f32 %v2342_v12, %v2264_v41  ;;  %v2412_v38 = vadd.f32 %v2411_v50, %v2381_v3  ;;  %v3231_v30 = vpop.f32.mrb[141].mxu1  ;;  %v2271_v24 = vpop.f32.mrb[141].mxu0 }
 0x213   : > { %v3232_v43 = vadd.f32 %v3231_v30, %v3230_v1  ;;  %v2272_v31 = vadd.f32 %v2271_v24, %v2111_v34  ;;  %v3233_v45 = vpop.f32.mrb[142].mxu1  ;;  %v3307_v6 = vpop.f32.mrb[142].mxu0 }
 0x214   : > { %v2413_v52 = vadd.f32 %v2412_v38, %v2382_v36  ;;  %v2344_v7 = vadd.f32 %v2343_v28, %v2267_v56  ;;  %v3234_v53 = vpop.f32.mrb[143].mxu1  ;;  %v2274_v10 = vpop.f32.mrb[143].mxu0 }
 0x215   : > { %v2119_v0 = vadd.f32 %v3232_v43, %v4306_v13  ;;  %2314 = vst [vmem:[%s4321_s19 + $0xe0] sm:$0xff] %v2272_v31  ;;  %v2384_v57 = vmul.f32 %v2272_v31, %v2272_v31  ;;  %v3235_v23 = vadd.f32 %v3234_v53, %v3233_v45  ;;  %v2275_v20 = vadd.f32 %v2274_v10, %v2114_v60 }
 0x216   : > { %v2345_v21 = vadd.f32 %v2344_v7, %v2272_v31  ;;  %v2414_v61 = vadd.f32 %v2413_v52, %v2383_v9 }
 0x217   : > { %v2280_v35 = vadd.f32 %v3306_v49, %v2119_v0  ;;  %v2122_v26 = vadd.f32 %v3235_v23, %v4313_v11  ;;  %2315 = vst [vmem:[%s4321_s19 + $0xe8] sm:$0xff] %v2275_v20  ;;  %v2385_v5 = vmul.f32 %v2275_v20, %v2275_v20 }
 0x218   : > { %v2415_v42 = vadd.f32 %v2414_v61, %v2384_v57  ;;  %v2346_v37 = vadd.f32 %v2345_v21, %v2275_v20 }
 0x219   : > { %2316 = vst [vmem:[%s4321_s19 + $0xf0] sm:$0xff] %v2280_v35  ;;  %v2386_v14 = vmul.f32 %v2280_v35, %v2280_v35  ;;  %v2283_v47 = vadd.f32 %v3307_v6, %v2122_v26 }
 0x21a   : > { %v2347_v48 = vadd.f32 %v2346_v37, %v2280_v35  ;;  %v2416_v13 = vadd.f32 %v2415_v42, %v2385_v5 }
 0x21b   : > { %2317 = vst [vmem:[%s4321_s19 + $0xf8] sm:$0xff] %v2283_v47  ;;  %v2387_v19 = vmul.f32 %v2283_v47, %v2283_v47 }
 0x21c   : > { %v2348_v32 = vadd.f32 %v2347_v48, %v2283_v47  ;;  %v2417_v18 = vadd.f32 %v2416_v13, %v2386_v14 }
 0x21e   : > { %v2349_v46 = vrot.slane %v2348_v32, 4  ;;  %v2418_v8 = vadd.f32 %v2417_v18, %v2387_v19 }
 0x220   : > { %v2350_v63 = vadd.f32 %v2349_v46, %v2348_v32  ;;  %v2419_v22 = vrot.slane %v2418_v8, 4 }
 0x222   : > { %v2351_v62 = vrot.slane %v2350_v63, 2  ;;  %v2420_v11 = vadd.f32 %v2419_v22, %v2418_v8 }
 0x224   : > { %v2352_v58 = vadd.f32 %v2351_v62, %v2350_v63  ;;  %v2421_v41 = vrot.slane %v2420_v11, 2 }
 0x226   : > { %v2353_v39 = vrot.slane %v2352_v58, 1  ;;  %v2422_v15 = vadd.f32 %v2421_v41, %v2420_v11 }
 0x228   : > { %v2354_v2 = vadd.f32 %v2353_v39, %v2352_v58  ;;  %v2423_v16 = vrot.slane %v2422_v15, 1 }
 0x22a   : > { %2355 = vst [vmem:[%s181_s23] sm:$0x1] %v2354_v2  ;;  %v2424_v59 = vadd.f32 %v2423_v16, %v2422_v15 }
 0x22c   : > { %2425 = vst [vmem:[%s181_s23 + $0x1] sm:$0x1] %v2424_v59 }
 0x22d PF: > { %s14_s12 = sadd.s32 1, %s3411_s12  }
 0x22e   : > { %p11_p4 = scmp.ge.s32.totalorder %s14_s12, 4  }
 0x230   :  { %13 = sbr.rel (!%p11_p4) target bundleno = 1 (0x1), region = 72 }

// kernel: basic_block_forward.4
= control target key start
LH: loop header
LB: loop body
LE: loop exit
PB: predicated region body
PF: predicated region fallthrough
CT: control target
= control target key end

     0   :  { %s3525_s18 = smov 0   ;;  %s4560_s0 = inlined_call_operand.vmem [shape: f32[2,16,16,128], index: 0, kind: input, shape index: {}]   ;;  %s4561_s1 = inlined_call_operand.vmem [shape: f32[1,1,1,128], index: 1, kind: input, shape index: {}]   ;;  %s4562_s2 = inlined_call_operand.vmem [shape: f32[1,1,1,128], index: 2, kind: input, shape index: {}]   ;;  %s4563_s3 = inlined_call_operand.vmem [shape: bf16[1152,128], index: 3, kind: input, shape index: {}]   ;;  %s4564_s4 = inlined_call_operand.vmem [shape: f32[2,16,16,128], index: 4, kind: output, shape index: {0}]   ;;  %s4565_s5 = inlined_call_operand.vmem [shape: f32[2,2,128], index: 5, kind: output, shape index: {1}]  }
   0x1 LB: > { %s2779_s19 = sadd.s32 4294967295, %s3491_s18   ;;  %p2783_p0 = scmp.ge.s32.totalorder %s3491_s18, 1  ;;  %s3491_s18 = sphi %s3525_s18, %s16_s18  }
   0x2   : > { %p190_p1 = scmp.lt.s32.totalorder %s3491_s18, 3 }
   0x4   : > { %p191_p2 = pnand %p2783_p0, %p190_p1 }
   0x5   : > { %v3412_v0 = vld [vmem:[%s4563_s3 + $0x40] sm:$0xff] (!%p191_p2)   ;;  %v3493_v2 = vmov (!%p191_p2), 0.0   ;;  %v3414_v3 = vld [vmem:[%s4563_s3 + $0x48] sm:$0xff] (!%p191_p2)   ;;  %p222_p3 = scmp.lt.s32.totalorder (!%p191_p2), %s2779_s19, 1  ;;  %v3416_v5 = vld [vmem:[%s4563_s3 + $0x50] sm:$0xff] (!%p191_p2)   ;;  %v3494_v63 = vmov (!%p191_p2), 0.0|0.0  }
   0x6   : > { %194 = sbr.rel (%p191_p2) target bundleno = 557 (0x22d), region = 36  ;;  %v3413_v1 = vld [vmem:[%s4563_s3] sm:$0xff] (!%p191_p2)   ;;  %379 = vst [vmem:[#allocation2] sm:$0xff] (!%p191_p2), %v3493_v2  ;;  %380 = vst [vmem:[#allocation2 + $0x8] sm:$0xff] (!%p191_p2), %v3493_v2  ;;  %2867 = vmatprep.subr.bf16.mxu0 (!%p191_p2), %v3412_v0  ;;  %3387 = vmatprep.subr.bf16.mxu1 (!%p191_p2), %v3412_v0  ;;  %v3415_v4 = vld [vmem:[%s4563_s3 + $0x8] sm:$0xff] (!%p191_p2)  }
   0x7   : > { %381 = vst [vmem:[#allocation2 + $0x10] sm:$0x3] (!%p191_p2), %v3493_v2  ;;  %383 = vst [vmem:[#allocation2 + $0x198] sm:$0xff] (!%p191_p2), %v3493_v2  ;;  %2868 = vmatpush3.bf16.msra.mxu0 (!%p191_p2), %v3413_v1  ;;  %3395 = vmatpush3.bf16.msra.mxu1 (!%p191_p2), %v3413_v1  ;;  %v3417_v6 = vld [vmem:[%s4563_s3 + $0x10] sm:$0xff] (!%p191_p2)   ;;  %v3418_v7 = vld [vmem:[%s4563_s3 + $0x58] sm:$0xff] (!%p191_p2)  }
   0x8   : > { %384 = vst [vmem:[#allocation2 + $0x1a0] sm:$0xff] (!%p191_p2), %v3493_v2  ;;  %385 = vst [vmem:[#allocation2 + $0x1a8] sm:$0x3] (!%p191_p2), %v3493_v2  ;;  %2869 = vmatprep.subr.bf16.mxu0 (!%p191_p2), %v3414_v3  ;;  %3388 = vmatprep.subr.bf16.mxu1 (!%p191_p2), %v3414_v3  ;;  %v3419_v8 = vld [vmem:[%s4563_s3 + $0x18] sm:$0xff] (!%p191_p2)   ;;  %v3420_v9 = vld [vmem:[%s4563_s3 + $0x60] sm:$0xff] (!%p191_p2)  }
   0x9   : > { %387 = vst [vmem:[#allocation2 + $0x18] sm:$0x1] (!%p191_p2), %v3493_v2  ;;  %388 = vst [vmem:[#allocation2 + $0x30] sm:$0x1] (!%p191_p2), %v3493_v2  ;;  %v3421_v10 = vld [vmem:[%s4563_s3 + $0x20] sm:$0xff] (!%p191_p2)   ;;  %v3422_v11 = vld [vmem:[%s4563_s3 + $0x68] sm:$0xff] (!%p191_p2)  }
   0xa   : > { %389 = vst [vmem:[#allocation2 + $0x48] sm:$0x1] (!%p191_p2), %v3493_v2  ;;  %390 = vst [vmem:[#allocation2 + $0x60] sm:$0x1] (!%p191_p2), %v3493_v2  ;;  %v3585_v17 = vld [vmem:[%s4561_s1] ss:$0 sm:$0xff] (!%p191_p2) }
   0xb   : > { %391 = vst [vmem:[#allocation2 + $0x78] sm:$0x1] (!%p191_p2), %v3493_v2  ;;  %392 = vst [vmem:[#allocation2 + $0x90] sm:$0x1] (!%p191_p2), %v3493_v2  ;;  %2870 = vmatpush3.bf16.msra.mxu0 (!%p191_p2), %v3415_v4  ;;  %3396 = vmatpush3.bf16.msra.mxu1 (!%p191_p2), %v3415_v4  ;;  %v3590_v18 = vld [vmem:[%s4562_s2] ss:$0 sm:$0xff] (!%p191_p2) }
   0xc   : > { %393 = vst [vmem:[#allocation2 + $0xa8] sm:$0x1] (!%p191_p2), %v3493_v2  ;;  %394 = vst [vmem:[#allocation2 + $0xc0] sm:$0x1] (!%p191_p2), %v3493_v2  ;;  %2871 = vmatprep.subr.bf16.mxu0 (!%p191_p2), %v3416_v5  ;;  %3389 = vmatprep.subr.bf16.mxu1 (!%p191_p2), %v3416_v5  ;;  %v3423_v21 = vld [vmem:[%s4563_s3 + $0x28] sm:$0xff] (!%p191_p2)   ;;  %v3424_v22 = vld [vmem:[%s4563_s3 + $0x70] sm:$0xff] (!%p191_p2)  }
   0xd   : > { %395 = vst [vmem:[#allocation2 + $0xd8] sm:$0x1] %v3493_v2  ;;  %396 = vst [vmem:[#allocation2 + $0xf0] sm:$0x1] %v3493_v2  ;;  %s4567_s19 = smov (!%p222_p3, %s2779_s19), 1  ;;  %v515_v12 = vld [vmem:[#allocation2 + $0x1] sm:$0xff] }
   0xe   : > { %397 = vst [vmem:[#allocation2 + $0x108] sm:$0x1] %v3493_v2  ;;  %398 = vst [vmem:[#allocation2 + $0x120] sm:$0x1] %v3493_v2  ;;  %s2865_s9 = sshll.u32 %s4567_s19, 8  ;;  %v516_v13 = vld [vmem:[#allocation2 + $0x9] sm:$0xff] }
   0xf   : > { %399 = vst [vmem:[#allocation2 + $0x138] sm:$0x1] %v3493_v2  ;;  %400 = vst [vmem:[#allocation2 + $0x150] sm:$0x1] %v3493_v2  ;;  %2872 = vmatpush3.bf16.msra.mxu0 %v3417_v6  ;;  %3397 = vmatpush3.bf16.msra.mxu1 %v3417_v6  ;;  %s3572_s16 = scalar_lea.vmem %s4560_s0, %s2865_s9  ;;  %v547_v15 = vpack.c.bf16 %v516_v13, %v515_v12  ;;  %v3425_v27 = vld [vmem:[%s4563_s3 + $0x30] sm:$0xff]   ;;  %v3426_v28 = vld [vmem:[%s4563_s3 + $0x78] sm:$0xff]   ;;  %s4469_s24 = scalar_lea.vmem %s4564_s4, %s2865_s9 }
  0x10   : > { %401 = vst [vmem:[#allocation2 + $0x168] sm:$0x1] %v3493_v2  ;;  %402 = vst [vmem:[#allocation2 + $0x180] sm:$0x1] %v3493_v2  ;;  %2873 = vmatprep.subr.bf16.mxu0 %v3418_v7  ;;  %3390 = vmatprep.subr.bf16.mxu1 %v3418_v7  ;;  %v259_v14 = vld [vmem:[%s3572_s16 + $0xb0] sm:$0xff]  ;;  %v260_v16 = vld [vmem:[%s3572_s16 + $0xb8] sm:$0xff] }
  0x11   : > { %403 = vst [vmem:[#allocation2 + $0x29] sm:$0x1] %v3493_v2  ;;  %404 = vst [vmem:[#allocation2 + $0x41] sm:$0x1] %v3493_v2  ;;  %v298_v19 = vmul.f32 %v3585_v17, %v259_v14  ;;  %v299_v20 = vmul.f32 %v3585_v17, %v260_v16  ;;  %1780 = vmatprep.mubr.bf16.mxu0 %v547_v15  ;;  %v237_v30 = vld [vmem:[%s3572_s16] sm:$0xff]  ;;  %v238_v31 = vld [vmem:[%s3572_s16 + $0x8] sm:$0xff] }
  0x12   : > { %405 = vst [vmem:[#allocation2 + $0x59] sm:$0x1] %v3493_v2  ;;  %406 = vst [vmem:[#allocation2 + $0x71] sm:$0x1] %v3493_v2  ;;  %v276_v32 = vmul.f32 %v3585_v17, %v237_v30  ;;  %v277_v33 = vmul.f32 %v3585_v17, %v238_v31  ;;  %v261_v34 = vld [vmem:[%s3572_s16 + $0xc0] sm:$0xff]  ;;  %v262_v35 = vld [vmem:[%s3572_s16 + $0xc8] sm:$0xff] }
  0x13   : > { %407 = vst [vmem:[#allocation2 + $0x89] sm:$0x1] %v3493_v2  ;;  %408 = vst [vmem:[#allocation2 + $0xa1] sm:$0x1] %v3493_v2  ;;  %2874 = vmatpush3.bf16.msra.mxu0 %v3419_v8  ;;  %3398 = vmatpush3.bf16.msra.mxu1 %v3419_v8  ;;  %v337_v23 = vadd.f32 %v3590_v18, %v298_v19  ;;  %v338_v24 = vadd.f32 %v3590_v18, %v299_v20  ;;  %v3427_v36 = vld [vmem:[%s4563_s3 + $0x38] sm:$0xff]   ;;  %v3428_v39 = vld [vmem:[%s4563_s3 + $0xc0] sm:$0xff]  }
  0x14   : > { %409 = vst [vmem:[#allocation2 + $0xb9] sm:$0x1] %v3493_v2  ;;  %410 = vst [vmem:[#allocation2 + $0xd1] sm:$0x1] %v3493_v2  ;;  %2875 = vmatprep.subr.bf16.mxu0 %v3420_v9  ;;  %3391 = vmatprep.subr.bf16.mxu1 %v3420_v9  ;;  %v300_v37 = vmul.f32 %v3585_v17, %v261_v34  ;;  %v301_v38 = vmul.f32 %v3585_v17, %v262_v35  ;;  %v3429_v42 = vld [vmem:[%s4563_s3 + $0x140] sm:$0xff]   ;;  %v3432_v49 = vld [vmem:[%s4563_s3 + $0xc8] sm:$0xff]  }
  0x15   : > { %411 = vst [vmem:[#allocation2 + $0xe9] sm:$0x1] %v3493_v2  ;;  %412 = vst [vmem:[#allocation2 + $0x101] sm:$0x1] %v3493_v2  ;;  %v369_v25 = vmax.f32 %v337_v23, 0.0  ;;  %v370_v26 = vmax.f32 %v338_v24, 0.0  ;;  %v315_v40 = vadd.f32 %v3590_v18, %v276_v32  ;;  %v316_v41 = vadd.f32 %v3590_v18, %v277_v33 }
  0x16   : > { %413 = vst [vmem:[#allocation2 + $0x119] sm:$0x1] %v3493_v2  ;;  %414 = vst [vmem:[#allocation2 + $0x131] sm:$0x1] %v3493_v2  ;;  %v339_v43 = vadd.f32 %v3590_v18, %v300_v37  ;;  %v340_v44 = vadd.f32 %v3590_v18, %v301_v38  ;;  %v3430_v45 = vld [vmem:[%s4563_s3 + $0x80] sm:$0xff]   ;;  %v3437_v56 = vld [vmem:[%s4563_s3 + $0x148] sm:$0xff]  }
  0x17   : > { %415 = vst [vmem:[#allocation2 + $0x149] sm:$0x1] %v3493_v2  ;;  %416 = vst [vmem:[#allocation2 + $0x161] sm:$0x1] %v3493_v2  ;;  %2876 = vmatpush3.bf16.msra.mxu0 %v3421_v10  ;;  %3399 = vmatpush3.bf16.msra.mxu1 %v3421_v10  ;;  %v559_v29 = vpack.c.bf16 %v370_v26, %v369_v25  ;;  %v3431_v46 = vld [vmem:[%s4563_s3 + $0x100] sm:$0xff]   ;;  %v347_v47 = vmax.f32 %v315_v40, 0.0 }
  0x18   : > { %417 = vst [vmem:[#allocation2 + $0x179] sm:$0x1] %v3493_v2  ;;  %418 = vst [vmem:[#allocation2 + $0x191] sm:$0x1] %v3493_v2  ;;  %2877 = vmatprep.subr.bf16.mxu0 %v3422_v11  ;;  %3392 = vmatprep.subr.bf16.mxu1 %v3422_v11  ;;  %v348_v48 = vmax.f32 %v316_v41, 0.0  ;;  %v371_v50 = vmax.f32 %v339_v43, 0.0 }
  0x19   : > { %441 = vst [vmem:[#allocation2 + $0x121] sm:$0xff] %v369_v25  ;;  %442 = vst [vmem:[#allocation2 + $0x129] sm:$0xff] %v370_v26  ;;  %1876 = vmatprep.mubr.bf16.mxu1 %v559_v29  ;;  %v372_v51 = vmax.f32 %v340_v44, 0.0  ;;  %v239_v57 = vld [vmem:[%s3572_s16 + $0x10] sm:$0xff]  ;;  %v240_v59 = vld [vmem:[%s3572_s16 + $0x18] sm:$0xff]  ;;  %s2788_s9 = sshll.u32 %s4567_s19, 1 }
  0x1a   : > { %419 = vst [vmem:[#allocation2 + $0x19] sm:$0xff] %v347_v47  ;;  %420 = vst [vmem:[#allocation2 + $0x21] sm:$0xff] %v348_v48  ;;  %v3638_v55 = vpack.c.bf16 %v348_v48, %v347_v47  ;;  %v278_v60 = vmul.f32 %v3585_v17, %v239_v57  ;;  %v263_v61 = vld [vmem:[%s3572_s16 + $0xd0] sm:$0xff]  ;;  %v264_v62 = vld [vmem:[%s3572_s16 + $0xd8] sm:$0xff]  ;;  %v279_v1 = vmul.f32 %v3585_v17, %v240_v59  ;;  %s235_s27 = scalar_lea.vmem %s4565_s5, %s2788_s9 }
  0x1b   : > { %2878 = vmatpush3.bf16.msra.mxu0 %v3423_v21  ;;  %3400 = vmatpush3.bf16.msra.mxu1 %v3423_v21  ;;  %443 = vst [vmem:[#allocation2 + $0x139] sm:$0xff] %v371_v50  ;;  %444 = vst [vmem:[#allocation2 + $0x141] sm:$0xff] %v372_v51  ;;  %v560_v58 = vpack.c.bf16 %v372_v51, %v371_v50  ;;  %v3433_v0 = vld [vmem:[%s4563_s3 + $0x88] sm:$0xff]   ;;  %v302_v2 = vmul.f32 %v3585_v17, %v263_v61  ;;  %v3434_v6 = vld [vmem:[%s4563_s3 + $0xd0] sm:$0xff]  }
  0x1c   : > { %2879 = vmatprep.subr.bf16.mxu0 %v3424_v22  ;;  %3393 = vmatprep.subr.bf16.mxu1 %v3424_v22  ;;  %v303_v3 = vmul.f32 %v3585_v17, %v264_v62  ;;  %v3439_v4 = vld [vmem:[%s4563_s3 + $0x108] sm:$0xff]   ;;  %v317_v5 = vadd.f32 %v3590_v18, %v278_v60  ;;  %v318_v7 = vadd.f32 %v3590_v18, %v279_v1  ;;  %v3435_v10 = vld [vmem:[%s4563_s3 + $0x90] sm:$0xff]   ;;  %v3436_v14 = vld [vmem:[%s4563_s3 + $0xd8] sm:$0xff]  }
  0x1d   : > { %v341_v8 = vadd.f32 %v3590_v18, %v302_v2  ;;  %v241_v20 = vld [vmem:[%s3572_s16 + $0x20] sm:$0xff]  ;;  %v242_v24 = vld [vmem:[%s3572_s16 + $0x28] sm:$0xff]  ;;  %v3438_v32 = vld [vmem:[%s4563_s3 + $0x98] sm:$0xff]  }
  0x1e   : > { %v342_v9 = vadd.f32 %v3590_v18, %v303_v3  ;;  %v349_v11 = vmax.f32 %v317_v5, 0.0  ;;  %v350_v15 = vmax.f32 %v318_v7, 0.0  ;;  %v280_v25 = vmul.f32 %v3585_v17, %v241_v20  ;;  %v265_v30 = vld [vmem:[%s3572_s16 + $0xe0] sm:$0xff]  ;;  %v266_v31 = vld [vmem:[%s3572_s16 + $0xe8] sm:$0xff]  ;;  %v3445_v37 = vld [vmem:[%s4563_s3 + $0x150] sm:$0xff]  }
  0x1f   : > { %2880 = vmatpush3.bf16.msra.mxu0 %v3425_v27  ;;  %3401 = vmatpush3.bf16.msra.mxu1 %v3425_v27  ;;  %v373_v16 = vmax.f32 %v341_v8, 0.0  ;;  %v281_v29 = vmul.f32 %v3585_v17, %v242_v24  ;;  %v304_v34 = vmul.f32 %v3585_v17, %v265_v30  ;;  %v305_v35 = vmul.f32 %v3585_v17, %v266_v31  ;;  %v3440_v38 = vld [vmem:[%s4563_s3 + $0xe0] sm:$0xff]   ;;  %v3447_v43 = vld [vmem:[%s4563_s3 + $0x110] sm:$0xff]   ;;  %v3443_v61 = vld [vmem:[%s4563_s3 + $0xa8] sm:$0xff]  }
  0x20   : > { %2881 = vmatprep.subr.bf16.mxu0 %v3426_v28  ;;  %3394 = vmatprep.subr.bf16.mxu1 %v3426_v28  ;;  %v475_v52 = vld [vmem:[#allocation2 + $0x120] sm:$0xff]  ;;  %v476_v53 = vld [vmem:[#allocation2 + $0x128] sm:$0xff]  ;;  %v374_v19 = vmax.f32 %v342_v9, 0.0  ;;  %421 = vst [vmem:[#allocation2 + $0x31] sm:$0xff] %v349_v11  ;;  %422 = vst [vmem:[#allocation2 + $0x39] sm:$0xff] %v350_v15  ;;  %v3678_v27 = vpack.c.bf16 %v350_v15, %v349_v11  ;;  %v319_v33 = vadd.f32 %v3590_v18, %v280_v25 }
  0x21   : > { %v495_v54 = vpack.c.bf16 %v476_v53, %v475_v52  ;;  %v453_v12 = vld [vmem:[#allocation2 + $0x18] sm:$0xff]  ;;  %v454_v13 = vld [vmem:[#allocation2 + $0x20] sm:$0xff]  ;;  %445 = vst [vmem:[#allocation2 + $0x151] sm:$0xff] %v373_v16  ;;  %v343_v40 = vadd.f32 %v3590_v18, %v304_v34  ;;  %v344_v41 = vadd.f32 %v3590_v18, %v305_v35  ;;  %v243_v57 = vld [vmem:[%s3572_s16 + $0x30] sm:$0xff] }
  0x22   : > { %v3672_v21 = vpack.c.bf16 %v454_v13, %v453_v12  ;;  %v477_v22 = vld [vmem:[#allocation2 + $0x138] sm:$0xff]  ;;  %v478_v23 = vld [vmem:[#allocation2 + $0x140] sm:$0xff]  ;;  %446 = vst [vmem:[#allocation2 + $0x159] sm:$0xff] %v374_v19  ;;  %v561_v28 = vpack.c.bf16 %v374_v19, %v373_v16  ;;  %v282_v59 = vmul.f32 %v3585_v17, %v243_v57  ;;  %v3444_v62 = vld [vmem:[%s4563_s3 + $0xf0] sm:$0xff]  }
  0x23   : > { %2882 = vmatpush3.bf16.msra.mxu0 %v3427_v36  ;;  %3402 = vmatpush3.bf16.msra.mxu1 %v3427_v36  ;;  %v3676_v26 = vpack.c.bf16 %v478_v23, %v477_v22  ;;  %v320_v36 = vadd.f32 %v3590_v18, %v281_v29  ;;  %v3441_v44 = vld [vmem:[%s4563_s3 + $0xa0] sm:$0xff]   ;;  %v3452_v2 = vld [vmem:[%s4563_s3 + $0x158] sm:$0xff]   ;;  %v3446_v12 = vld [vmem:[%s4563_s3 + $0xb0] sm:$0xff]  }
  0x24   : > { %2979 = vmatprep.subr.bf16.mxu1 %v3428_v39  ;;  %3091 = vmatprep.subr.bf16.mxu0 %v3429_v42  ;;  %v351_v39 = vmax.f32 %v319_v33, 0.0  ;;  %v3448_v16 = vld [vmem:[%s4563_s3 + $0xf8] sm:$0xff]   ;;  %v247_v20 = vld [vmem:[%s3572_s16 + $0x50] sm:$0xff]  ;;  %v579_v24 = vld [vmem:[#allocation2 + $0x2] sm:$0xff] }
  0x25   : > { %v352_v42 = vmax.f32 %v320_v36, 0.0  ;;  %v248_v22 = vld [vmem:[%s3572_s16 + $0x58] sm:$0xff]  ;;  %v580_v25 = vld [vmem:[#allocation2 + $0xa] sm:$0xff]  ;;  %v286_v29 = vmul.f32 %v3585_v17, %v247_v20  ;;  %v3450_v33 = vld [vmem:[%s4563_s3 + $0x1c0] sm:$0xff]  }
  0x26   : > { %1781 = vmatmul.mubr.bf16.vlgmr.msra.gmra.mrb[0].mxu0 %v3494_v63  ;;  %1877 = vmatmul.mubr.bf16.vlgmr.msra.gmra.mrb[0].mxu1 %v495_v54  ;;  %423 = vst [vmem:[#allocation2 + $0x49] sm:$0xff] %v351_v39  ;;  %v3442_v54 = vld [vmem:[%s4563_s3 + $0xe8] sm:$0xff]   ;;  %v321_v63 = vadd.f32 %v3590_v18, %v282_v59  ;;  %v3449_v23 = vld [vmem:[%s4563_s3 + $0xb8] sm:$0xff]   ;;  %v287_v30 = vmul.f32 %v3585_v17, %v248_v22  ;;  %v251_v59 = vld [vmem:[%s3572_s16 + $0x70] sm:$0xff] }
  0x27   : > { %2980 = vmatpush3.bf16.msra.mxu1 %v3430_v45  ;;  %3092 = vmatpush3.bf16.msra.mxu0 %v3431_v46  ;;  %v375_v45 = vmax.f32 %v343_v40, 0.0  ;;  %v376_v46 = vmax.f32 %v344_v41, 0.0  ;;  %v455_v47 = vld [vmem:[#allocation2 + $0x30] sm:$0xff]  ;;  %424 = vst [vmem:[#allocation2 + $0x51] sm:$0xff] %v352_v42  ;;  %v456_v48 = vld [vmem:[#allocation2 + $0x38] sm:$0xff]  ;;  %v3707_v51 = vpack.c.bf16 %v352_v42, %v351_v39  ;;  %v3772_v35 = vadd.f32 %v3590_v18, %v286_v29  ;;  %v249_v41 = vld [vmem:[%s3572_s16 + $0x60] sm:$0xff] }
  0x28   : > { %2981 = vmatprep.subr.bf16.mxu1 %v3432_v49  ;;  %1788 = vmatprep.mubr.bf16.mxu0 %v3638_v55  ;;  %v479_v49 = vld [vmem:[#allocation2 + $0x150] sm:$0xff]  ;;  %v3709_v52 = vpack.c.bf16 %v456_v48, %v455_v47  ;;  %v326_v36 = vadd.f32 %v3590_v18, %v287_v30  ;;  %v250_v42 = vld [vmem:[%s3572_s16 + $0x68] sm:$0xff]  ;;  %v3451_v48 = vld [vmem:[%s4563_s3 + $0x180] sm:$0xff]  }
  0x29   : > { %1884 = vmatprep.mubr.bf16.mxu1 %v560_v58  ;;  %3093 = vmatprep.subr.bf16.mxu0 %v3437_v56  ;;  %v480_v50 = vld [vmem:[#allocation2 + $0x158] sm:$0xff]  ;;  %447 = vst [vmem:[#allocation2 + $0x169] sm:$0xff] %v375_v45  ;;  %448 = vst [vmem:[#allocation2 + $0x171] sm:$0xff] %v376_v46  ;;  %v562_v56 = vpack.c.bf16 %v376_v46, %v375_v45  ;;  %v357_v39 = vmax.f32 %v3772_v35, 0.0  ;;  %v611_v45 = vpack.c.bf16 %v580_v25, %v579_v24  ;;  %v3461_v22 = vld [vmem:[%s4563_s3 + $0x190] sm:$0xff]  }
  0x2a   : > { %v3711_v53 = vpack.c.bf16 %v480_v50, %v479_v49  ;;  %v244_v58 = vld [vmem:[%s3572_s16 + $0x38] sm:$0xff]  ;;  %v358_v40 = vmax.f32 %v326_v36, 0.0  ;;  %v289_v46 = vmul.f32 %v3585_v17, %v250_v42  ;;  %v3462_v25 = vld [vmem:[%s4563_s3 + $0x170] sm:$0xff]  }
  0x2b   : > { %2982 = vmatpush3.bf16.msra.mxu1 %v3433_v0  ;;  %3094 = vmatpush3.bf16.msra.mxu0 %v3439_v4  ;;  %v283_v60 = vmul.f32 %v3585_v17, %v244_v58  ;;  %v353_v4 = vmax.f32 %v321_v63, 0.0  ;;  %429 = vst [vmem:[#allocation2 + $0x91] sm:$0xff] %v357_v39  ;;  %v581_v50 = vld [vmem:[#allocation2 + $0x1a] sm:$0xff]  ;;  %v3458_v58 = vld [vmem:[%s4563_s3 + $0x168] sm:$0xff]   ;;  %v3463_v29 = vld [vmem:[%s4563_s3 + $0x130] sm:$0xff]  }
  0x2c   : > { %2983 = vmatprep.subr.bf16.mxu1 %v3434_v6  ;;  %3095 = vmatprep.subr.bf16.mxu0 %v3445_v37  ;;  %v3453_v6 = vld [vmem:[%s4563_s3 + $0x118] sm:$0xff]   ;;  %430 = vst [vmem:[#allocation2 + $0x99] sm:$0xff] %v358_v40  ;;  %v3798_v57 = vadd.f32 %v3590_v18, %v289_v46  ;;  %v3840_v20 = vpack.c.bf16 %v358_v40, %v357_v39  ;;  %v255_v30 = vld [vmem:[%s3572_s16 + $0x90] sm:$0xff] }
  0x2d   : > { %v322_v0 = vadd.f32 %v3590_v18, %v283_v60  ;;  %v457_v1 = vld [vmem:[#allocation2 + $0x48] sm:$0xff]  ;;  %425 = vst [vmem:[#allocation2 + $0x61] sm:$0xff] %v353_v4  ;;  %v252_v60 = vld [vmem:[%s3572_s16 + $0x78] sm:$0xff]  ;;  %v294_v35 = vmul.f32 %v3585_v17, %v255_v30 }
  0x2e   : > { %1789 = vmatmul.mubr.bf16.gmra.mrb[4].mxu0 %v3672_v21  ;;  %1885 = vmatmul.mubr.bf16.gmra.mrb[4].mxu1 %v3676_v26  ;;  %v458_v3 = vld [vmem:[#allocation2 + $0x50] sm:$0xff]  ;;  %v360_v63 = vmax.f32 %v3798_v57, 0.0  ;;  %v3464_v42 = vld [vmem:[%s4563_s3 + $0x1d8] sm:$0xff]  }
  0x2f   : > { %2984 = vmatpush3.bf16.msra.mxu1 %v3435_v10  ;;  %1796 = vmatprep.mubr.bf16.mxu0 %v3678_v27  ;;  %v354_v5 = vmax.f32 %v322_v0, 0.0  ;;  %v3737_v7 = vpack.c.bf16 %v458_v3, %v457_v1  ;;  %v245_v10 = vld [vmem:[%s3572_s16 + $0x40] sm:$0xff]  ;;  %v3459_v0 = vld [vmem:[%s4563_s3 + $0x128] sm:$0xff]   ;;  %v290_v1 = vmul.f32 %v3585_v17, %v251_v59  ;;  %v3875_v40 = vadd.f32 %v3590_v18, %v294_v35  ;;  %v3466_v46 = vld [vmem:[%s4563_s3 + $0x178] sm:$0xff]  }
  0x30   : > { %2985 = vmatprep.subr.bf16.mxu1 %v3436_v14  ;;  %1892 = vmatprep.mubr.bf16.mxu1 %v561_v28  ;;  %v481_v8 = vld [vmem:[#allocation2 + $0x168] sm:$0xff]  ;;  %v482_v9 = vld [vmem:[#allocation2 + $0x170] sm:$0xff]  ;;  %v284_v15 = vmul.f32 %v3585_v17, %v245_v10  ;;  %432 = vst [vmem:[#allocation2 + $0xb1] sm:$0xff] %v360_v63  ;;  %v253_v10 = vld [vmem:[%s3572_s16 + $0x80] sm:$0xff] }
  0x31   : > { %3096 = vmatpush3.bf16.msra.mxu0 %v3447_v43  ;;  %v3740_v11 = vpack.c.bf16 %v482_v9, %v481_v8  ;;  %426 = vst [vmem:[#allocation2 + $0x69] sm:$0xff] %v354_v5  ;;  %v3745_v13 = vpack.c.bf16 %v354_v5, %v353_v4  ;;  %v246_v14 = vld [vmem:[%s3572_s16 + $0x48] sm:$0xff]  ;;  %v3823_v5 = vadd.f32 %v3590_v18, %v290_v1  ;;  %v3460_v8 = vld [vmem:[%s4563_s3 + $0x1d0] sm:$0xff]  }
  0x32   : > { %3097 = vmatprep.subr.bf16.mxu0 %v3452_v2  ;;  %v285_v19 = vmul.f32 %v3585_v17, %v246_v14  ;;  %v323_v28 = vadd.f32 %v3590_v18, %v284_v15  ;;  %v291_v2 = vmul.f32 %v3585_v17, %v252_v60  ;;  %v3457_v3 = vld [vmem:[%s4563_s3 + $0x188] sm:$0xff]  }
  0x33   : > { %2986 = vmatpush3.bf16.msra.mxu1 %v3438_v32  ;;  %v3454_v32 = vld [vmem:[%s4563_s3 + $0x160] sm:$0xff]   ;;  %v361_v15 = vmax.f32 %v3823_v5, 0.0  ;;  %v585_v60 = vld [vmem:[#allocation2 + $0x4a] sm:$0xff] }
  0x34   : > { %2987 = vmatprep.subr.bf16.mxu1 %v3440_v38  ;;  %v324_v31 = vadd.f32 %v3590_v18, %v285_v19  ;;  %v355_v34 = vmax.f32 %v323_v28, 0.0  ;;  %v3456_v38 = vld [vmem:[%s4563_s3 + $0x120] sm:$0xff]   ;;  %v292_v19 = vmul.f32 %v3585_v17, %v253_v10 }
  0x35   : > { %3098 = vmatpush3.bf16.msra.mxu0 %v3453_v6  ;;  %v459_v43 = vld [vmem:[#allocation2 + $0x60] sm:$0xff]  ;;  %v3826_v6 = vadd.f32 %v3590_v18, %v291_v2  ;;  %433 = vst [vmem:[#allocation2 + $0xc1] sm:$0xff] %v361_v15 }
  0x36   : > { %1797 = vmatmul.mubr.bf16.gmra.mrb[8].mxu0 %v3709_v52  ;;  %1893 = vmatmul.mubr.bf16.gmra.mrb[8].mxu1 %v3711_v53  ;;  %v356_v37 = vmax.f32 %v324_v31, 0.0  ;;  %427 = vst [vmem:[#allocation2 + $0x79] sm:$0xff] %v355_v34  ;;  %v3851_v24 = vadd.f32 %v3590_v18, %v292_v19  ;;  %v256_v31 = vld [vmem:[%s3572_s16 + $0x98] sm:$0xff]  ;;  %v3930_v2 = vld [vmem:[%s4563_s3 + $0x200] sm:$0xff]   ;;  %v3471_v19 = vld [vmem:[%s4563_s3 + $0x1e8] sm:$0xff]  }
  0x37   : > { %2988 = vmatpush3.bf16.msra.mxu1 %v3441_v44  ;;  %1804 = vmatprep.mubr.bf16.mxu0 %v3707_v51  ;;  %v295_v36 = vmul.f32 %v3585_v17, %v256_v31  ;;  %v3476_v31 = vld [vmem:[%s4563_s3 + $0x1b0] sm:$0xff]  }
  0x38   : > { %2989 = vmatprep.subr.bf16.mxu1 %v3442_v54  ;;  %1900 = vmatprep.mubr.bf16.mxu1 %v562_v56  ;;  %v460_v44 = vld [vmem:[#allocation2 + $0x68] sm:$0xff]  ;;  %428 = vst [vmem:[#allocation2 + $0x81] sm:$0xff] %v356_v37  ;;  %v3789_v49 = vpack.c.bf16 %v356_v37, %v355_v34  ;;  %v363_v34 = vmax.f32 %v3851_v24, 0.0  ;;  %v463_v37 = vld [vmem:[#allocation2 + $0x90] sm:$0xff]  ;;  %v3477_v24 = vld [vmem:[%s4563_s3 + $0x1f8] sm:$0xff]  }
  0x39   : > { %3099 = vmatprep.subr.bf16.mxu0 %v3454_v32  ;;  %v3784_v47 = vpack.c.bf16 %v460_v44, %v459_v43  ;;  %v3455_v54 = vld [vmem:[%s4563_s3 + $0x1c8] sm:$0xff]   ;;  %v583_v32 = vld [vmem:[#allocation2 + $0x32] sm:$0xff] }
  0x3a   : > { %3100 = vmatpush3.bf16.msra.mxu0 %v3456_v38  ;;  %v464_v38 = vld [vmem:[#allocation2 + $0x98] sm:$0xff]  ;;  %435 = vst [vmem:[#allocation2 + $0xd9] sm:$0xff] %v363_v34  ;;  %v587_v5 = vld [vmem:[#allocation2 + $0x62] sm:$0xff] }
  0x3b   : > { %2990 = vmatpush3.bf16.msra.mxu1 %v3443_v61  ;;  %v582_v61 = vld [vmem:[#allocation2 + $0x22] sm:$0xff]  ;;  %3101 = vmatprep.subr.bf16.mxu0 %v3458_v58  ;;  %v3888_v43 = vpack.c.bf16 %v464_v38, %v463_v37  ;;  %v268_v37 = vld [vmem:[%s3572_s16 + $0xf8] sm:$0xff] }
  0x3c   : > { %2991 = vmatprep.subr.bf16.mxu1 %v3444_v62  ;;  %v258_v58 = vld [vmem:[%s3572_s16 + $0xa8] sm:$0xff] }
  0x3d   : > { %v461_v4 = vld [vmem:[#allocation2 + $0x78] sm:$0xff]  ;;  %v297_v57 = vmul.f32 %v3585_v17, %v258_v58 }
  0x3e   : > { %1805 = vmatmul.mubr.bf16.gmra.mrb[12].mxu0 %v3737_v7  ;;  %1901 = vmatmul.mubr.bf16.gmra.mrb[12].mxu1 %v3740_v11 }
  0x3f   : > { %2992 = vmatpush3.bf16.msra.mxu1 %v3446_v12  ;;  %1812 = vmatprep.mubr.bf16.mxu0 %v3745_v13  ;;  %v462_v9 = vld [vmem:[#allocation2 + $0x80] sm:$0xff]  ;;  %v254_v12 = vld [vmem:[%s3572_s16 + $0x88] sm:$0xff]  ;;  %v3925_v1 = vadd.f32 %v3590_v18, %v297_v57 }
  0x40   : > { %2993 = vmatprep.subr.bf16.mxu1 %v3448_v16  ;;  %1941 = vmatprep.mubr.bf16.mxu1 %v3672_v21  ;;  %v288_v21 = vmul.f32 %v3585_v17, %v249_v41  ;;  %v3835_v14 = vpack.c.bf16 %v462_v9, %v461_v4  ;;  %v362_v16 = vmax.f32 %v3826_v6, 0.0  ;;  %v3878_v41 = vadd.f32 %v3590_v18, %v295_v36  ;;  %v3473_v6 = vld [vmem:[%s4563_s3 + $0x1a8] sm:$0xff]   ;;  %v267_v36 = vld [vmem:[%s3572_s16 + $0xf0] sm:$0xff] }
  0x41   : > { %3102 = vmatpush3.bf16.msra.mxu0 %v3459_v0  ;;  %v368_v4 = vmax.f32 %v3925_v1, 0.0  ;;  %v590_v35 = vld [vmem:[#allocation2 + $0x82] sm:$0xff]  ;;  %v306_v38 = vmul.f32 %v3585_v17, %v267_v36 }
  0x42   : > { %v3795_v56 = vadd.f32 %v3590_v18, %v288_v21  ;;  %434 = vst [vmem:[#allocation2 + $0xc9] sm:$0xff] %v362_v16  ;;  %3103 = vmatprep.subr.bf16.mxu0 %v3462_v25  ;;  %v366_v21 = vmax.f32 %v3878_v41, 0.0  ;;  %v592_v41 = vld [vmem:[#allocation2 + $0x9a] sm:$0xff] }
  0x43   : > { %2994 = vmatpush3.bf16.msra.mxu1 %v3449_v23  ;;  %v293_v23 = vmul.f32 %v3585_v17, %v254_v12  ;;  %v3946_v12 = vpack.c.bf16 %v362_v16, %v361_v15  ;;  %440 = vst [vmem:[#allocation2 + $0x111] sm:$0xff] %v368_v4  ;;  %v467_v15 = vld [vmem:[#allocation2 + $0xc0] sm:$0xff] }
  0x44   : > { %3203 = vmatprep.subr.bf16.mxu1 %v3450_v33  ;;  %v359_v62 = vmax.f32 %v3795_v56, 0.0  ;;  %v584_v33 = vld [vmem:[#allocation2 + $0x3a] sm:$0xff]  ;;  %438 = vst [vmem:[#allocation2 + $0xf9] sm:$0xff] %v366_v21 }
  0x45   : > { %v3857_v28 = vadd.f32 %v3590_v18, %v293_v23  ;;  %3104 = vmatpush3.bf16.msra.mxu0 %v3463_v29  ;;  %v3890_v44 = vpack.c.bf16 %v584_v33, %v583_v32  ;;  %v3474_v23 = vld [vmem:[%s4563_s3 + $0x1f0] sm:$0xff]   ;;  %v469_v32 = vld [vmem:[#allocation2 + $0xd8] sm:$0xff] }
  0x46   : > { %1813 = vmatmul.mubr.bf16.gmra.mrb[16].mxu0 %v3784_v47  ;;  %1942 = vmatmul.mubr.bf16.vlgmr.msra.gmra.mrb[16].mxu1 %v611_v45  ;;  %431 = vst [vmem:[#allocation2 + $0xa9] sm:$0xff] %v359_v62  ;;  %v365_v45 = vmax.f32 %v3875_v40, 0.0  ;;  %v589_v33 = vld [vmem:[#allocation2 + $0x7a] sm:$0xff] }
  0x47   : > { %3204 = vmatpush3.bf16.msra.mxu1 %v3451_v48  ;;  %1820 = vmatprep.mubr.bf16.mxu0 %v3789_v49  ;;  %v364_v39 = vmax.f32 %v3857_v28, 0.0  ;;  %v3467_v48 = vld [vmem:[%s4563_s3 + $0x138] sm:$0xff]  }
  0x48   : > { %1949 = vmatprep.mubr.bf16.mxu1 %v3709_v52  ;;  %3205 = vmatprep.subr.bf16.mxu1 %v3455_v54  ;;  %v3831_v52 = vpack.c.bf16 %v582_v61, %v581_v50  ;;  %v3904_v50 = vpack.c.bf16 %v360_v63, %v359_v62  ;;  %437 = vst [vmem:[#allocation2 + $0xf1] sm:$0xff] %v365_v45  ;;  %v257_v54 = vld [vmem:[%s3572_s16 + $0xa0] sm:$0xff]  ;;  %v586_v61 = vld [vmem:[#allocation2 + $0x52] sm:$0xff] }
  0x49   : > { %436 = vst [vmem:[#allocation2 + $0xe1] sm:$0xff] %v364_v39  ;;  %3105 = vmatprep.subr.bf16.mxu0 %v3466_v46  ;;  %v296_v56 = vmul.f32 %v3585_v17, %v257_v54  ;;  %v3468_v62 = vld [vmem:[%s4563_s3 + $0x1e0] sm:$0xff]   ;;  %v3939_v10 = vpack.c.bf16 %v586_v61, %v585_v60  ;;  %v468_v16 = vld [vmem:[#allocation2 + $0xc8] sm:$0xff]  ;;  %v3973_v30 = vpack.c.bf16 %v364_v39, %v363_v34  ;;  %v3479_v34 = vld [vmem:[%s4563_s3 + $0x1b8] sm:$0xff]  }
  0x4a   : > { %3106 = vmatpush3.bf16.msra.mxu0 %v3467_v48  ;;  %v3965_v25 = vpack.c.bf16 %v468_v16, %v467_v15  ;;  %v4000_v46 = vpack.c.bf16 %v366_v21, %v365_v45  ;;  %v345_v48 = vadd.f32 %v3590_v18, %v306_v38  ;;  %v595_v1 = vld [vmem:[#allocation2 + $0xc2] sm:$0xff] }
  0x4b   : > { %3206 = vmatpush3.bf16.msra.mxu1 %v3457_v3  ;;  %v3922_v0 = vadd.f32 %v3590_v18, %v296_v56  ;;  %3339 = vmatprep.subr.bf16.mxu0 %v3930_v2  ;;  %v665_v16 = vld [vmem:[#allocation2 + $0x120] sm:$0xff] }
  0x4c   : > { %3207 = vmatprep.subr.bf16.mxu1 %v3460_v8  ;;  %v3470_v8 = vld [vmem:[%s4563_s3 + $0x1a0] sm:$0xff]   ;;  %v377_v58 = vmax.f32 %v345_v48, 0.0 }
  0x4d   : > { %v465_v59 = vld [vmem:[#allocation2 + $0xa8] sm:$0xff]  ;;  %v466_v63 = vld [vmem:[#allocation2 + $0xb0] sm:$0xff]  ;;  %v367_v3 = vmax.f32 %v3922_v0, 0.0  ;;  %v608_v48 = vld [vmem:[#allocation2 + $0x15a] sm:$0xff] }
  0x4e   : > { %1821 = vmatmul.mubr.bf16.gmra.mrb[20].mxu0 %v3835_v14  ;;  %1950 = vmatmul.mubr.bf16.gmra.mrb[20].mxu1 %v3831_v52  ;;  %v3937_v9 = vpack.c.bf16 %v466_v63, %v465_v59  ;;  %v591_v59 = vld [vmem:[#allocation2 + $0x92] sm:$0xff]  ;;  %449 = vst [vmem:[#allocation2 + $0x181] sm:$0xff] %v377_v58  ;;  %v593_v61 = vld [vmem:[#allocation2 + $0xaa] sm:$0xff]  ;;  %v606_v38 = vld [vmem:[#allocation2 + $0x142] sm:$0xff] }
  0x4f   : > { %1828 = vmatprep.mubr.bf16.mxu0 %v3840_v20  ;;  %1957 = vmatprep.mubr.bf16.mxu1 %v3737_v7  ;;  %v3465_v7 = vld [vmem:[%s4563_s3 + $0x198] sm:$0xff]   ;;  %439 = vst [vmem:[#allocation2 + $0x109] sm:$0xff] %v367_v3  ;;  %v4010_v21 = vpack.c.bf16 %v592_v41, %v591_v59 }
  0x50   : > { %3208 = vmatpush3.bf16.msra.mxu1 %v3461_v22  ;;  %v588_v22 = vld [vmem:[#allocation2 + $0x6a] sm:$0xff]  ;;  %v470_v28 = vld [vmem:[#allocation2 + $0xe0] sm:$0xff]  ;;  %v472_v40 = vld [vmem:[#allocation2 + $0xf8] sm:$0xff] }
  0x51   : > { %3209 = vmatprep.subr.bf16.mxu1 %v3464_v42  ;;  %v3967_v29 = vpack.c.bf16 %v588_v22, %v587_v5  ;;  %v3991_v39 = vpack.c.bf16 %v470_v28, %v469_v32  ;;  %v3993_v42 = vpack.c.bf16 %v590_v35, %v589_v33  ;;  %v597_v5 = vld [vmem:[#allocation2 + $0xda] sm:$0xff]  ;;  %v666_v22 = vld [vmem:[#allocation2 + $0x128] sm:$0xff]  ;;  %v602_v33 = vld [vmem:[#allocation2 + $0x112] sm:$0xff] }
  0x52   : > { %v4059_v32 = vpack.c.bf16 %v666_v22, %v665_v16  ;;  %v3482_v35 = vld [vmem:[%s4563_s3 + $0x230] sm:$0xff]   ;;  %v603_v28 = vld [vmem:[#allocation2 + $0x122] sm:$0xff] }
  0x53   : > { %v732_v16 = vld [vmem:[#allocation2 + $0x141] sm:$0xff] }
  0x54   : > { %3210 = vmatpush3.bf16.msra.mxu1 %v3465_v7  ;;  %v307_v7 = vmul.f32 %v3585_v17, %v268_v37  ;;  %v471_v17 = vld [vmem:[#allocation2 + $0xf0] sm:$0xff]  ;;  %v605_v37 = vld [vmem:[#allocation2 + $0x13a] sm:$0xff] }
  0x55   : > { %3211 = vmatprep.subr.bf16.mxu1 %v3468_v62  ;;  %v4008_v45 = vpack.c.bf16 %v472_v40, %v471_v17  ;;  %v594_v62 = vld [vmem:[#allocation2 + $0xb2] sm:$0xff] }
  0x56   : > { %1829 = vmatmul.mubr.bf16.gmra.mrb[24].mxu0 %v3888_v43  ;;  %1958 = vmatmul.mubr.bf16.gmra.mrb[24].mxu1 %v3890_v44  ;;  %v346_v54 = vadd.f32 %v3590_v18, %v307_v7  ;;  %v4016_v18 = vpack.c.bf16 %v368_v4, %v367_v3  ;;  %v473_v56 = vld [vmem:[#allocation2 + $0x108] sm:$0xff]  ;;  %v474_v57 = vld [vmem:[#allocation2 + $0x110] sm:$0xff]  ;;  %v901_v40 = vld [vmem:[#allocation2 + $0x39] sm:$0xff] }
  0x57   : > { %1836 = vmatprep.mubr.bf16.mxu0 %v3904_v50  ;;  %1965 = vmatprep.mubr.bf16.mxu1 %v3784_v47  ;;  %v4022_v63 = vpack.c.bf16 %v474_v57, %v473_v56  ;;  %v596_v3 = vld [vmem:[#allocation2 + $0xca] sm:$0xff]  ;;  %v607_v7 = vld [vmem:[#allocation2 + $0x152] sm:$0xff] }
  0x58   : > { %3212 = vmatpush3.bf16.msra.mxu1 %v3470_v8  ;;  %v378_v60 = vmax.f32 %v346_v54, 0.0  ;;  %v4024_v8 = vpack.c.bf16 %v594_v62, %v593_v61  ;;  %v4032_v4 = vpack.c.bf16 %v596_v3, %v595_v1  ;;  %v673_v54 = vld [vmem:[#allocation2 + $0x180] sm:$0xff]  ;;  %v4092_v59 = vpack.c.bf16 %v608_v48, %v607_v7  ;;  %v900_v17 = vld [vmem:[#allocation2 + $0x31] sm:$0xff]  ;;  %v902_v62 = vld [vmem:[#allocation2 + $0x49] sm:$0xff] }
  0x59   : > { %3213 = vmatprep.subr.bf16.mxu1 %v3471_v19  ;;  %v3472_v19 = vld [vmem:[%s4563_s3 + $0x208] sm:$0xff]   ;;  %v932_v61 = vpack.c.bf16 %v901_v40, %v900_v17  ;;  %v836_v56 = vld [vmem:[#allocation2 + $0x30] sm:$0xff]  ;;  %v837_v57 = vld [vmem:[#allocation2 + $0x38] sm:$0xff] }
  0x5a   : > { %450 = vst [vmem:[#allocation2 + $0x189] sm:$0xff] %v378_v60  ;;  %v4026_v0 = vpack.c.bf16 %v378_v60, %v377_v58  ;;  %v609_v60 = vld [vmem:[#allocation2 + $0x16a] sm:$0xff]  ;;  %v868_v3 = vpack.c.bf16 %v837_v57, %v836_v56 }
  0x5b   : > { %v903_v1 = vld [vmem:[#allocation2 + $0x51] sm:$0xff] }
  0x5c   : > { %3214 = vmatpush3.bf16.msra.mxu1 %v3473_v6  ;;  %v598_v6 = vld [vmem:[#allocation2 + $0xe2] sm:$0xff] }
  0x5d   : > { %3215 = vmatprep.subr.bf16.mxu1 %v3474_v23  ;;  %v4045_v15 = vpack.c.bf16 %v598_v6, %v597_v5  ;;  %v3480_v23 = vld [vmem:[%s4563_s3 + $0x220] sm:$0xff]   ;;  %v838_v5 = vld [vmem:[#allocation2 + $0x48] sm:$0xff]  ;;  %v839_v6 = vld [vmem:[#allocation2 + $0x50] sm:$0xff] }
  0x5e   : > { %1837 = vmatmul.mubr.bf16.gmra.mrb[28].mxu0 %v3937_v9  ;;  %1966 = vmatmul.mubr.bf16.gmra.mrb[28].mxu1 %v3939_v10 }
  0x5f   : > { %1844 = vmatprep.mubr.bf16.mxu0 %v3946_v12  ;;  %1973 = vmatprep.mubr.bf16.mxu1 %v3835_v14 }
  0x60   : > { %3216 = vmatpush3.bf16.msra.mxu1 %v3476_v31 }
  0x61   : > { %3217 = vmatprep.subr.bf16.mxu1 %v3477_v24  ;;  %v674_v58 = vld [vmem:[#allocation2 + $0x188] sm:$0xff] }
  0x64   : > { %3218 = vmatpush3.bf16.msra.mxu1 %v3479_v34  ;;  %v604_v34 = vld [vmem:[#allocation2 + $0x12a] sm:$0xff] }
  0x65   : > { %v4080_v36 = vpack.c.bf16 %v604_v34, %v603_v28 }
  0x66   : > { %1845 = vmatmul.mubr.bf16.gmra.mrb[32].mxu0 %v3965_v25  ;;  %1974 = vmatmul.mubr.bf16.gmra.mrb[32].mxu1 %v3967_v29 }
  0x67   : > { %1852 = vmatprep.mubr.bf16.mxu0 %v3973_v30  ;;  %1981 = vmatprep.mubr.bf16.mxu1 %v3888_v43 }
  0x6e   : > { %1853 = vmatmul.mubr.bf16.gmra.mrb[36].mxu0 %v3991_v39  ;;  %1982 = vmatmul.mubr.bf16.gmra.mrb[36].mxu1 %v3993_v42 }
  0x6f   : > { %1860 = vmatprep.mubr.bf16.mxu0 %v4000_v46  ;;  %1989 = vmatprep.mubr.bf16.mxu1 %v3937_v9 }
  0x76   : > { %1861 = vmatmul.mubr.bf16.gmra.mrb[40].mxu0 %v4008_v45  ;;  %1990 = vmatmul.mubr.bf16.gmra.mrb[40].mxu1 %v4010_v21 }
  0x77   : > { %1868 = vmatprep.mubr.bf16.mxu0 %v4016_v18  ;;  %1997 = vmatprep.mubr.bf16.mxu1 %v3965_v25 }
  0x7e   : > { %1869 = vmatmul.mubr.bf16.gmra.mrb[44].mxu0 %v4022_v63  ;;  %1998 = vmatmul.mubr.bf16.gmra.mrb[44].mxu1 %v4024_v8 }
  0x7f   : > { %2005 = vmatprep.mubr.bf16.mxu1 %v3991_v39  ;;  %2102 = vmatprep.mubr.bf16.mxu0 %v3831_v52  ;;  %v3475_v52 = vld [vmem:[%s4563_s3 + $0x210] sm:$0xff]  }
  0x86   : > { %2006 = vmatmul.mubr.bf16.gmra.mrb[48].mxu1 %v4032_v4  ;;  %2103 = vmatmul.mubr.bf16.vlgmr.msra.gmra.mrb[48].mxu0 %v3638_v55  ;;  %v3478_v55 = vld [vmem:[%s4563_s3 + $0x218] sm:$0xff]  }
  0x87   : > { %3340 = vmatpush3.bf16.msra.mxu0 %v3930_v2  ;;  %2013 = vmatprep.mubr.bf16.mxu1 %v4008_v45  ;;  %v600_v2 = vld [vmem:[#allocation2 + $0xfa] sm:$0xff] }
  0x88   : > { %2110 = vmatprep.mubr.bf16.mxu0 %v3890_v44  ;;  %3341 = vmatprep.subr.bf16.mxu0 %v3472_v19  ;;  %v599_v44 = vld [vmem:[#allocation2 + $0xf2] sm:$0xff] }
  0x89   : > { %v4057_v31 = vpack.c.bf16 %v600_v2, %v599_v44  ;;  %v730_v44 = vld [vmem:[#allocation2 + $0x129] sm:$0xff] }
  0x8b   : > { %3342 = vmatpush3.bf16.msra.mxu0 %v3472_v19  ;;  %v933_v19 = vpack.c.bf16 %v903_v1, %v902_v62 }
  0x8c   : > { %3343 = vmatprep.subr.bf16.mxu0 %v3475_v52 }
  0x8e   : > { %2014 = vmatmul.mubr.bf16.gmra.mrb[52].mxu1 %v4045_v15  ;;  %2111 = vmatmul.mubr.bf16.gmra.mrb[52].mxu0 %v3678_v27  ;;  %v3481_v27 = vld [vmem:[%s4563_s3 + $0x228] sm:$0xff]  }
  0x8f   : > { %2021 = vmatprep.mubr.bf16.mxu1 %v4022_v63  ;;  %2118 = vmatprep.mubr.bf16.mxu0 %v3939_v10  ;;  %v601_v10 = vld [vmem:[#allocation2 + $0x10a] sm:$0xff] }
  0x90   : > { %3344 = vmatpush3.bf16.msra.mxu0 %v3475_v52  ;;  %v4071_v24 = vpack.c.bf16 %v602_v33, %v601_v10  ;;  %v869_v52 = vpack.c.bf16 %v839_v6, %v838_v5 }
  0x91   : > { %3345 = vmatprep.subr.bf16.mxu0 %v3478_v55 }
  0x94   : > { %3346 = vmatpush3.bf16.msra.mxu0 %v3478_v55  ;;  %v729_v55 = vld [vmem:[#allocation2 + $0x121] sm:$0xff] }
  0x95   : > { %3347 = vmatprep.subr.bf16.mxu0 %v3480_v23  ;;  %v4114_v2 = vpack.c.bf16 %v730_v44, %v729_v55 }
  0x96   : > { %2022 = vmatmul.mubr.bf16.gmra.mrb[56].mxu1 %v4057_v31  ;;  %2119 = vmatmul.mubr.bf16.gmra.mrb[56].mxu0 %v3707_v51  ;;  %v3483_v51 = vld [vmem:[%s4563_s3 + $0x238] sm:$0xff]  }
  0x97   : > { %2029 = vmatprep.mubr.bf16.mxu1 %v4059_v32  ;;  %2126 = vmatprep.mubr.bf16.mxu0 %v3967_v29 }
  0x98   : > { %3348 = vmatpush3.bf16.msra.mxu0 %v3480_v23 }
  0x99   : > { %3349 = vmatprep.subr.bf16.mxu0 %v3481_v27 }
  0x9c   : > { %3350 = vmatpush3.bf16.msra.mxu0 %v3481_v27  ;;  %v801_v27 = vld [vmem:[#allocation2 + $0x182] sm:$0xff] }
  0x9d   : > { %3351 = vmatprep.subr.bf16.mxu0 %v3482_v35 }
  0x9e   : > { %2030 = vmatmul.mubr.bf16.gmra.mrb[60].mxu1 %v4071_v24  ;;  %2127 = vmatmul.mubr.bf16.gmra.mrb[60].mxu0 %v3745_v13 }
  0x9f   : > { %2037 = vmatprep.mubr.bf16.mxu1 %v3676_v26  ;;  %2134 = vmatprep.mubr.bf16.mxu0 %v3993_v42  ;;  %v4086_v26 = vpack.c.bf16 %v606_v38, %v605_v37 }
  0xa0   : > { %3352 = vmatpush3.bf16.msra.mxu0 %v3482_v35 }
  0xa1   : > { %3353 = vmatprep.subr.bf16.mxu0 %v3483_v51 }
  0xa4   : > { %3354 = vmatpush3.bf16.msra.mxu0 %v3483_v51 }
  0xa6   : > { %2038 = vmatmul.mubr.bf16.gmra.mrb[64].mxu1 %v4080_v36  ;;  %2135 = vmatmul.mubr.bf16.gmra.mrb[64].mxu0 %v3789_v49 }
  0xa7   : > { %2045 = vmatprep.mubr.bf16.mxu1 %v3711_v53  ;;  %2142 = vmatprep.mubr.bf16.mxu0 %v4010_v21  ;;  %v4094_v53 = vpack.c.bf16 %v674_v58, %v673_v54 }
  0xae   : > { %2046 = vmatmul.mubr.bf16.gmra.mrb[68].mxu1 %v4086_v26  ;;  %2143 = vmatmul.mubr.bf16.gmra.mrb[68].mxu0 %v3840_v20 }
  0xaf   : > { %2053 = vmatprep.mubr.bf16.mxu1 %v3740_v11  ;;  %2150 = vmatprep.mubr.bf16.mxu0 %v4024_v8  ;;  %v610_v11 = vld [vmem:[#allocation2 + $0x172] sm:$0xff] }
  0xb0   : > { %v4100_v41 = vpack.c.bf16 %v610_v11, %v609_v60  ;;  %v967_v11 = vld [vmem:[#allocation2 + $0x52] sm:$0xff] }
  0xb6   : > { %2054 = vmatmul.mubr.bf16.gmra.mrb[72].mxu1 %v4092_v59  ;;  %2151 = vmatmul.mubr.bf16.gmra.mrb[72].mxu0 %v3904_v50 }
  0xb7   : > { %2061 = vmatprep.mubr.bf16.mxu1 %v4094_v53  ;;  %2158 = vmatprep.mubr.bf16.mxu0 %v4032_v4 }
  0xbe   : > { %2062 = vmatmul.mubr.bf16.gmra.mrb[76].mxu1 %v4100_v41  ;;  %2159 = vmatmul.mubr.bf16.gmra.mrb[76].mxu0 %v3946_v12 }
  0xbf   : > { %2166 = vmatprep.mubr.bf16.mxu0 %v4045_v15  ;;  %2263 = vmatprep.mubr.bf16.mxu1 %v932_v61 }
  0xc6   : > { %2167 = vmatmul.mubr.bf16.gmra.mrb[80].mxu0 %v3973_v30  ;;  %2264 = vmatmul.mubr.bf16.vlgmr.msra.gmra.mrb[80].mxu1 %v868_v3 }
  0xc7   : > { %2174 = vmatprep.mubr.bf16.mxu0 %v4057_v31  ;;  %2271 = vmatprep.mubr.bf16.mxu1 %v933_v19 }
  0xce   : > { %2175 = vmatmul.mubr.bf16.gmra.mrb[84].mxu0 %v4000_v46  ;;  %2272 = vmatmul.mubr.bf16.gmra.mrb[84].mxu1 %v869_v52 }
  0xcf   : > { %2182 = vmatprep.mubr.bf16.mxu0 %v4071_v24  ;;  %2279 = vmatprep.mubr.bf16.mxu1 %v3745_v13  ;;  %v731_v13 = vld [vmem:[#allocation2 + $0x139] sm:$0xff] }
  0xd0   : > { %v4120_v22 = vpack.c.bf16 %v732_v16, %v731_v13 }
  0xd6   : > { %2183 = vmatmul.mubr.bf16.gmra.mrb[88].mxu0 %v4016_v18  ;;  %2280 = vmatmul.mubr.bf16.gmra.mrb[88].mxu1 %v3784_v47  ;;  %v733_v47 = vld [vmem:[#allocation2 + $0x151] sm:$0xff] }
  0xd7   : > { %2190 = vmatprep.mubr.bf16.mxu0 %v4080_v36  ;;  %2287 = vmatprep.mubr.bf16.mxu1 %v3789_v49  ;;  %v734_v49 = vld [vmem:[#allocation2 + $0x159] sm:$0xff] }
  0xd8   : > { %v4126_v23 = vpack.c.bf16 %v734_v49, %v733_v47 }
  0xde   : > { %2191 = vmatmul.mubr.bf16.gmra.mrb[92].mxu0 %v4114_v2  ;;  %2288 = vmatmul.mubr.bf16.gmra.mrb[92].mxu1 %v3835_v14  ;;  %v735_v14 = vld [vmem:[#allocation2 + $0x169] sm:$0xff] }
  0xdf   : > { %2198 = vmatprep.mubr.bf16.mxu0 %v4086_v26  ;;  %2295 = vmatprep.mubr.bf16.mxu1 %v3840_v20  ;;  %v736_v20 = vld [vmem:[#allocation2 + $0x171] sm:$0xff] }
  0xe0   : > { %v4132_v10 = vpack.c.bf16 %v736_v20, %v735_v14 }
  0xe6   : > { %2199 = vmatmul.mubr.bf16.gmra.mrb[96].mxu0 %v4120_v22  ;;  %2296 = vmatmul.mubr.bf16.gmra.mrb[96].mxu1 %v3888_v43  ;;  %v802_v43 = vld [vmem:[#allocation2 + $0x18a] sm:$0xff] }
  0xe7   : > { %2206 = vmatprep.mubr.bf16.mxu0 %v4092_v59  ;;  %2303 = vmatprep.mubr.bf16.mxu1 %v3904_v50  ;;  %v4134_v33 = vpack.c.bf16 %v802_v43, %v801_v27  ;;  %v964_v50 = vld [vmem:[#allocation2 + $0x32] sm:$0xff] }
  0xee   : > { %2207 = vmatmul.mubr.bf16.gmra.mrb[100].mxu0 %v4126_v23  ;;  %2304 = vmatmul.mubr.bf16.gmra.mrb[100].mxu1 %v3937_v9  ;;  %v965_v9 = vld [vmem:[#allocation2 + $0x3a] sm:$0xff] }
  0xef   : > { %2214 = vmatprep.mubr.bf16.mxu0 %v4100_v41  ;;  %2311 = vmatprep.mubr.bf16.mxu1 %v3946_v12  ;;  %v996_v48 = vpack.c.bf16 %v965_v9, %v964_v50 }
  0xf6   : > { %2215 = vmatmul.mubr.bf16.gmra.mrb[104].mxu0 %v4132_v10  ;;  %2312 = vmatmul.mubr.bf16.gmra.mrb[104].mxu1 %v3965_v25 }
  0xf7   : > { %2222 = vmatprep.mubr.bf16.mxu0 %v4134_v33  ;;  %2319 = vmatprep.mubr.bf16.mxu1 %v3973_v30  ;;  %v966_v30 = vld [vmem:[#allocation2 + $0x4a] sm:$0xff] }
  0xf8   : > { %v997_v57 = vpack.c.bf16 %v967_v11, %v966_v30 }
  0xf9   : > { %v2883_v35 = vpop.f32.mrb[0].mxu0  ;;  %v2955_v12 = vpop.f32.mrb[0].mxu1 }
  0xfa   : > { %v2884_v51 = vpop.f32.mrb[1].mxu0  ;;  %v2956_v28 = vpop.f32.mrb[1].mxu1 }
  0xfb   : > { %v4140_v34 = vadd.f32 %v2884_v51, %v2883_v35  ;;  %v4142_v37 = vadd.f32 %v2956_v28, %v2955_v12  ;;  %v2886_v38 = vpop.f32.mrb[2].mxu0  ;;  %v2958_v7 = vpop.f32.mrb[2].mxu1 }
  0xfc   : > { %v2887_v54 = vpop.f32.mrb[3].mxu0  ;;  %v2959_v58 = vpop.f32.mrb[3].mxu1 }
  0xfd   : > { %v4144_v25 = vadd.f32 %v2887_v54, %v2886_v38  ;;  %v4146_v60 = vadd.f32 %v2959_v58, %v2958_v7 }
  0xfe   : > { %2223 = vmatmul.mubr.bf16.gmra.mrb[108].mxu0 %v4026_v0  ;;  %2320 = vmatmul.mubr.bf16.gmra.mrb[108].mxu1 %v3991_v39 }
  0xff   : > { %2327 = vmatprep.mubr.bf16.mxu1 %v4000_v46  ;;  %3355 = vmatprep.mubr.bf16.mxu0 %v996_v48 }
 0x101   : > { %v2889_v17 = vpop.f32.mrb[4].mxu0  ;;  %v2961_v40 = vpop.f32.mrb[4].mxu1 }
 0x102   : > { %v2890_v61 = vpop.f32.mrb[5].mxu0  ;;  %v2962_v56 = vpop.f32.mrb[5].mxu1 }
 0x103   : > { %v4151_v62 = vadd.f32 %v2890_v61, %v2889_v17  ;;  %v4153_v1 = vadd.f32 %v2962_v56, %v2961_v40  ;;  %v2892_v3 = vpop.f32.mrb[6].mxu0  ;;  %v2964_v19 = vpop.f32.mrb[6].mxu1 }
 0x104   : > { %v2893_v5 = vpop.f32.mrb[7].mxu0  ;;  %v2965_v6 = vpop.f32.mrb[7].mxu1 }
 0x105   : > { %v4155_v52 = vadd.f32 %v2893_v5, %v2892_v3  ;;  %v4157_v39 = vadd.f32 %v2965_v6, %v2964_v19  ;;  %v860_v19 = vld [vmem:[#allocation2 + $0x150] sm:$0xff]  ;;  %v861_v5 = vld [vmem:[#allocation2 + $0x158] sm:$0xff] }
 0x106   : > { %2328 = vmatmul.mubr.bf16.gmra.mrb[112].mxu1 %v4008_v45  ;;  %3356 = vmatmul.mubr.bf16.vlgmr.msra.gmra.mrb[112].mxu0 %v997_v57 }
 0x107   : > { %2335 = vmatprep.mubr.bf16.mxu1 %v4016_v18  ;;  %3359 = vmatprep.mubr.bf16.mxu0 %v3967_v29 }
 0x109   : > { %v2895_v46 = vpop.f32.mrb[8].mxu0  ;;  %v2967_v55 = vpop.f32.mrb[8].mxu1 }
 0x10a   : > { %v2896_v44 = vpop.f32.mrb[9].mxu0  ;;  %v2968_v13 = vpop.f32.mrb[9].mxu1 }
 0x10b   : > { %v4162_v16 = vadd.f32 %v2896_v44, %v2895_v46  ;;  %v4164_v47 = vadd.f32 %v2968_v13, %v2967_v55  ;;  %v2898_v49 = vpop.f32.mrb[10].mxu0  ;;  %v2970_v14 = vpop.f32.mrb[10].mxu1  ;;  %v880_v44 = vpack.c.bf16 %v861_v5, %v860_v19 }
 0x10c   : > { %v2899_v20 = vpop.f32.mrb[11].mxu0  ;;  %v2971_v27 = vpop.f32.mrb[11].mxu1 }
 0x10d   : > { %v4166_v43 = vadd.f32 %v2899_v20, %v2898_v49  ;;  %v4168_v45 = vadd.f32 %v2971_v27, %v2970_v14 }
 0x10e   : > { %2336 = vmatmul.mubr.bf16.gmra.mrb[116].mxu1 %v4022_v63  ;;  %3360 = vmatmul.mubr.bf16.gmra.mrb[116].mxu0 %v3993_v42  ;;  %v858_v42 = vld [vmem:[#allocation2 + $0x138] sm:$0xff] }
 0x10f   : > { %2343 = vmatprep.mubr.bf16.mxu1 %v4114_v2  ;;  %3363 = vmatprep.mubr.bf16.mxu0 %v4010_v21  ;;  %v859_v21 = vld [vmem:[#allocation2 + $0x140] sm:$0xff] }
 0x110   : > { %v879_v11 = vpack.c.bf16 %v859_v21, %v858_v42 }
 0x111   : > { %v2901_v29 = vpop.f32.mrb[12].mxu0  ;;  %v2973_v18 = vpop.f32.mrb[12].mxu1 }
 0x112   : > { %v2902_v50 = vpop.f32.mrb[13].mxu0  ;;  %v2974_v9 = vpop.f32.mrb[13].mxu1 }
 0x113   : > { %v4174_v35 = vadd.f32 %v2902_v50, %v2901_v29  ;;  %v4176_v12 = vadd.f32 %v2974_v9, %v2973_v18  ;;  %v2904_v51 = vpop.f32.mrb[14].mxu0  ;;  %v2976_v28 = vpop.f32.mrb[14].mxu1  ;;  %v862_v18 = vld [vmem:[#allocation2 + $0x168] sm:$0xff]  ;;  %v863_v50 = vld [vmem:[#allocation2 + $0x170] sm:$0xff] }
 0x114   : > { %v2905_v38 = vpop.f32.mrb[15].mxu0  ;;  %v2977_v7 = vpop.f32.mrb[15].mxu1 }
 0x115   : > { %v4178_v48 = vadd.f32 %v2905_v38, %v2904_v51  ;;  %v4180_v63 = vadd.f32 %v2977_v7, %v2976_v28  ;;  %v881_v38 = vpack.c.bf16 %v863_v50, %v862_v18 }
 0x116   : > { %2344 = vmatmul.mubr.bf16.gmra.mrb[120].mxu1 %v4059_v32  ;;  %3364 = vmatmul.mubr.bf16.gmra.mrb[120].mxu0 %v4024_v8 }
 0x117   : > { %2351 = vmatprep.mubr.bf16.mxu1 %v4120_v22  ;;  %3367 = vmatprep.mubr.bf16.mxu0 %v4032_v4 }
 0x119   : > { %v2907_v2 = vpop.f32.mrb[16].mxu0  ;;  %v2995_v54 = vpop.f32.mrb[16].mxu1 }
 0x11a   : > { %v2908_v58 = vpop.f32.mrb[17].mxu0  ;;  %v2996_v30 = vpop.f32.mrb[17].mxu1 }
 0x11b   : > { %v4186_v17 = vadd.f32 %v2908_v58, %v2907_v2  ;;  %v2997_v40 = vadd.f32 %v2996_v30, %v2995_v54  ;;  %v2910_v61 = vpop.f32.mrb[18].mxu0  ;;  %v2998_v56 = vpop.f32.mrb[18].mxu1  ;;  %v930_v30 = vld [vmem:[#allocation2 + $0x199] sm:$0xff] }
 0x11c   : > { %v2911_v57 = vpop.f32.mrb[19].mxu0  ;;  %v2999_v32 = vpop.f32.mrb[19].mxu1 }
 0x11d   : > { %v4189_v8 = vadd.f32 %v2997_v40, %v4140_v34  ;;  %v4191_v22 = vadd.f32 %v2911_v57, %v2910_v61  ;;  %v3000_v4 = vadd.f32 %v2999_v32, %v2998_v56 }
 0x11e   : > { %2352 = vmatmul.mubr.bf16.gmra.mrb[124].mxu1 %v879_v11  ;;  %3368 = vmatmul.mubr.bf16.gmra.mrb[124].mxu0 %v4045_v15  ;;  %v931_v11 = vld [vmem:[#allocation2 + $0x1a1] sm:$0xff] }
 0x11f   : > { %v4195_v3 = vadd.f32 %v3000_v4, %v4144_v25  ;;  %2359 = vmatprep.mubr.bf16.mxu1 %v4126_v23  ;;  %3371 = vmatprep.mubr.bf16.mxu0 %v4057_v31  ;;  %v947_v5 = vpack.c.bf16 %v931_v11, %v930_v30 }
 0x121   : > { %v2913_v6 = vpop.f32.mrb[20].mxu0  ;;  %v3001_v46 = vpop.f32.mrb[20].mxu1 }
 0x122   : > { %v2914_v55 = vpop.f32.mrb[21].mxu0  ;;  %v3002_v34 = vpop.f32.mrb[21].mxu1 }
 0x123   : > { %v4199_v13 = vadd.f32 %v2914_v55, %v2913_v6  ;;  %v3003_v49 = vadd.f32 %v3002_v34, %v3001_v46  ;;  %v2916_v14 = vpop.f32.mrb[22].mxu0  ;;  %v3004_v20 = vpop.f32.mrb[22].mxu1  ;;  %v994_v55 = vld [vmem:[#allocation2 + $0x19a] sm:$0xff]  ;;  %v995_v34 = vld [vmem:[#allocation2 + $0x1a2] sm:$0xff] }
 0x124   : > { %v2917_v15 = vpop.f32.mrb[23].mxu0  ;;  %v3005_v27 = vpop.f32.mrb[23].mxu1 }
 0x125   : > { %v4202_v25 = vadd.f32 %v3003_v49, %v4151_v62  ;;  %v4204_v23 = vadd.f32 %v2917_v15, %v2916_v14  ;;  %v3006_v31 = vadd.f32 %v3005_v27, %v3004_v20  ;;  %v3484_v20 = vld [vmem:[#allocation2] sm:$0xff]  ;;  %v1011_v27 = vpack.c.bf16 %v995_v34, %v994_v55 }
 0x126   : > { %2360 = vmatmul.mubr.bf16.gmra.mrb[128].mxu1 %v880_v44  ;;  %3372 = vmatmul.mubr.bf16.gmra.mrb[128].mxu0 %v4071_v24  ;;  %v883_v15 = vpack.c.bf16 %v3484_v20, %v3484_v20 }
 0x127   : > { %v4208_v29 = vadd.f32 %v3006_v31, %v4155_v52  ;;  %2367 = vmatprep.mubr.bf16.mxu1 %v4132_v10  ;;  %3375 = vmatprep.mubr.bf16.mxu0 %v4080_v36 }
 0x129   : > { %v2919_v9 = vpop.f32.mrb[24].mxu0  ;;  %v3007_v51 = vpop.f32.mrb[24].mxu1 }
 0x12a   : > { %v2920_v28 = vpop.f32.mrb[25].mxu0  ;;  %v3008_v62 = vpop.f32.mrb[25].mxu1 }
 0x12b   : > { %v4212_v7 = vadd.f32 %v2920_v28, %v2919_v9  ;;  %v3009_v42 = vadd.f32 %v3008_v62, %v3007_v51  ;;  %v2922_v21 = vpop.f32.mrb[26].mxu0  ;;  %v3010_v2 = vpop.f32.mrb[26].mxu1 }
 0x12c   : > { %v2923_v24 = vpop.f32.mrb[27].mxu0  ;;  %v3011_v54 = vpop.f32.mrb[27].mxu1 }
 0x12d   : > { %v4215_v52 = vadd.f32 %v3009_v42, %v4162_v16  ;;  %v4217_v10 = vadd.f32 %v2923_v24, %v2922_v21  ;;  %v3012_v36 = vadd.f32 %v3011_v54, %v3010_v2 }
 0x12e   : > { %2368 = vmatmul.mubr.bf16.gmra.mrb[132].mxu1 %v881_v38  ;;  %3376 = vmatmul.mubr.bf16.gmra.mrb[132].mxu0 %v4086_v26 }
 0x12f   : > { %v4221_v58 = vadd.f32 %v3012_v36, %v4166_v43  ;;  %2375 = vmatprep.mubr.bf16.mxu1 %v4026_v0  ;;  %3379 = vmatprep.mubr.bf16.mxu0 %v4092_v59 }
 0x131   : > { %v2925_v40 = vpop.f32.mrb[28].mxu0  ;;  %v3013_v61 = vpop.f32.mrb[28].mxu1 }
 0x132   : > { %v2926_v56 = vpop.f32.mrb[29].mxu0  ;;  %v3014_v16 = vpop.f32.mrb[29].mxu1 }
 0x133   : > { %v4225_v57 = vadd.f32 %v2926_v56, %v2925_v40  ;;  %v3015_v32 = vadd.f32 %v3014_v16, %v3013_v61  ;;  %v2928_v4 = vpop.f32.mrb[30].mxu0  ;;  %v3016_v19 = vpop.f32.mrb[30].mxu1 }
 0x134   : > { %v2929_v26 = vpop.f32.mrb[31].mxu0  ;;  %v3017_v6 = vpop.f32.mrb[31].mxu1 }
 0x135   : > { %v4228_v43 = vadd.f32 %v3015_v32, %v4174_v35  ;;  %v4230_v0 = vadd.f32 %v2929_v26, %v2928_v4  ;;  %v3018_v59 = vadd.f32 %v3017_v6, %v3016_v19 }
 0x136   : > { %2376 = vmatmul.mubr.bf16.gmra.mrb[136].mxu1 %v4094_v53  ;;  %3380 = vmatmul.mubr.bf16.gmra.mrb[136].mxu0 %v4100_v41 }
 0x137   : > { %v4235_v46 = vadd.f32 %v3018_v59, %v4178_v48  ;;  %2383 = vmatprep.mubr.bf16.mxu1 %v947_v5  ;;  %3383 = vmatprep.mubr.bf16.mxu0 %v4134_v33 }
 0x139   : > { %v2931_v44 = vpop.f32.mrb[32].mxu0  ;;  %v3019_v49 = vpop.f32.mrb[32].mxu1 }
 0x13a   : > { %v2932_v14 = vpop.f32.mrb[33].mxu0  ;;  %v3020_v35 = vpop.f32.mrb[33].mxu1 }
 0x13b   : > { %v4238_v31 = vadd.f32 %v2932_v14, %v2931_v44  ;;  %v3021_v53 = vadd.f32 %v3020_v35, %v3019_v49  ;;  %v2934_v18 = vpop.f32.mrb[34].mxu0  ;;  %v3022_v41 = vpop.f32.mrb[34].mxu1 }
 0x13c   : > { %v2935_v50 = vpop.f32.mrb[35].mxu0  ;;  %v3023_v48 = vpop.f32.mrb[35].mxu1 }
 0x13d   : > { %v4241_v9 = vadd.f32 %v3021_v53, %v4186_v17  ;;  %v2936_v33 = vadd.f32 %v2935_v50, %v2934_v18  ;;  %v3024_v51 = vadd.f32 %v3023_v48, %v3022_v41 }
 0x13e   : > { %2384 = vmatmul.mubr.bf16.gmra.mrb[140].mxu1 %v883_v15  ;;  %3384 = vmatmul.mubr.bf16.gmra.mrb[140].mxu0 %v1011_v27 }
 0x13f   : > { %v4244_v28 = vadd.f32 %v3024_v51, %v4191_v22 }
 0x141   : > { %v2937_v62 = vpop.f32.mrb[36].mxu0  ;;  %v3025_v38 = vpop.f32.mrb[36].mxu1 }
 0x142   : > { %v2938_v42 = vpop.f32.mrb[37].mxu0  ;;  %v3026_v21 = vpop.f32.mrb[37].mxu1 }
 0x143   : > { %v4246_v2 = vadd.f32 %v2938_v42, %v2937_v62  ;;  %v3027_v24 = vadd.f32 %v3026_v21, %v3025_v38  ;;  %v2940_v54 = vpop.f32.mrb[38].mxu0  ;;  %v3028_v36 = vpop.f32.mrb[38].mxu1 }
 0x144   : > { %v2941_v30 = vpop.f32.mrb[39].mxu0  ;;  %v3029_v11 = vpop.f32.mrb[39].mxu1 }
 0x145   : > { %v4249_v17 = vadd.f32 %v3027_v24, %v4199_v13  ;;  %v2942_v40 = vadd.f32 %v2941_v30, %v2940_v54  ;;  %v3030_v61 = vadd.f32 %v3029_v11, %v3028_v36 }
 0x147   : > { %v4252_v56 = vadd.f32 %v3030_v61, %v4204_v23 }
 0x149   : > { %v2943_v22 = vpop.f32.mrb[40].mxu0  ;;  %v3031_v16 = vpop.f32.mrb[40].mxu1 }
 0x14a   : > { %v2944_v32 = vpop.f32.mrb[41].mxu0  ;;  %v3032_v4 = vpop.f32.mrb[41].mxu1 }
 0x14b   : > { %v4254_v19 = vadd.f32 %v2944_v32, %v2943_v22  ;;  %v3033_v5 = vadd.f32 %v3032_v4, %v3031_v16  ;;  %v2946_v26 = vpop.f32.mrb[42].mxu0  ;;  %v3034_v6 = vpop.f32.mrb[42].mxu1 }
 0x14c   : > { %v2947_v59 = vpop.f32.mrb[43].mxu0  ;;  %v3035_v55 = vpop.f32.mrb[43].mxu1 }
 0x14d   : > { %v4257_v34 = vadd.f32 %v3033_v5, %v4212_v7  ;;  %v4259_v13 = vadd.f32 %v2947_v59, %v2946_v26  ;;  %v3036_v44 = vadd.f32 %v3035_v55, %v3034_v6 }
 0x14f   : > { %v4262_v23 = vadd.f32 %v3036_v44, %v4217_v10 }
 0x151   : > { %v2949_v49 = vpop.f32.mrb[44].mxu0  ;;  %v3037_v14 = vpop.f32.mrb[44].mxu1 }
 0x152   : > { %v2950_v35 = vpop.f32.mrb[45].mxu0  ;;  %v3038_v20 = vpop.f32.mrb[45].mxu1 }
 0x153   : > { %v4264_v15 = vadd.f32 %v2950_v35, %v2949_v49  ;;  %v3039_v27 = vadd.f32 %v3038_v20, %v3037_v14  ;;  %v2952_v53 = vpop.f32.mrb[46].mxu0  ;;  %v3040_v18 = vpop.f32.mrb[46].mxu1 }
 0x154   : > { %v2953_v41 = vpop.f32.mrb[47].mxu0  ;;  %v3041_v50 = vpop.f32.mrb[47].mxu1 }
 0x155   : > { %v4267_v7 = vadd.f32 %v3039_v27, %v4225_v57  ;;  %v4269_v48 = vadd.f32 %v2953_v41, %v2952_v53  ;;  %v3042_v51 = vadd.f32 %v3041_v50, %v3040_v18 }
 0x157   : > { %v4272_v10 = vadd.f32 %v3042_v51, %v4230_v0 }
 0x159   : > { %v3043_v62 = vpop.f32.mrb[48].mxu1  ;;  %v3107_v38 = vpop.f32.mrb[48].mxu0 }
 0x15a   : > { %v3044_v42 = vpop.f32.mrb[49].mxu1  ;;  %v3108_v21 = vpop.f32.mrb[49].mxu0 }
 0x15b   : > { %v3045_v24 = vadd.f32 %v3044_v42, %v3043_v62  ;;  %v3109_v54 = vadd.f32 %v3108_v21, %v3107_v38  ;;  %v3046_v36 = vpop.f32.mrb[50].mxu1  ;;  %v3110_v30 = vpop.f32.mrb[50].mxu0 }
 0x15c   : > { %v3047_v11 = vpop.f32.mrb[51].mxu1  ;;  %v3111_v61 = vpop.f32.mrb[51].mxu0 }
 0x15d   : > { %v4275_v22 = vadd.f32 %v3045_v24, %v4238_v31  ;;  %v4278_v57 = vadd.f32 %v3109_v54, %v4189_v8  ;;  %v3048_v16 = vadd.f32 %v3047_v11, %v3046_v36  ;;  %v3112_v32 = vadd.f32 %v3111_v61, %v3110_v30 }
 0x15f   : > { %v4280_v0 = vadd.f32 %v3048_v16, %v2936_v33  ;;  %v4283_v4 = vadd.f32 %v3112_v32, %v4195_v3 }
 0x161   : > { %v3049_v5 = vpop.f32.mrb[52].mxu1  ;;  %v3113_v26 = vpop.f32.mrb[52].mxu0 }
 0x162   : > { %v3050_v6 = vpop.f32.mrb[53].mxu1  ;;  %v3114_v59 = vpop.f32.mrb[53].mxu0 }
 0x163   : > { %v3051_v55 = vadd.f32 %v3050_v6, %v3049_v5  ;;  %v3115_v44 = vadd.f32 %v3114_v59, %v3113_v26  ;;  %v3052_v49 = vpop.f32.mrb[54].mxu1  ;;  %v3116_v14 = vpop.f32.mrb[54].mxu0 }
 0x164   : > { %v3053_v31 = vpop.f32.mrb[55].mxu1  ;;  %v3117_v35 = vpop.f32.mrb[55].mxu0 }
 0x165   : > { %v4286_v8 = vadd.f32 %v3051_v55, %v4246_v2  ;;  %v4289_v20 = vadd.f32 %v3115_v44, %v4202_v25  ;;  %v3054_v33 = vadd.f32 %v3053_v31, %v3052_v49  ;;  %v3118_v27 = vadd.f32 %v3117_v35, %v3116_v14 }
 0x167   : > { %v4291_v3 = vadd.f32 %v3054_v33, %v2942_v40  ;;  %v4294_v53 = vadd.f32 %v3118_v27, %v4208_v29 }
 0x169   : > { %v3055_v18 = vpop.f32.mrb[56].mxu1  ;;  %v3119_v41 = vpop.f32.mrb[56].mxu0 }
 0x16a   : > { %v3056_v50 = vpop.f32.mrb[57].mxu1  ;;  %v3120_v51 = vpop.f32.mrb[57].mxu0 }
 0x16b   : > { %v3057_v62 = vadd.f32 %v3056_v50, %v3055_v18  ;;  %v3121_v38 = vadd.f32 %v3120_v51, %v3119_v41  ;;  %v3058_v42 = vpop.f32.mrb[58].mxu1  ;;  %v3122_v21 = vpop.f32.mrb[58].mxu0 }
 0x16c   : > { %v3059_v2 = vpop.f32.mrb[59].mxu1  ;;  %v3123_v24 = vpop.f32.mrb[59].mxu0 }
 0x16d   : > { %v4297_v25 = vadd.f32 %v3057_v62, %v4254_v19  ;;  %v4300_v54 = vadd.f32 %v3121_v38, %v4215_v52  ;;  %v3060_v40 = vadd.f32 %v3059_v2, %v3058_v42  ;;  %v3124_v36 = vadd.f32 %v3123_v24, %v3122_v21 }
 0x16f   : > { %v4303_v29 = vadd.f32 %v3060_v40, %v4259_v13  ;;  %v4306_v30 = vadd.f32 %v3124_v36, %v4221_v58 }
 0x171   : > { %v3061_v11 = vpop.f32.mrb[60].mxu1  ;;  %v3125_v61 = vpop.f32.mrb[60].mxu0 }
 0x172   : > { %v3062_v16 = vpop.f32.mrb[61].mxu1  ;;  %v3126_v32 = vpop.f32.mrb[61].mxu0 }
 0x173   : > { %v3063_v5 = vadd.f32 %v3062_v16, %v3061_v11  ;;  %v3127_v26 = vadd.f32 %v3126_v32, %v3125_v61  ;;  %v3064_v6 = vpop.f32.mrb[62].mxu1  ;;  %v3128_v19 = vpop.f32.mrb[62].mxu0 }
 0x174   : > { %v3065_v59 = vpop.f32.mrb[63].mxu1  ;;  %v3129_v55 = vpop.f32.mrb[63].mxu0 }
 0x175   : > { %v4309_v52 = vadd.f32 %v3063_v5, %v4264_v15  ;;  %v4312_v44 = vadd.f32 %v3127_v26, %v4228_v43  ;;  %v3066_v13 = vadd.f32 %v3065_v59, %v3064_v6  ;;  %v3130_v49 = vadd.f32 %v3129_v55, %v3128_v19 }
 0x177   : > { %v4315_v58 = vadd.f32 %v3066_v13, %v4269_v48  ;;  %v4318_v14 = vadd.f32 %v3130_v49, %v4235_v46 }
 0x179   : > { %v3067_v31 = vpop.f32.mrb[64].mxu1  ;;  %v3131_v35 = vpop.f32.mrb[64].mxu0 }
 0x17a   : > { %v3068_v33 = vpop.f32.mrb[65].mxu1  ;;  %v3132_v27 = vpop.f32.mrb[65].mxu0 }
 0x17b   : > { %v3069_v18 = vadd.f32 %v3068_v33, %v3067_v31  ;;  %v3133_v41 = vadd.f32 %v3132_v27, %v3131_v35  ;;  %v3070_v50 = vpop.f32.mrb[66].mxu1  ;;  %v3134_v15 = vpop.f32.mrb[66].mxu0 }
 0x17c   : > { %v3071_v51 = vpop.f32.mrb[67].mxu1  ;;  %v3135_v62 = vpop.f32.mrb[67].mxu0 }
 0x17d   : > { %v4321_v43 = vadd.f32 %v3069_v18, %v4142_v37  ;;  %v4324_v38 = vadd.f32 %v3133_v41, %v4241_v9  ;;  %v3072_v48 = vadd.f32 %v3071_v51, %v3070_v50  ;;  %v3136_v42 = vadd.f32 %v3135_v62, %v3134_v15 }
 0x17f   : > { %v4327_v46 = vadd.f32 %v3072_v48, %v4146_v60  ;;  %v4330_v21 = vadd.f32 %v3136_v42, %v4244_v28 }
 0x181   : > { %v3073_v2 = vpop.f32.mrb[68].mxu1  ;;  %v3137_v24 = vpop.f32.mrb[68].mxu0 }
 0x182   : > { %v3074_v40 = vpop.f32.mrb[69].mxu1  ;;  %v3138_v36 = vpop.f32.mrb[69].mxu0 }
 0x183   : > { %v3075_v11 = vadd.f32 %v3074_v40, %v3073_v2  ;;  %v3139_v61 = vadd.f32 %v3138_v36, %v3137_v24  ;;  %v3076_v16 = vpop.f32.mrb[70].mxu1  ;;  %v3140_v37 = vpop.f32.mrb[70].mxu0 }
 0x184   : > { %v3077_v32 = vpop.f32.mrb[71].mxu1  ;;  %v3141_v5 = vpop.f32.mrb[71].mxu0 }
 0x185   : > { %v4333_v9 = vadd.f32 %v3075_v11, %v4153_v1  ;;  %v4336_v26 = vadd.f32 %v3139_v61, %v4249_v17  ;;  %v3078_v60 = vadd.f32 %v3077_v32, %v3076_v16  ;;  %v3142_v6 = vadd.f32 %v3141_v5, %v3140_v37 }
 0x187   : > { %v4339_v28 = vadd.f32 %v3078_v60, %v4157_v39  ;;  %v4342_v19 = vadd.f32 %v3142_v6, %v4252_v56 }
 0x189   : > { %v3079_v59 = vpop.f32.mrb[72].mxu1  ;;  %v3143_v55 = vpop.f32.mrb[72].mxu0 }
 0x18a   : > { %v3080_v13 = vpop.f32.mrb[73].mxu1  ;;  %v3144_v49 = vpop.f32.mrb[73].mxu0 }
 0x18b   : > { %v3081_v31 = vadd.f32 %v3080_v13, %v3079_v59  ;;  %v3145_v35 = vadd.f32 %v3144_v49, %v3143_v55  ;;  %v3082_v33 = vpop.f32.mrb[74].mxu1  ;;  %v3146_v1 = vpop.f32.mrb[74].mxu0 }
 0x18c   : > { %v3083_v27 = vpop.f32.mrb[75].mxu1  ;;  %v3147_v18 = vpop.f32.mrb[75].mxu0 }
 0x18d   : > { %v4345_v17 = vadd.f32 %v3081_v31, %v4164_v47  ;;  %v4348_v41 = vadd.f32 %v3145_v35, %v4257_v34  ;;  %v3084_v39 = vadd.f32 %v3083_v27, %v3082_v33  ;;  %v3148_v50 = vadd.f32 %v3147_v18, %v3146_v1 }
 0x18f   : > { %v4351_v56 = vadd.f32 %v3084_v39, %v4168_v45  ;;  %v4354_v15 = vadd.f32 %v3148_v50, %v4262_v23 }
 0x191   : > { %v3085_v51 = vpop.f32.mrb[76].mxu1  ;;  %v3149_v62 = vpop.f32.mrb[76].mxu0 }
 0x192   : > { %v3086_v48 = vpop.f32.mrb[77].mxu1  ;;  %v3150_v42 = vpop.f32.mrb[77].mxu0 }
 0x193   : > { %v3087_v2 = vadd.f32 %v3086_v48, %v3085_v51  ;;  %v3151_v24 = vadd.f32 %v3150_v42, %v3149_v62  ;;  %v3088_v40 = vpop.f32.mrb[78].mxu1  ;;  %v3152_v47 = vpop.f32.mrb[78].mxu0 }
 0x194   : > { %v3089_v36 = vpop.f32.mrb[79].mxu1  ;;  %v3153_v11 = vpop.f32.mrb[79].mxu0 }
 0x195   : > { %v4357_v34 = vadd.f32 %v3087_v2, %v4176_v12  ;;  %v4360_v61 = vadd.f32 %v3151_v24, %v4267_v7  ;;  %v3090_v45 = vadd.f32 %v3089_v36, %v3088_v40  ;;  %v3154_v16 = vadd.f32 %v3153_v11, %v3152_v47 }
 0x197   : > { %v4363_v23 = vadd.f32 %v3090_v45, %v4180_v63  ;;  %v4366_v37 = vadd.f32 %v3154_v16, %v4272_v10 }
 0x199   : > { %v3155_v32 = vpop.f32.mrb[80].mxu0  ;;  %v3219_v5 = vpop.f32.mrb[80].mxu1 }
 0x19a   : > { %v3156_v60 = vpop.f32.mrb[81].mxu0  ;;  %v3220_v6 = vpop.f32.mrb[81].mxu1 }
 0x19b   : > { %v3157_v59 = vadd.f32 %v3156_v60, %v3155_v32  ;;  %v3221_v55 = vadd.f32 %v3220_v6, %v3219_v5  ;;  %v3158_v13 = vpop.f32.mrb[82].mxu0  ;;  %v3222_v12 = vpop.f32.mrb[82].mxu1 }
 0x19c   : > { %v3159_v49 = vpop.f32.mrb[83].mxu0  ;;  %v3223_v31 = vpop.f32.mrb[83].mxu1 }
 0x19d   : > { %v4369_v7 = vadd.f32 %v3157_v59, %v4275_v22  ;;  %v3160_v35 = vadd.f32 %v3159_v49, %v3158_v13  ;;  %v3224_v33 = vadd.f32 %v3223_v31, %v3222_v12  ;;  %v4372_v63 = vadd.f32 %v3221_v55, %v4278_v57 }
 0x19f   : > { %v4375_v10 = vadd.f32 %v3160_v35, %v4280_v0  ;;  %v4378_v1 = vadd.f32 %v3224_v33, %v4283_v4 }
 0x1a1   : > { %v3161_v27 = vpop.f32.mrb[84].mxu0  ;;  %v3225_v18 = vpop.f32.mrb[84].mxu1 }
 0x1a2   : > { %v3162_v39 = vpop.f32.mrb[85].mxu0  ;;  %v3226_v50 = vpop.f32.mrb[85].mxu1 }
 0x1a3   : > { %v3163_v51 = vadd.f32 %v3162_v39, %v3161_v27  ;;  %v3227_v62 = vadd.f32 %v3226_v50, %v3225_v18  ;;  %v3164_v48 = vpop.f32.mrb[86].mxu0  ;;  %v3228_v22 = vpop.f32.mrb[86].mxu1 }
 0x1a4   : > { %v3165_v42 = vpop.f32.mrb[87].mxu0  ;;  %v3229_v2 = vpop.f32.mrb[87].mxu1 }
 0x1a5   : > { %v4381_v24 = vadd.f32 %v3163_v51, %v4286_v8  ;;  %v3166_v57 = vadd.f32 %v3165_v42, %v3164_v48  ;;  %v3230_v40 = vadd.f32 %v3229_v2, %v3228_v22  ;;  %v4384_v0 = vadd.f32 %v3227_v62, %v4289_v20 }
 0x1a7   : > { %v4387_v4 = vadd.f32 %v3166_v57, %v4291_v3  ;;  %v4390_v47 = vadd.f32 %v3230_v40, %v4294_v53 }
 0x1a9   : > { %v3167_v36 = vpop.f32.mrb[88].mxu0  ;;  %v3231_v11 = vpop.f32.mrb[88].mxu1 }
 0x1aa   : > { %v3168_v45 = vpop.f32.mrb[89].mxu0  ;;  %v3232_v16 = vpop.f32.mrb[89].mxu1 }
 0x1ab   : > { %v3169_v32 = vadd.f32 %v3168_v45, %v3167_v36  ;;  %v3233_v5 = vadd.f32 %v3232_v16, %v3231_v11  ;;  %v3170_v60 = vpop.f32.mrb[90].mxu0  ;;  %v3234_v8 = vpop.f32.mrb[90].mxu1 }
 0x1ac   : > { %v3171_v6 = vpop.f32.mrb[91].mxu0  ;;  %v3235_v59 = vpop.f32.mrb[91].mxu1 }
 0x1ad   : > { %v4393_v55 = vadd.f32 %v3169_v32, %v4297_v25  ;;  %v3172_v20 = vadd.f32 %v3171_v6, %v3170_v60  ;;  %v3236_v13 = vadd.f32 %v3235_v59, %v3234_v8  ;;  %v4396_v3 = vadd.f32 %v3233_v5, %v4300_v54 }
 0x1af   : > { %v4399_v53 = vadd.f32 %v3172_v20, %v4303_v29  ;;  %v4402_v12 = vadd.f32 %v3236_v13, %v4306_v30 }
 0x1b1   : > { %v3173_v49 = vpop.f32.mrb[92].mxu0  ;;  %v3237_v31 = vpop.f32.mrb[92].mxu1 }
 0x1b2   : > { %v3174_v35 = vpop.f32.mrb[93].mxu0  ;;  %v3238_v33 = vpop.f32.mrb[93].mxu1 }
 0x1b3   : > { %v3175_v27 = vadd.f32 %v3174_v35, %v3173_v49  ;;  %v3239_v18 = vadd.f32 %v3238_v33, %v3237_v31  ;;  %v3176_v39 = vpop.f32.mrb[94].mxu0  ;;  %v3240_v25 = vpop.f32.mrb[94].mxu1 }
 0x1b4   : > { %v3177_v50 = vpop.f32.mrb[95].mxu0  ;;  %v3241_v51 = vpop.f32.mrb[95].mxu1 }
 0x1b5   : > { %v4405_v62 = vadd.f32 %v3175_v27, %v4309_v52  ;;  %v3178_v54 = vadd.f32 %v3177_v50, %v3176_v39  ;;  %v3242_v48 = vadd.f32 %v3241_v51, %v3240_v25  ;;  %v4408_v29 = vadd.f32 %v3239_v18, %v4312_v44 }
 0x1b7   : > { %v4411_v30 = vadd.f32 %v3178_v54, %v4315_v58  ;;  %v4414_v22 = vadd.f32 %v3242_v48, %v4318_v14 }
 0x1b9   : > { %v3179_v42 = vpop.f32.mrb[96].mxu0  ;;  %v3243_v2 = vpop.f32.mrb[96].mxu1 }
 0x1ba   : > { %v3180_v57 = vpop.f32.mrb[97].mxu0  ;;  %v3244_v40 = vpop.f32.mrb[97].mxu1 }
 0x1bb   : > { %v3181_v36 = vadd.f32 %v3180_v57, %v3179_v42  ;;  %v3245_v11 = vadd.f32 %v3244_v40, %v3243_v2  ;;  %v3182_v45 = vpop.f32.mrb[98].mxu0  ;;  %v3246_v52 = vpop.f32.mrb[98].mxu1 }
 0x1bc   : > { %v3183_v16 = vpop.f32.mrb[99].mxu0  ;;  %v3247_v32 = vpop.f32.mrb[99].mxu1 }
 0x1bd   : > { %v4417_v5 = vadd.f32 %v3181_v36, %v4321_v43  ;;  %v3184_v44 = vadd.f32 %v3183_v16, %v3182_v45  ;;  %v3248_v60 = vadd.f32 %v3247_v32, %v3246_v52  ;;  %v4420_v58 = vadd.f32 %v3245_v11, %v4324_v38 }
 0x1bf   : > { %v4423_v14 = vadd.f32 %v3184_v44, %v4327_v46  ;;  %v4426_v8 = vadd.f32 %v3248_v60, %v4330_v21 }
 0x1c1   : > { %v3185_v6 = vpop.f32.mrb[100].mxu0  ;;  %v3249_v59 = vpop.f32.mrb[100].mxu1 }
 0x1c2   : > { %v3186_v20 = vpop.f32.mrb[101].mxu0  ;;  %v3250_v13 = vpop.f32.mrb[101].mxu1 }
 0x1c3   : > { %v3187_v49 = vadd.f32 %v3186_v20, %v3185_v6  ;;  %v3251_v31 = vadd.f32 %v3250_v13, %v3249_v59  ;;  %v3188_v35 = vpop.f32.mrb[102].mxu0  ;;  %v3252_v43 = vpop.f32.mrb[102].mxu1 }
 0x1c4   : > { %v3189_v33 = vpop.f32.mrb[103].mxu0  ;;  %v3253_v27 = vpop.f32.mrb[103].mxu1 }
 0x1c5   : > { %v4429_v18 = vadd.f32 %v3187_v49, %v4333_v9  ;;  %v3190_v38 = vadd.f32 %v3189_v33, %v3188_v35  ;;  %v3254_v39 = vadd.f32 %v3253_v27, %v3252_v43  ;;  %v4432_v46 = vadd.f32 %v3251_v31, %v4336_v26 }
 0x1c7   : > { %v4435_v21 = vadd.f32 %v3190_v38, %v4339_v28  ;;  %v4438_v25 = vadd.f32 %v3254_v39, %v4342_v19 }
 0x1c9   : > { %v3191_v50 = vpop.f32.mrb[104].mxu0  ;;  %v3255_v51 = vpop.f32.mrb[104].mxu1 }
 0x1ca   : > { %v3192_v54 = vpop.f32.mrb[105].mxu0  ;;  %v3256_v48 = vpop.f32.mrb[105].mxu1 }
 0x1cb   : > { %v3193_v42 = vadd.f32 %v3192_v54, %v3191_v50  ;;  %v3257_v2 = vadd.f32 %v3256_v48, %v3255_v51  ;;  %v3194_v57 = vpop.f32.mrb[106].mxu0  ;;  %v3258_v9 = vpop.f32.mrb[106].mxu1 }
 0x1cc   : > { %v3195_v40 = vpop.f32.mrb[107].mxu0  ;;  %v3259_v36 = vpop.f32.mrb[107].mxu1 }
 0x1cd   : > { %v4441_v11 = vadd.f32 %v3193_v42, %v4345_v17  ;;  %v3196_v26 = vadd.f32 %v3195_v40, %v3194_v57  ;;  %v3260_v45 = vadd.f32 %v3259_v36, %v3258_v9  ;;  %v4444_v28 = vadd.f32 %v3257_v2, %v4348_v41 }
 0x1cf   : > { %v4447_v19 = vadd.f32 %v3196_v26, %v4351_v56  ;;  %v4450_v52 = vadd.f32 %v3260_v45, %v4354_v15 }
 0x1d1   : > { %v3197_v16 = vpop.f32.mrb[108].mxu0  ;;  %v3261_v32 = vpop.f32.mrb[108].mxu1 }
 0x1d2   : > { %v3198_v44 = vpop.f32.mrb[109].mxu0  ;;  %v3262_v60 = vpop.f32.mrb[109].mxu1 }
 0x1d3   : > { %v3199_v6 = vadd.f32 %v3198_v44, %v3197_v16  ;;  %v3263_v59 = vadd.f32 %v3262_v60, %v3261_v32  ;;  %v3200_v17 = vpop.f32.mrb[110].mxu0  ;;  %v3264_v20 = vpop.f32.mrb[110].mxu1 }
 0x1d4   : > { %v3201_v13 = vpop.f32.mrb[111].mxu0  ;;  %v3265_v49 = vpop.f32.mrb[111].mxu1 }
 0x1d5   : > { %v4453_v41 = vadd.f32 %v3199_v6, %v4357_v34  ;;  %v3202_v31 = vadd.f32 %v3201_v13, %v3200_v17  ;;  %v3266_v56 = vadd.f32 %v3265_v49, %v3264_v20  ;;  %v4456_v35 = vadd.f32 %v3263_v59, %v4360_v61 }
 0x1d7   : > { %v4459_v15 = vadd.f32 %v3202_v31, %v4363_v23  ;;  %v4462_v43 = vadd.f32 %v3266_v56, %v4366_v37 }
 0x1d9   : > { %v3267_v33 = vpop.f32.mrb[112].mxu1  ;;  %v3357_v34 = vpop.f32.mrb[112].mxu0 }
 0x1da   : > { %v2435_v61 = vadd.f32 %v3357_v34, %v4384_v0  ;;  %v3268_v27 = vpop.f32.mrb[113].mxu1  ;;  %v2426_v23 = vpop.f32.mrb[113].mxu0 }
 0x1db   : > { %v3269_v38 = vadd.f32 %v3268_v27, %v3267_v33  ;;  %v2427_v37 = vadd.f32 %v2426_v23, %v4372_v63  ;;  %v3270_v39 = vpop.f32.mrb[114].mxu1  ;;  %v3358_v50 = vpop.f32.mrb[114].mxu0 }
 0x1dc   : > { %2555 = vst [vmem:[%s4469_s24 + $0x10] sm:$0xff] %v2435_v61  ;;  %v2438_v51 = vadd.f32 %v3358_v50, %v4390_v47  ;;  %v3271_v54 = vpop.f32.mrb[115].mxu1  ;;  %v2429_v48 = vpop.f32.mrb[115].mxu0  ;;  %v2625_v36 = vmul.f32 %v2435_v61, %v2435_v61 }
 0x1dd   : > { %2553 = vst [vmem:[%s4469_s24] sm:$0xff] %v2427_v37  ;;  %v3272_v42 = vadd.f32 %v3271_v54, %v3270_v39  ;;  %v2430_v2 = vadd.f32 %v2429_v48, %v4378_v1  ;;  %v4478_v57 = vadd.f32 %v3269_v38, %v4369_v7  ;;  %v2623_v0 = vmul.f32 %v2427_v37, %v2427_v37 }
 0x1de   : > { %2556 = vst [vmem:[%s4469_s24 + $0x18] sm:$0xff] %v2438_v51  ;;  %v2626_v32 = vmul.f32 %v2438_v51, %v2438_v51 }
 0x1df   : > { %2554 = vst [vmem:[%s4469_s24 + $0x8] sm:$0xff] %v2430_v2  ;;  %v2585_v9 = vadd.f32 %v2430_v2, %v2427_v37  ;;  %v2624_v40 = vmul.f32 %v2430_v2, %v2430_v2  ;;  %v4483_v63 = vadd.f32 %v3272_v42, %v4375_v10 }
 0x1e1   : > { %v2586_v47 = vadd.f32 %v2585_v9, %v2435_v61  ;;  %v2655_v26 = vadd.f32 %v2624_v40, %v2623_v0  ;;  %v3273_v45 = vpop.f32.mrb[116].mxu1  ;;  %v3361_v16 = vpop.f32.mrb[116].mxu0 }
 0x1e2   : > { %v2451_v1 = vadd.f32 %v3361_v16, %v4408_v29  ;;  %v3274_v7 = vpop.f32.mrb[117].mxu1  ;;  %v2442_v44 = vpop.f32.mrb[117].mxu0 }
 0x1e3   : > { %v2656_v60 = vadd.f32 %v2655_v26, %v2625_v36  ;;  %v3275_v6 = vadd.f32 %v3274_v7, %v3273_v45  ;;  %v2443_v59 = vadd.f32 %v2442_v44, %v4396_v3  ;;  %v2587_v17 = vadd.f32 %v2586_v47, %v2438_v51  ;;  %v3276_v10 = vpop.f32.mrb[118].mxu1  ;;  %v3362_v20 = vpop.f32.mrb[118].mxu0 }
 0x1e4   : > { %2559 = vst [vmem:[%s4469_s24 + $0x30] sm:$0xff] %v2451_v1  ;;  %v2454_v13 = vadd.f32 %v3362_v20, %v4414_v22  ;;  %v3277_v49 = vpop.f32.mrb[119].mxu1  ;;  %v2445_v31 = vpop.f32.mrb[119].mxu0  ;;  %v2629_v50 = vmul.f32 %v2451_v1, %v2451_v1 }
 0x1e5   : > { %2557 = vst [vmem:[%s4469_s24 + $0x20] sm:$0xff] %v2443_v59  ;;  %v2588_v56 = vadd.f32 %v2587_v17, %v2443_v59  ;;  %v2627_v33 = vmul.f32 %v2443_v59, %v2443_v59  ;;  %v2657_v29 = vadd.f32 %v2656_v60, %v2626_v32  ;;  %v3278_v34 = vadd.f32 %v3277_v49, %v3276_v10 }
 0x1e6   : > { %2560 = vst [vmem:[%s4469_s24 + $0x38] sm:$0xff] %v2454_v13  ;;  %v2446_v61 = vadd.f32 %v2445_v31, %v4402_v12  ;;  %v4493_v27 = vadd.f32 %v3275_v6, %v4381_v24  ;;  %v2630_v9 = vmul.f32 %v2454_v13, %v2454_v13 }
 0x1e7   : > { %v2658_v3 = vadd.f32 %v2657_v29, %v2627_v33  ;;  %v4496_v23 = vadd.f32 %v3278_v34, %v4387_v4 }
 0x1e8   : > { %2558 = vst [vmem:[%s4469_s24 + $0x28] sm:$0xff] %v2446_v61  ;;  %v2589_v38 = vadd.f32 %v2588_v56, %v2446_v61  ;;  %v2628_v22 = vmul.f32 %v2446_v61, %v2446_v61 }
 0x1e9   : > { %v3279_v37 = vpop.f32.mrb[120].mxu1  ;;  %v3365_v39 = vpop.f32.mrb[120].mxu0 }
 0x1ea   : > { %v2590_v51 = vadd.f32 %v2589_v38, %v2451_v1  ;;  %v2659_v54 = vadd.f32 %v2658_v3, %v2628_v22  ;;  %v2467_v48 = vadd.f32 %v3365_v39, %v4432_v46  ;;  %v3280_v12 = vpop.f32.mrb[121].mxu1  ;;  %v2458_v42 = vpop.f32.mrb[121].mxu0 }
 0x1eb   : > { %v3281_v24 = vadd.f32 %v3280_v12, %v3279_v37  ;;  %v2459_v2 = vadd.f32 %v2458_v42, %v4420_v58  ;;  %v3282_v0 = vpop.f32.mrb[122].mxu1  ;;  %v3366_v4 = vpop.f32.mrb[122].mxu0 }
 0x1ec   : > { %v2660_v40 = vadd.f32 %v2659_v54, %v2629_v50  ;;  %2563 = vst [vmem:[%s4469_s24 + $0x50] sm:$0xff] %v2467_v48  ;;  %v2591_v36 = vadd.f32 %v2590_v51, %v2454_v13  ;;  %v2470_v47 = vadd.f32 %v3366_v4, %v4438_v25  ;;  %v3283_v26 = vpop.f32.mrb[123].mxu1  ;;  %v2461_v45 = vpop.f32.mrb[123].mxu0  ;;  %v2633_v10 = vmul.f32 %v2467_v48, %v2467_v48 }
 0x1ed   : > { %2561 = vst [vmem:[%s4469_s24 + $0x40] sm:$0xff] %v2459_v2  ;;  %v2631_v16 = vmul.f32 %v2459_v2, %v2459_v2  ;;  %v3284_v46 = vadd.f32 %v3283_v26, %v3282_v0  ;;  %v2462_v32 = vadd.f32 %v2461_v45, %v4426_v8  ;;  %v4506_v1 = vadd.f32 %v3281_v24, %v4393_v55 }
 0x1ee   : > { %v2592_v58 = vadd.f32 %v2591_v36, %v2459_v2  ;;  %v2661_v7 = vadd.f32 %v2660_v40, %v2630_v9  ;;  %2564 = vst [vmem:[%s4469_s24 + $0x58] sm:$0xff] %v2470_v47  ;;  %v2634_v29 = vmul.f32 %v2470_v47, %v2470_v47 }
 0x1ef   : > { %2562 = vst [vmem:[%s4469_s24 + $0x48] sm:$0xff] %v2462_v32  ;;  %v2632_v44 = vmul.f32 %v2462_v32, %v2462_v32  ;;  %v4511_v60 = vadd.f32 %v3284_v46, %v4399_v53 }
 0x1f0   : > { %v2662_v6 = vadd.f32 %v2661_v7, %v2631_v16  ;;  %v2593_v25 = vadd.f32 %v2592_v58, %v2462_v32 }
 0x1f1   : > { %v3285_v59 = vpop.f32.mrb[124].mxu1  ;;  %v3369_v17 = vpop.f32.mrb[124].mxu0 }
 0x1f2   : > { %v2594_v20 = vadd.f32 %v2593_v25, %v2467_v48  ;;  %v2663_v8 = vadd.f32 %v2662_v6, %v2632_v44  ;;  %v2483_v55 = vadd.f32 %v3369_v17, %v4456_v35  ;;  %v3286_v13 = vpop.f32.mrb[125].mxu1  ;;  %v2474_v49 = vpop.f32.mrb[125].mxu0 }
 0x1f3   : > { %v3287_v31 = vadd.f32 %v3286_v13, %v3285_v59  ;;  %v2475_v56 = vadd.f32 %v2474_v49, %v4444_v28  ;;  %v3288_v33 = vpop.f32.mrb[126].mxu1  ;;  %v3370_v53 = vpop.f32.mrb[126].mxu0 }
 0x1f4   : > { %v2664_v34 = vadd.f32 %v2663_v8, %v2633_v10  ;;  %2567 = vst [vmem:[%s4469_s24 + $0x70] sm:$0xff] %v2483_v55  ;;  %v2595_v61 = vadd.f32 %v2594_v20, %v2470_v47  ;;  %v2486_v3 = vadd.f32 %v3370_v53, %v4462_v43  ;;  %v3289_v38 = vpop.f32.mrb[127].mxu1  ;;  %v2477_v22 = vpop.f32.mrb[127].mxu0  ;;  %v2637_v2 = vmul.f32 %v2483_v55, %v2483_v55 }
 0x1f5   : > { %2565 = vst [vmem:[%s4469_s24 + $0x60] sm:$0xff] %v2475_v56  ;;  %v2635_v37 = vmul.f32 %v2475_v56, %v2475_v56  ;;  %v3290_v35 = vadd.f32 %v3289_v38, %v3288_v33  ;;  %v2478_v39 = vadd.f32 %v2477_v22, %v4450_v52  ;;  %v2354_v50 = vadd.f32 %v3287_v31, %v4405_v62 }
 0x1f6   : > { %v2596_v28 = vadd.f32 %v2595_v61, %v2475_v56  ;;  %v2665_v51 = vadd.f32 %v2664_v34, %v2634_v29  ;;  %2568 = vst [vmem:[%s4469_s24 + $0x78] sm:$0xff] %v2486_v3 }
 0x1f7   : > { %2566 = vst [vmem:[%s4469_s24 + $0x68] sm:$0xff] %v2478_v39  ;;  %v2636_v54 = vmul.f32 %v2478_v39, %v2478_v39  ;;  %v2357_v48 = vadd.f32 %v3290_v35, %v4411_v30  ;;  %v2638_v30 = vmul.f32 %v2486_v3, %v2486_v3 }
 0x1f8   : > { %v2666_v12 = vadd.f32 %v2665_v51, %v2635_v37  ;;  %v2597_v42 = vadd.f32 %v2596_v28, %v2478_v39 }
 0x1f9   : > { %v3291_v43 = vpop.f32.mrb[128].mxu1  ;;  %v3373_v24 = vpop.f32.mrb[128].mxu0 }
 0x1fa   : > { %v2598_v0 = vadd.f32 %v2597_v42, %v2483_v55  ;;  %v2667_v4 = vadd.f32 %v2666_v12, %v2636_v54  ;;  %v2499_v52 = vadd.f32 %v3373_v24, %v4493_v27  ;;  %v3292_v9 = vpop.f32.mrb[129].mxu1  ;;  %v2490_v62 = vpop.f32.mrb[129].mxu0 }
 0x1fb   : > { %v3293_v40 = vadd.f32 %v3292_v9, %v3291_v43  ;;  %v2491_v36 = vadd.f32 %v2490_v62, %v4478_v57  ;;  %v3294_v47 = vpop.f32.mrb[130].mxu1  ;;  %v3374_v26 = vpop.f32.mrb[130].mxu0 }
 0x1fc   : > { %v2668_v45 = vadd.f32 %v2667_v4, %v2637_v2  ;;  %2571 = vst [vmem:[%s4469_s24 + $0x90] sm:$0xff] %v2499_v52  ;;  %v2599_v16 = vadd.f32 %v2598_v0, %v2486_v3  ;;  %v2502_v46 = vadd.f32 %v3374_v26, %v4496_v23  ;;  %v3295_v32 = vpop.f32.mrb[131].mxu1  ;;  %v2493_v58 = vpop.f32.mrb[131].mxu0  ;;  %v2641_v55 = vmul.f32 %v2499_v52, %v2499_v52 }
 0x1fd   : > { %2569 = vst [vmem:[%s4469_s24 + $0x80] sm:$0xff] %v2491_v36  ;;  %v2639_v7 = vmul.f32 %v2491_v36, %v2491_v36  ;;  %v3296_v27 = vadd.f32 %v3295_v32, %v3294_v47  ;;  %v2494_v44 = vadd.f32 %v2493_v58, %v4483_v63  ;;  %v2362_v6 = vadd.f32 %v3293_v40, %v4417_v5 }
 0x1fe   : > { %v2600_v57 = vadd.f32 %v2599_v16, %v2491_v36  ;;  %v2669_v25 = vadd.f32 %v2668_v45, %v2638_v30  ;;  %2572 = vst [vmem:[%s4469_s24 + $0x98] sm:$0xff] %v2502_v46 }
 0x1ff   : > { %2570 = vst [vmem:[%s4469_s24 + $0x88] sm:$0xff] %v2494_v44  ;;  %v2640_v59 = vmul.f32 %v2494_v44, %v2494_v44  ;;  %v2365_v17 = vadd.f32 %v3296_v27, %v4423_v14  ;;  %v2642_v14 = vmul.f32 %v2502_v46, %v2502_v46 }
 0x200   : > { %v2670_v10 = vadd.f32 %v2669_v25, %v2639_v7  ;;  %v2601_v20 = vadd.f32 %v2600_v57, %v2494_v44 }
 0x201   : > { %v3297_v23 = vpop.f32.mrb[132].mxu1  ;;  %v3377_v8 = vpop.f32.mrb[132].mxu0 }
 0x202   : > { %v2602_v13 = vadd.f32 %v2601_v20, %v2499_v52  ;;  %v2671_v49 = vadd.f32 %v2670_v10, %v2640_v59  ;;  %v2515_v31 = vadd.f32 %v3377_v8, %v2354_v50  ;;  %v3298_v63 = vpop.f32.mrb[133].mxu1  ;;  %v2506_v56 = vpop.f32.mrb[133].mxu0 }
 0x203   : > { %v3299_v5 = vadd.f32 %v3298_v63, %v3297_v23  ;;  %v2507_v33 = vadd.f32 %v2506_v56, %v4506_v1  ;;  %v3300_v53 = vpop.f32.mrb[134].mxu1  ;;  %v3378_v29 = vpop.f32.mrb[134].mxu0 }
 0x204   : > { %v2672_v34 = vadd.f32 %v2671_v49, %v2641_v55  ;;  %2575 = vst [vmem:[%s4469_s24 + $0xb0] sm:$0xff] %v2515_v31  ;;  %v2603_v61 = vadd.f32 %v2602_v13, %v2502_v46  ;;  %v2518_v3 = vadd.f32 %v3378_v29, %v2357_v48  ;;  %v3301_v38 = vpop.f32.mrb[135].mxu1  ;;  %v2509_v22 = vpop.f32.mrb[135].mxu0  ;;  %v2645_v24 = vmul.f32 %v2515_v31, %v2515_v31 }
 0x205   : > { %2573 = vst [vmem:[%s4469_s24 + $0xa0] sm:$0xff] %v2507_v33  ;;  %v2643_v37 = vmul.f32 %v2507_v33, %v2507_v33  ;;  %v3302_v35 = vadd.f32 %v3301_v38, %v3300_v53  ;;  %v2510_v39 = vadd.f32 %v2509_v22, %v4511_v60  ;;  %v2370_v50 = vadd.f32 %v3299_v5, %v4429_v18 }
 0x206   : > { %v2604_v28 = vadd.f32 %v2603_v61, %v2507_v33  ;;  %v2673_v1 = vadd.f32 %v2672_v34, %v2642_v14  ;;  %2576 = vst [vmem:[%s4469_s24 + $0xb8] sm:$0xff] %v2518_v3  ;;  %v2646_v36 = vmul.f32 %v2518_v3, %v2518_v3 }
 0x207   : > { %2574 = vst [vmem:[%s4469_s24 + $0xa8] sm:$0xff] %v2510_v39  ;;  %v2644_v51 = vmul.f32 %v2510_v39, %v2510_v39  ;;  %v2373_v54 = vadd.f32 %v3302_v35, %v4435_v21 }
 0x208   : > { %v2674_v12 = vadd.f32 %v2673_v1, %v2643_v37  ;;  %v2605_v42 = vadd.f32 %v2604_v28, %v2510_v39 }
 0x209   : > { %v3303_v48 = vpop.f32.mrb[136].mxu1  ;;  %v3381_v43 = vpop.f32.mrb[136].mxu0 }
 0x20a   : > { %v2606_v2 = vadd.f32 %v2605_v42, %v2515_v31  ;;  %v2675_v0 = vadd.f32 %v2674_v12, %v2644_v51  ;;  %v2531_v4 = vadd.f32 %v3381_v43, %v2370_v50  ;;  %v3304_v60 = vpop.f32.mrb[137].mxu1  ;;  %v2522_v52 = vpop.f32.mrb[137].mxu0 }
 0x20b   : > { %v3305_v18 = vadd.f32 %v3304_v60, %v3303_v48  ;;  %v2523_v9 = vadd.f32 %v2522_v52, %v2362_v6  ;;  %v3306_v62 = vpop.f32.mrb[138].mxu1  ;;  %v3382_v40 = vpop.f32.mrb[138].mxu0 }
 0x20c   : > { %v2676_v21 = vadd.f32 %v2675_v0, %v2645_v24  ;;  %2579 = vst [vmem:[%s4469_s24 + $0xd0] sm:$0xff] %v2531_v4  ;;  %v2607_v47 = vadd.f32 %v2606_v2, %v2518_v3  ;;  %v2534_v26 = vadd.f32 %v3382_v40, %v2373_v54  ;;  %v3307_v30 = vpop.f32.mrb[139].mxu1  ;;  %v2525_v45 = vpop.f32.mrb[139].mxu0  ;;  %v2649_v20 = vmul.f32 %v2531_v4, %v2531_v4 }
 0x20d   : > { %2577 = vst [vmem:[%s4469_s24 + $0xc0] sm:$0xff] %v2523_v9  ;;  %v2647_v16 = vmul.f32 %v2523_v9, %v2523_v9  ;;  %v3308_v46 = vadd.f32 %v3307_v30, %v3306_v62  ;;  %v2526_v32 = vadd.f32 %v2525_v45, %v2365_v17  ;;  %v2378_v58 = vadd.f32 %v3305_v18, %v4441_v11 }
 0x20e   : > { %v2608_v7 = vadd.f32 %v2607_v47, %v2523_v9  ;;  %v2677_v27 = vadd.f32 %v2676_v21, %v2646_v36  ;;  %2580 = vst [vmem:[%s4469_s24 + $0xd8] sm:$0xff] %v2534_v26  ;;  %v2650_v63 = vmul.f32 %v2534_v26, %v2534_v26 }
 0x20f   : > { %2578 = vst [vmem:[%s4469_s24 + $0xc8] sm:$0xff] %v2526_v32  ;;  %v2648_v44 = vmul.f32 %v2526_v32, %v2526_v32  ;;  %v2381_v6 = vadd.f32 %v3308_v46, %v4447_v19 }
 0x210   : > { %v2678_v57 = vadd.f32 %v2677_v27, %v2647_v16  ;;  %v2609_v25 = vadd.f32 %v2608_v7, %v2526_v32 }
 0x211   : > { %v3309_v59 = vpop.f32.mrb[140].mxu1  ;;  %v3385_v10 = vpop.f32.mrb[140].mxu0 }
 0x212   : > { %v2610_v23 = vadd.f32 %v2609_v25, %v2531_v4  ;;  %v2679_v8 = vadd.f32 %v2678_v57, %v2648_v44  ;;  %v3310_v55 = vpop.f32.mrb[141].mxu1  ;;  %v2538_v13 = vpop.f32.mrb[141].mxu0 }
 0x213   : > { %v3311_v17 = vadd.f32 %v3310_v55, %v3309_v59  ;;  %v2539_v49 = vadd.f32 %v2538_v13, %v2378_v58  ;;  %v3312_v11 = vpop.f32.mrb[142].mxu1  ;;  %v3386_v31 = vpop.f32.mrb[142].mxu0 }
 0x214   : > { %v2680_v56 = vadd.f32 %v2679_v8, %v2649_v20  ;;  %v2611_v5 = vadd.f32 %v2610_v23, %v2534_v26  ;;  %v3313_v19 = vpop.f32.mrb[143].mxu1  ;;  %v2541_v33 = vpop.f32.mrb[143].mxu0 }
 0x215   : > { %v2386_v53 = vadd.f32 %v3311_v17, %v4453_v41  ;;  %2581 = vst [vmem:[%s4469_s24 + $0xe0] sm:$0xff] %v2539_v49  ;;  %v2651_v29 = vmul.f32 %v2539_v49, %v2539_v49  ;;  %v3314_v14 = vadd.f32 %v3313_v19, %v3312_v11  ;;  %v2542_v34 = vadd.f32 %v2541_v33, %v2381_v6 }
 0x216   : > { %v2612_v61 = vadd.f32 %v2611_v5, %v2539_v49  ;;  %v2681_v3 = vadd.f32 %v2680_v56, %v2650_v63 }
 0x217   : > { %v2547_v38 = vadd.f32 %v3385_v10, %v2386_v53  ;;  %v2389_v22 = vadd.f32 %v3314_v14, %v4459_v15  ;;  %2582 = vst [vmem:[%s4469_s24 + $0xe8] sm:$0xff] %v2542_v34  ;;  %v2652_v37 = vmul.f32 %v2542_v34, %v2542_v34 }
 0x218   : > { %v2682_v35 = vadd.f32 %v2681_v3, %v2651_v29  ;;  %v2613_v39 = vadd.f32 %v2612_v61, %v2542_v34 }
 0x219   : > { %2583 = vst [vmem:[%s4469_s24 + $0xf0] sm:$0xff] %v2547_v38  ;;  %v2653_v50 = vmul.f32 %v2547_v38, %v2547_v38  ;;  %v2550_v28 = vadd.f32 %v3386_v31, %v2389_v22 }
 0x21a   : > { %v2614_v1 = vadd.f32 %v2613_v39, %v2547_v38  ;;  %v2683_v41 = vadd.f32 %v2682_v35, %v2652_v37 }
 0x21b   : > { %2584 = vst [vmem:[%s4469_s24 + $0xf8] sm:$0xff] %v2550_v28  ;;  %v2654_v51 = vmul.f32 %v2550_v28, %v2550_v28 }
 0x21c   : > { %v2615_v54 = vadd.f32 %v2614_v1, %v2550_v28  ;;  %v2684_v12 = vadd.f32 %v2683_v41, %v2653_v50 }
 0x21e   : > { %v2616_v42 = vrot.slane %v2615_v54, 4  ;;  %v2685_v48 = vadd.f32 %v2684_v12, %v2654_v51 }
 0x220   : > { %v2617_v43 = vadd.f32 %v2616_v42, %v2615_v54  ;;  %v2686_v24 = vrot.slane %v2685_v48, 4 }
 0x222   : > { %v2618_v2 = vrot.slane %v2617_v43, 2  ;;  %v2687_v15 = vadd.f32 %v2686_v24, %v2685_v48 }
 0x224   : > { %v2619_v0 = vadd.f32 %v2618_v2, %v2617_v43  ;;  %v2688_v4 = vrot.slane %v2687_v15, 2 }
 0x226   : > { %v2620_v60 = vrot.slane %v2619_v0, 1  ;;  %v2689_v52 = vadd.f32 %v2688_v4, %v2687_v15 }
 0x228   : > { %v2621_v18 = vadd.f32 %v2620_v60, %v2619_v0  ;;  %v2690_v9 = vrot.slane %v2689_v52, 1 }
 0x22a   : > { %2622 = vst [vmem:[%s235_s27] sm:$0x1] %v2621_v18  ;;  %v2691_v62 = vadd.f32 %v2690_v9, %v2689_v52 }
 0x22c   : > { %2692 = vst [vmem:[%s235_s27 + $0x1] sm:$0x1] %v2691_v62 }
 0x22d PF: > { %s16_s18 = sadd.s32 1, %s3491_s18  }
 0x22e   : > { %p13_p4 = scmp.ge.s32.totalorder %s16_s18, 4  }
 0x230   :  { %15 = sbr.rel (!%p13_p4) target bundleno = 1 (0x1), region = 81 }

</bundles_post_ra>
